<compile_context>
chip_gen: v6e
topology: v6e:2x2x1
jax: 0.10.0
libtpu: 0.0.40
codegen_flags: <defaults>
</compile_context>

<pallas_src>
import jax
import jax.numpy as jnp
import numpy as np
from jax import lax
from jax.experimental import pallas as pl

# ----- small, module-consistent hyperparameters -----
IMG_SIZE = 16
PATCH = 4
IN_CH = 4
EMBED = 32
DEPTH = 2
HEADS = 4
MLP_RATIO = 4.0
NUM_CLASSES = 10
BATCH = 2

N_PATCHES = (IMG_SIZE // PATCH) ** 2          # 16
SEQ = N_PATCHES + 1                           # 17 (cls token)
BS = BATCH * SEQ                              # 34 rows (batch folded into sublanes)
FFN = int(EMBED * MLP_RATIO)                  # 128
HEAD_DIM = EMBED // HEADS                     # 8
PATCH_DIM = IN_CH * PATCH * PATCH             # 64
LN_EPS = 1e-5
LANES = 128                                   # lane-dense slab width (one vreg)

# The slab packing below relies on these toy-size identities.
assert 4 * EMBED == LANES and FFN == LANES and 3 * EMBED + EMBED == LANES


# ---------------------------------------------------------------------------
# Fused Pallas kernel
# ---------------------------------------------------------------------------
def _layernorm(x, w, b):
    # one-pass LN: var = E[x^2] - E[x]^2 (half the cross-lane reductions)
    mu = jnp.mean(x, axis=-1, keepdims=True)
    ms = jnp.mean(x * x, axis=-1, keepdims=True)
    return (x - mu) * lax.rsqrt(ms - mu * mu + LN_EPS) * w + b


def vit_fused_kernel(patches_ref, base_ref, projw_ref, w_in_ref, w1_ref, w2_ref,
                     vec_ref, headw_ref, final_ref, o_ref):
    """Whole ViT forward in a single grid-less kernel invocation.

    Operands (all full-array VMEM windows, loaded once):
      patches (BS, 64) bf16         im2col patches, cls rows zero-padded
      base    (BS, E)  f32          cls_token / pos_embed / conv-bias additive base
      projw   (64, E)  bf16         conv-as-matmul weight
      w_in    (DEPTH, E, 4E) bf16   per-layer [Wq|Wk|Wv|Wo]
      w1      (DEPTH, E, FFN) bf16  per-layer linear1.weight.T
      w2      (DEPTH, FFN, E) bf16  per-layer linear2.weight.T
      vec     (DEPTH, 4, 128) f32   per-layer [bqkv|bo], [b1], [ln1w|ln1b|ln2w|ln2b], [b2|pad]
      headw   (E, 128) bf16         head weight, classes zero-padded to 128 lanes
      final   (2, 128) f32          [norm_w|norm_b|pad], [head_b|pad]
      o       (BS, 128) f32         lane-dense logits slab (rows 0/SEQ = cls tokens)
    """
    f32, bf16 = jnp.float32, jnp.bfloat16
    scale = HEAD_DIM ** -0.5

    # ---- patch embedding: one matmul + precomputed additive base ----
    x = jnp.dot(patches_ref[...], projw_ref[...],
                preferred_element_type=f32) + base_ref[...]

    # ---- block-diagonal additive mask, generated in-kernel (no DMA) ----
    # float-floor batch id (with +0.5 guard) so tokens never attend across images.
    r = lax.broadcasted_iota(jnp.int32, (BS, BS), 0).astype(f32)
    c = lax.broadcasted_iota(jnp.int32, (BS, BS), 1).astype(f32)
    rb = jnp.floor((r + 0.5) * (1.0 / SEQ))
    cb = jnp.floor((c + 0.5) * (1.0 / SEQ))
    attn_bias = jnp.where(rb == cb, 0.0, -1e30).astype(f32)

    for d in range(DEPTH):                              # static unroll, DEPTH=2
        w_in = w_in_ref[d]                              # (E, 4E) bf16
        w1 = w1_ref[d]                                  # (E, FFN) bf16
        w2 = w2_ref[d]                                  # (FFN, E) bf16
        vec = vec_ref[d]                                # (4, 128) f32

        wqkv = w_in[:, :3 * EMBED]                      # (E, 3E)
        wo = w_in[:, 3 * EMBED:]                        # (E, E)
        bqkv = vec[0:1, :3 * EMBED]
        bo = vec[0:1, 3 * EMBED:]
        b1 = vec[1:2, :]
        ln1w = vec[2:3, 0 * EMBED:1 * EMBED]
        ln1b = vec[2:3, 1 * EMBED:2 * EMBED]
        ln2w = vec[2:3, 2 * EMBED:3 * EMBED]
        ln2b = vec[2:3, 3 * EMBED:4 * EMBED]
        b2 = vec[3:4, :EMBED]

        # ---- multi-head self-attention: fused QKV projection ----
        qkv = jnp.dot(x.astype(bf16), wqkv, preferred_element_type=f32) + bqkv  # (BS, 3E)

        ctx_heads = []
        for h in range(HEADS):                          # static unroll, HEADS=4
            lo = h * HEAD_DIM
            qh = qkv[:, lo:lo + HEAD_DIM].astype(bf16)
            kh = qkv[:, EMBED + lo:EMBED + lo + HEAD_DIM].astype(bf16)
            vh = qkv[:, 2 * EMBED + lo:2 * EMBED + lo + HEAD_DIM].astype(bf16)
            s = lax.dot_general(qh, kh, (((1,), (1,)), ((), ())),
                                preferred_element_type=f32) * scale + attn_bias
            s = s - jnp.max(s, axis=-1, keepdims=True)
            e = jnp.exp(s)
            p = e * pl.reciprocal(jnp.sum(e, axis=-1, keepdims=True), approx=True)
            ctx_heads.append(jnp.dot(p.astype(bf16), vh, preferred_element_type=f32))

        # fused output projection over the lane-concatenated heads
        ctx = jnp.concatenate(ctx_heads, axis=-1)                           # (BS, E)
        attn_out = jnp.dot(ctx.astype(bf16), wo, preferred_element_type=f32) + bo

        # post-norm residual 1
        x = _layernorm(x + attn_out, ln1w, ln1b)

        # ---- feed-forward (ReLU) ----
        ff = jnp.dot(x.astype(bf16), w1, preferred_element_type=f32) + b1
        ff = jnp.maximum(ff, 0.0)
        ff = jnp.dot(ff.astype(bf16), w2, preferred_element_type=f32) + b2

        # post-norm residual 2
        x = _layernorm(x + ff, ln2w, ln2b)

    # final norm + head on ALL rows (cls rows extracted in the wrapper; extra rows
    # are free on the MXU and avoid non-8-aligned sublane gathers in the kernel).
    fv = final_ref[...]
    norm_w = fv[0:1, :EMBED]
    norm_b = fv[0:1, EMBED:2 * EMBED]
    head_b = fv[1:2, :]
    y = _layernorm(x, norm_w, norm_b)
    o_ref[...] = jnp.dot(y.astype(bf16), headw_ref[...],
                         preferred_element_type=f32) + head_b


# ---------------------------------------------------------------------------
# Host-side wrappers
# ---------------------------------------------------------------------------
def patchify(x):
    # NCHW -> (B, nH*nW, C*P*P), each patch flattened in (C, ph, pw) order (== Conv2d im2col)
    B, C, H, W = x.shape
    nH, nW = H // PATCH, W // PATCH
    x = x.reshape(B, C, nH, PATCH, nW, PATCH)
    x = x.transpose(0, 2, 4, 1, 3, 5)
    return x.reshape(B, nH * nW, C * PATCH * PATCH)


def prepare_kernel_params(params, batch):
    """One-time host-side repacking of PyTorch-layout params into lane-dense slabs."""
    # Additive "base": row 0 of every sequence gets cls_token + pos[0]; patch rows get
    # conv-bias + pos[1:].  Combined with zero-padded cls patch rows this reproduces
    # cat([cls, conv(x)]) + pos_embed with a single in-kernel matmul + add.
    pos = params["pos_embed"][0]                                  # (S, E)
    base = pos.at[0, :].add(params["cls_token"][0, 0])
    base = base.at[1:, :].add(params["proj_b"][0])
    base = jnp.tile(base, (batch, 1)).astype(jnp.float32)         # (B*S, E)

    w_in, w1s, w2s, vecs = [], [], [], []
    for lp in params["layers"]:
        w_in.append(jnp.concatenate([lp["wqkv_t"], lp["wo_t"]], axis=1))   # (E, 4E)
        w1s.append(lp["w1_t"])                                             # (E, FFN)
        w2s.append(lp["w2_t"])                                             # (FFN, E)
        vecs.append(jnp.stack([
            jnp.concatenate([lp["bqkv"][0], lp["bo"][0]]),                              # [bqkv|bo]
            lp["b1"][0],                                                                # [b1]
            jnp.concatenate([lp["ln1w"][0], lp["ln1b"][0],
                             lp["ln2w"][0], lp["ln2b"][0]]),                            # LN affines
            jnp.concatenate([lp["b2"][0], jnp.zeros((LANES - EMBED,), jnp.float32)]),   # [b2|pad]
        ]))

    head_w = jnp.zeros((EMBED, LANES), jnp.float32).at[:, :NUM_CLASSES].set(params["head_w_t"])
    final_vec = jnp.zeros((2, LANES), jnp.float32)
    final_vec = final_vec.at[0, :EMBED].set(params["norm_w"][0])
    final_vec = final_vec.at[0, EMBED:2 * EMBED].set(params["norm_b"][0])
    final_vec = final_vec.at[1, :NUM_CLASSES].set(params["head_b"][0])

    return {
        "base": base,
        "proj_w": params["proj_w_t"].astype(jnp.bfloat16),
        "w_in": jnp.stack(w_in).astype(jnp.bfloat16),     # (DEPTH, E, 4E)
        "w1": jnp.stack(w1s).astype(jnp.bfloat16),        # (DEPTH, E, FFN)
        "w2": jnp.stack(w2s).astype(jnp.bfloat16),        # (DEPTH, FFN, E)
        "vec": jnp.stack(vecs).astype(jnp.float32),       # (DEPTH, 4, 128)
        "head_w": head_w.astype(jnp.bfloat16),            # (E, 128)
        "final_vec": final_vec,                           # (2, 128)
    }


@jax.jit
def vit_forward(x, kparams):
    B = x.shape[0]
    patches = patchify(x)                                            # (B, N, C*P*P)
    patches = jnp.concatenate(
        [jnp.zeros((B, 1, PATCH_DIM), patches.dtype), patches], axis=1)  # cls rows = 0
    patches = patches.reshape(B * SEQ, PATCH_DIM).astype(jnp.bfloat16)   # (B*S, C*P*P)

    # Single grid-less pallas_call: 9 packed operands get a full-array VMEM window
    # once; no per-layer launches, no HBM round-trips of activations.
    out = pl.pallas_call(
        vit_fused_kernel,
        out_shape=jax.ShapeDtypeStruct((BS, LANES), jnp.float32),
    )(patches, kparams["base"], kparams["proj_w"], kparams["w_in"], kparams["w1"],
      kparams["w2"], kparams["vec"], kparams["head_w"], kparams["final_vec"])

    # cls tokens live at rows {0, SEQ, 2*SEQ, ...}; real classes in the first lanes.
    return out[::SEQ, :NUM_CLASSES]


# ---------------------------------------------------------------------------
# Deterministic parameter construction + pure-JAX reference check
# ---------------------------------------------------------------------------
def make_params(key):
    keys = iter(jax.random.split(key, 64))

    def rnd(shape, scale=0.02):
        return (scale * jax.random.normal(next(keys), shape)).astype(jnp.float32)

    # NOTE: cls/pos/biases/LN-affines are randomized (PyTorch inits most of them to
    # zeros/ones) purely to make the numerical check stronger; forward semantics match.
    params = {
        # Conv2d(in_ch, embed, k=patch, stride=patch): weight (E, C, P, P)
        "proj_w_t": rnd((EMBED, IN_CH, PATCH, PATCH)).reshape(EMBED, -1).T,
        "proj_b": rnd((1, EMBED)),
        "cls_token": rnd((1, 1, EMBED)),
        "pos_embed": rnd((1, SEQ, EMBED)),
        "norm_w": 1.0 + rnd((1, EMBED), 0.1),
        "norm_b": rnd((1, EMBED)),
        "head_w_t": rnd((NUM_CLASSES, EMBED)).T,
        "head_b": rnd((1, NUM_CLASSES)),
        "layers": [],
    }
    for _ in range(DEPTH):
        params["layers"].append({
            "wqkv_t": rnd((3 * EMBED, EMBED)).T,      # in_proj_weight.T
            "bqkv": rnd((1, 3 * EMBED)),
            "wo_t": rnd((EMBED, EMBED)).T,            # out_proj.weight.T
            "bo": rnd((1, EMBED)),
            "ln1w": 1.0 + rnd((1, EMBED), 0.1),
            "ln1b": rnd((1, EMBED)),
            "w1_t": rnd((FFN, EMBED)).T,              # linear1.weight.T
            "b1": rnd((1, FFN)),
            "w2_t": rnd((EMBED, FFN)).T,              # linear2.weight.T
            "b2": rnd((1, EMBED)),
            "ln2w": 1.0 + rnd((1, EMBED), 0.1),
            "ln2b": rnd((1, EMBED)),
        })
    return params


def vit_reference(x, params):
    """Pure-JAX f32 reference mirroring PyTorch semantics, for validation."""
    B = x.shape[0]
    patches = patchify(x)
    emb = patches @ params["proj_w_t"] + params["proj_b"]
    cls = jnp.broadcast_to(params["cls_token"], (B, 1, EMBED))
    h = jnp.concatenate([cls, emb], axis=1) + params["pos_embed"]

    def ln(x, w, b):
        mu = x.mean(-1, keepdims=True)
        var = ((x - mu) ** 2).mean(-1, keepdims=True)
        return (x - mu) / jnp.sqrt(var + LN_EPS) * w + b

    for lp in params["layers"]:
        qkv = h @ lp["wqkv_t"] + lp["bqkv"]
        q, k, v = jnp.split(qkv, 3, axis=-1)
        q = q.reshape(B, SEQ, HEADS, HEAD_DIM).transpose(0, 2, 1, 3)
        k = k.reshape(B, SEQ, HEADS, HEAD_DIM).transpose(0, 2, 1, 3)
        v = v.reshape(B, SEQ, HEADS, HEAD_DIM).transpose(0, 2, 1, 3)
        s = jnp.einsum("bhqd,bhkd->bhqk", q, k) / jnp.sqrt(HEAD_DIM)
        a = jax.nn.softmax(s, axis=-1)
        ctx = jnp.einsum("bhqk,bhkd->bhqd", a, v).transpose(0, 2, 1, 3).reshape(B, SEQ, EMBED)
        attn_out = ctx @ lp["wo_t"] + lp["bo"]
        h = ln(h + attn_out, lp["ln1w"], lp["ln1b"])
        ff = jax.nn.relu(h @ lp["w1_t"] + lp["b1"]) @ lp["w2_t"] + lp["b2"]
        h = ln(h + ff, lp["ln2w"], lp["ln2b"])

    cls_out = ln(h[:, 0], params["norm_w"], params["norm_b"])
    return cls_out @ params["head_w_t"] + params["head_b"]


if __name__ == "__main__":
    key = jax.random.PRNGKey(0)
    k_x, k_p = jax.random.split(key)
    x = jax.random.normal(k_x, (BATCH, IN_CH, IMG_SIZE, IMG_SIZE), jnp.float32)
    params = make_params(k_p)
    kparams = prepare_kernel_params(params, BATCH)

    logits = vit_forward(x, kparams)
    logits = jax.block_until_ready(logits)

    ref = vit_reference(x, params)
    # tolerance relaxed vs. the all-f32 version: kernel matmul operands are bf16
    np.testing.assert_allclose(np.asarray(logits), np.asarray(ref), rtol=1e-2, atol=1e-2)
    assert logits.shape == (BATCH, NUM_CLASSES)
    print("KERNEL_OK")
</pallas_src>

<mosaic_0001>
module attributes {stable_mosaic.version = 11 : i64} {
  func.func @vit_fused_kernel(%arg0: memref<34x64xbf16, #tpu.memory_space<vmem>>, %arg1: memref<34x32xf32, #tpu.memory_space<vmem>>, %arg2: memref<64x32xbf16, #tpu.memory_space<vmem>>, %arg3: memref<2x32x128xbf16, #tpu.memory_space<vmem>>, %arg4: memref<2x32x128xbf16, #tpu.memory_space<vmem>>, %arg5: memref<2x128x32xbf16, #tpu.memory_space<vmem>>, %arg6: memref<2x4x128xf32, #tpu.memory_space<vmem>>, %arg7: memref<32x128xbf16, #tpu.memory_space<vmem>>, %arg8: memref<2x128xf32, #tpu.memory_space<vmem>>, %arg9: memref<34x128xf32, #tpu.memory_space<vmem>>) attributes {dimension_semantics = [], scalar_prefetch = 0 : i64, scratch_operands = 0 : i64, tpu.core_type = #tpu.core_type<tc>} {
    %c0 = arith.constant 0 : index
    %c0_0 = arith.constant 0 : index
    %0 = vector.load %arg0[%c0, %c0_0] : memref<34x64xbf16, #tpu.memory_space<vmem>>, vector<34x64xbf16>
    %c0_1 = arith.constant 0 : index
    %c0_2 = arith.constant 0 : index
    %1 = vector.load %arg2[%c0_1, %c0_2] : memref<64x32xbf16, #tpu.memory_space<vmem>>, vector<64x32xbf16>
    %cst = arith.constant dense<0.000000e+00> : vector<34x32xf32>
    %2 = tpu.matmul %0, %1, %cst {dimension_numbers = #tpu.dot_dimension_numbers<[1], [0], [0], [1], [0, 0, 1, 1], [], []>} : vector<34x64xbf16>, vector<64x32xbf16>, vector<34x32xf32> -> vector<34x32xf32>
    %c0_3 = arith.constant 0 : index
    %c0_4 = arith.constant 0 : index
    %3 = vector.load %arg1[%c0_3, %c0_4] : memref<34x32xf32, #tpu.memory_space<vmem>>, vector<34x32xf32>
    %4 = arith.addf %2, %3 : vector<34x32xf32>
    %5 = tpu.iota {dimensions = array<i32: 0>} : vector<34x34xi32>
    %6 = arith.sitofp %5 : vector<34x34xi32> to vector<34x34xf32>
    %7 = tpu.iota {dimensions = array<i32: 1>} : vector<34x34xi32>
    %8 = arith.sitofp %7 : vector<34x34xi32> to vector<34x34xf32>
    %cst_5 = arith.constant 5.000000e-01 : f32
    %9 = vector.broadcast %cst_5 : f32 to vector<34x34xf32>
    %10 = arith.addf %6, %9 : vector<34x34xf32>
    %cst_6 = arith.constant 0.0588235296 : f32
    %11 = vector.broadcast %cst_6 : f32 to vector<34x34xf32>
    %12 = arith.mulf %10, %11 : vector<34x34xf32>
    %13 = math.floor %12 : vector<34x34xf32>
    %cst_7 = arith.constant 5.000000e-01 : f32
    %14 = vector.broadcast %cst_7 : f32 to vector<34x34xf32>
    %15 = arith.addf %8, %14 : vector<34x34xf32>
    %cst_8 = arith.constant 0.0588235296 : f32
    %16 = vector.broadcast %cst_8 : f32 to vector<34x34xf32>
    %17 = arith.mulf %15, %16 : vector<34x34xf32>
    %18 = math.floor %17 : vector<34x34xf32>
    %19 = arith.cmpf oeq, %13, %18 : vector<34x34xf32>
    %cst_9 = arith.constant 0.000000e+00 : f32
    %cst_10 = arith.constant -1.000000e+30 : f32
    %20 = vector.broadcast %cst_9 : f32 to vector<34x34xf32>
    %21 = vector.broadcast %cst_10 : f32 to vector<34x34xf32>
    %22 = arith.select %19, %20, %21 : vector<34x34xi1>, vector<34x34xf32>
    %c0_11 = arith.constant 0 : index
    %c0_12 = arith.constant 0 : index
    %c0_13 = arith.constant 0 : index
    %23 = vector.load %arg3[%c0_11, %c0_12, %c0_13] : memref<2x32x128xbf16, #tpu.memory_space<vmem>>, vector<1x32x128xbf16>
    %24 = vector.shape_cast %23 : vector<1x32x128xbf16> to vector<32x128xbf16>
    %c0_14 = arith.constant 0 : index
    %c0_15 = arith.constant 0 : index
    %c0_16 = arith.constant 0 : index
    %25 = vector.load %arg4[%c0_14, %c0_15, %c0_16] : memref<2x32x128xbf16, #tpu.memory_space<vmem>>, vector<1x32x128xbf16>
    %26 = vector.shape_cast %25 : vector<1x32x128xbf16> to vector<32x128xbf16>
    %c0_17 = arith.constant 0 : index
    %c0_18 = arith.constant 0 : index
    %c0_19 = arith.constant 0 : index
    %27 = vector.load %arg5[%c0_17, %c0_18, %c0_19] : memref<2x128x32xbf16, #tpu.memory_space<vmem>>, vector<1x128x32xbf16>
    %28 = vector.shape_cast %27 : vector<1x128x32xbf16> to vector<128x32xbf16>
    %c0_20 = arith.constant 0 : index
    %c0_21 = arith.constant 0 : index
    %c0_22 = arith.constant 0 : index
    %29 = vector.load %arg6[%c0_20, %c0_21, %c0_22] : memref<2x4x128xf32, #tpu.memory_space<vmem>>, vector<1x4x128xf32>
    %30 = vector.shape_cast %29 : vector<1x4x128xf32> to vector<4x128xf32>
    %31 = vector.extract_strided_slice %24 {offsets = [0, 0], sizes = [32, 96], strides = [1, 1]} : vector<32x128xbf16> to vector<32x96xbf16>
    %32 = vector.extract_strided_slice %24 {offsets = [0, 96], sizes = [32, 32], strides = [1, 1]} : vector<32x128xbf16> to vector<32x32xbf16>
    %33 = vector.extract_strided_slice %30 {offsets = [0, 0], sizes = [1, 96], strides = [1, 1]} : vector<4x128xf32> to vector<1x96xf32>
    %34 = vector.extract_strided_slice %30 {offsets = [0, 96], sizes = [1, 32], strides = [1, 1]} : vector<4x128xf32> to vector<1x32xf32>
    %35 = vector.extract_strided_slice %30 {offsets = [1, 0], sizes = [1, 128], strides = [1, 1]} : vector<4x128xf32> to vector<1x128xf32>
    %36 = vector.extract_strided_slice %30 {offsets = [2, 0], sizes = [1, 32], strides = [1, 1]} : vector<4x128xf32> to vector<1x32xf32>
    %37 = vector.extract_strided_slice %30 {offsets = [2, 32], sizes = [1, 32], strides = [1, 1]} : vector<4x128xf32> to vector<1x32xf32>
    %38 = vector.extract_strided_slice %30 {offsets = [2, 64], sizes = [1, 32], strides = [1, 1]} : vector<4x128xf32> to vector<1x32xf32>
    %39 = vector.extract_strided_slice %30 {offsets = [2, 96], sizes = [1, 32], strides = [1, 1]} : vector<4x128xf32> to vector<1x32xf32>
    %40 = vector.extract_strided_slice %30 {offsets = [3, 0], sizes = [1, 32], strides = [1, 1]} : vector<4x128xf32> to vector<1x32xf32>
    %41 = arith.truncf %4 : vector<34x32xf32> to vector<34x32xbf16>
    %cst_23 = arith.constant dense<0.000000e+00> : vector<34x96xf32>
    %42 = tpu.matmul %41, %31, %cst_23 {dimension_numbers = #tpu.dot_dimension_numbers<[1], [0], [0], [1], [0, 0, 1, 1], [], []>} : vector<34x32xbf16>, vector<32x96xbf16>, vector<34x96xf32> -> vector<34x96xf32>
    %43 = vector.broadcast %33 : vector<1x96xf32> to vector<34x96xf32>
    %44 = arith.addf %42, %43 : vector<34x96xf32>
    %45 = vector.extract_strided_slice %44 {offsets = [0, 0], sizes = [34, 8], strides = [1, 1]} : vector<34x96xf32> to vector<34x8xf32>
    %46 = arith.truncf %45 : vector<34x8xf32> to vector<34x8xbf16>
    %47 = vector.extract_strided_slice %44 {offsets = [0, 32], sizes = [34, 8], strides = [1, 1]} : vector<34x96xf32> to vector<34x8xf32>
    %48 = arith.truncf %47 : vector<34x8xf32> to vector<34x8xbf16>
    %49 = vector.extract_strided_slice %44 {offsets = [0, 64], sizes = [34, 8], strides = [1, 1]} : vector<34x96xf32> to vector<34x8xf32>
    %50 = arith.truncf %49 : vector<34x8xf32> to vector<34x8xbf16>
    %cst_24 = arith.constant dense<0.000000e+00> : vector<34x34xf32>
    %51 = tpu.matmul %46, %48, %cst_24 {dimension_numbers = #tpu.dot_dimension_numbers<[1], [1], [0], [0], [0, 0, 1, 0], [], []>} : vector<34x8xbf16>, vector<34x8xbf16>, vector<34x34xf32> -> vector<34x34xf32>
    %cst_25 = arith.constant 0.353553385 : f32
    %52 = vector.broadcast %cst_25 : f32 to vector<34x34xf32>
    %53 = arith.mulf %51, %52 : vector<34x34xf32>
    %54 = arith.addf %53, %22 : vector<34x34xf32>
    %cst_26 = arith.constant dense<0xFF800000> : vector<34xf32>
    %55 = vector.multi_reduction <maximumf>, %54, %cst_26 [1] : vector<34x34xf32> to vector<34xf32>
    %56 = vector.shape_cast %55 : vector<34xf32> to vector<34x1xf32>
    %57 = vector.broadcast %56 : vector<34x1xf32> to vector<34x34xf32>
    %58 = arith.subf %54, %57 : vector<34x34xf32>
    %59 = math.exp %58 : vector<34x34xf32>
    %cst_27 = arith.constant dense<0.000000e+00> : vector<34xf32>
    %60 = vector.multi_reduction <add>, %59, %cst_27 [1] : vector<34x34xf32> to vector<34xf32>
    %61 = vector.shape_cast %60 : vector<34xf32> to vector<34x1xf32>
    %62 = tpu.reciprocal %61 {approx = true} : vector<34x1xf32> -> vector<34x1xf32>
    %63 = vector.broadcast %62 : vector<34x1xf32> to vector<34x34xf32>
    %64 = arith.mulf %59, %63 : vector<34x34xf32>
    %65 = arith.truncf %64 : vector<34x34xf32> to vector<34x34xbf16>
    %cst_28 = arith.constant dense<0.000000e+00> : vector<34x8xf32>
    %66 = tpu.matmul %65, %50, %cst_28 {dimension_numbers = #tpu.dot_dimension_numbers<[1], [0], [0], [1], [0, 0, 1, 1], [], []>} : vector<34x34xbf16>, vector<34x8xbf16>, vector<34x8xf32> -> vector<34x8xf32>
    %67 = vector.extract_strided_slice %44 {offsets = [0, 8], sizes = [34, 8], strides = [1, 1]} : vector<34x96xf32> to vector<34x8xf32>
    %68 = arith.truncf %67 : vector<34x8xf32> to vector<34x8xbf16>
    %69 = vector.extract_strided_slice %44 {offsets = [0, 40], sizes = [34, 8], strides = [1, 1]} : vector<34x96xf32> to vector<34x8xf32>
    %70 = arith.truncf %69 : vector<34x8xf32> to vector<34x8xbf16>
    %71 = vector.extract_strided_slice %44 {offsets = [0, 72], sizes = [34, 8], strides = [1, 1]} : vector<34x96xf32> to vector<34x8xf32>
    %72 = arith.truncf %71 : vector<34x8xf32> to vector<34x8xbf16>
    %cst_29 = arith.constant dense<0.000000e+00> : vector<34x34xf32>
    %73 = tpu.matmul %68, %70, %cst_29 {dimension_numbers = #tpu.dot_dimension_numbers<[1], [1], [0], [0], [0, 0, 1, 0], [], []>} : vector<34x8xbf16>, vector<34x8xbf16>, vector<34x34xf32> -> vector<34x34xf32>
    %cst_30 = arith.constant 0.353553385 : f32
    %74 = vector.broadcast %cst_30 : f32 to vector<34x34xf32>
    %75 = arith.mulf %73, %74 : vector<34x34xf32>
    %76 = arith.addf %75, %22 : vector<34x34xf32>
    %cst_31 = arith.constant dense<0xFF800000> : vector<34xf32>
    %77 = vector.multi_reduction <maximumf>, %76, %cst_31 [1] : vector<34x34xf32> to vector<34xf32>
    %78 = vector.shape_cast %77 : vector<34xf32> to vector<34x1xf32>
    %79 = vector.broadcast %78 : vector<34x1xf32> to vector<34x34xf32>
    %80 = arith.subf %76, %79 : vector<34x34xf32>
    %81 = math.exp %80 : vector<34x34xf32>
    %cst_32 = arith.constant dense<0.000000e+00> : vector<34xf32>
    %82 = vector.multi_reduction <add>, %81, %cst_32 [1] : vector<34x34xf32> to vector<34xf32>
    %83 = vector.shape_cast %82 : vector<34xf32> to vector<34x1xf32>
    %84 = tpu.reciprocal %83 {approx = true} : vector<34x1xf32> -> vector<34x1xf32>
    %85 = vector.broadcast %84 : vector<34x1xf32> to vector<34x34xf32>
    %86 = arith.mulf %81, %85 : vector<34x34xf32>
    %87 = arith.truncf %86 : vector<34x34xf32> to vector<34x34xbf16>
    %cst_33 = arith.constant dense<0.000000e+00> : vector<34x8xf32>
    %88 = tpu.matmul %87, %72, %cst_33 {dimension_numbers = #tpu.dot_dimension_numbers<[1], [0], [0], [1], [0, 0, 1, 1], [], []>} : vector<34x34xbf16>, vector<34x8xbf16>, vector<34x8xf32> -> vector<34x8xf32>
    %89 = vector.extract_strided_slice %44 {offsets = [0, 16], sizes = [34, 8], strides = [1, 1]} : vector<34x96xf32> to vector<34x8xf32>
    %90 = arith.truncf %89 : vector<34x8xf32> to vector<34x8xbf16>
    %91 = vector.extract_strided_slice %44 {offsets = [0, 48], sizes = [34, 8], strides = [1, 1]} : vector<34x96xf32> to vector<34x8xf32>
    %92 = arith.truncf %91 : vector<34x8xf32> to vector<34x8xbf16>
    %93 = vector.extract_strided_slice %44 {offsets = [0, 80], sizes = [34, 8], strides = [1, 1]} : vector<34x96xf32> to vector<34x8xf32>
    %94 = arith.truncf %93 : vector<34x8xf32> to vector<34x8xbf16>
    %cst_34 = arith.constant dense<0.000000e+00> : vector<34x34xf32>
    %95 = tpu.matmul %90, %92, %cst_34 {dimension_numbers = #tpu.dot_dimension_numbers<[1], [1], [0], [0], [0, 0, 1, 0], [], []>} : vector<34x8xbf16>, vector<34x8xbf16>, vector<34x34xf32> -> vector<34x34xf32>
    %cst_35 = arith.constant 0.353553385 : f32
    %96 = vector.broadcast %cst_35 : f32 to vector<34x34xf32>
    %97 = arith.mulf %95, %96 : vector<34x34xf32>
    %98 = arith.addf %97, %22 : vector<34x34xf32>
    %cst_36 = arith.constant dense<0xFF800000> : vector<34xf32>
    %99 = vector.multi_reduction <maximumf>, %98, %cst_36 [1] : vector<34x34xf32> to vector<34xf32>
    %100 = vector.shape_cast %99 : vector<34xf32> to vector<34x1xf32>
    %101 = vector.broadcast %100 : vector<34x1xf32> to vector<34x34xf32>
    %102 = arith.subf %98, %101 : vector<34x34xf32>
    %103 = math.exp %102 : vector<34x34xf32>
    %cst_37 = arith.constant dense<0.000000e+00> : vector<34xf32>
    %104 = vector.multi_reduction <add>, %103, %cst_37 [1] : vector<34x34xf32> to vector<34xf32>
    %105 = vector.shape_cast %104 : vector<34xf32> to vector<34x1xf32>
    %106 = tpu.reciprocal %105 {approx = true} : vector<34x1xf32> -> vector<34x1xf32>
    %107 = vector.broadcast %106 : vector<34x1xf32> to vector<34x34xf32>
    %108 = arith.mulf %103, %107 : vector<34x34xf32>
    %109 = arith.truncf %108 : vector<34x34xf32> to vector<34x34xbf16>
    %cst_38 = arith.constant dense<0.000000e+00> : vector<34x8xf32>
    %110 = tpu.matmul %109, %94, %cst_38 {dimension_numbers = #tpu.dot_dimension_numbers<[1], [0], [0], [1], [0, 0, 1, 1], [], []>} : vector<34x34xbf16>, vector<34x8xbf16>, vector<34x8xf32> -> vector<34x8xf32>
    %111 = vector.extract_strided_slice %44 {offsets = [0, 24], sizes = [34, 8], strides = [1, 1]} : vector<34x96xf32> to vector<34x8xf32>
    %112 = arith.truncf %111 : vector<34x8xf32> to vector<34x8xbf16>
    %113 = vector.extract_strided_slice %44 {offsets = [0, 56], sizes = [34, 8], strides = [1, 1]} : vector<34x96xf32> to vector<34x8xf32>
    %114 = arith.truncf %113 : vector<34x8xf32> to vector<34x8xbf16>
    %115 = vector.extract_strided_slice %44 {offsets = [0, 88], sizes = [34, 8], strides = [1, 1]} : vector<34x96xf32> to vector<34x8xf32>
    %116 = arith.truncf %115 : vector<34x8xf32> to vector<34x8xbf16>
    %cst_39 = arith.constant dense<0.000000e+00> : vector<34x34xf32>
    %117 = tpu.matmul %112, %114, %cst_39 {dimension_numbers = #tpu.dot_dimension_numbers<[1], [1], [0], [0], [0, 0, 1, 0], [], []>} : vector<34x8xbf16>, vector<34x8xbf16>, vector<34x34xf32> -> vector<34x34xf32>
    %cst_40 = arith.constant 0.353553385 : f32
    %118 = vector.broadcast %cst_40 : f32 to vector<34x34xf32>
    %119 = arith.mulf %117, %118 : vector<34x34xf32>
    %120 = arith.addf %119, %22 : vector<34x34xf32>
    %cst_41 = arith.constant dense<0xFF800000> : vector<34xf32>
    %121 = vector.multi_reduction <maximumf>, %120, %cst_41 [1] : vector<34x34xf32> to vector<34xf32>
    %122 = vector.shape_cast %121 : vector<34xf32> to vector<34x1xf32>
    %123 = vector.broadcast %122 : vector<34x1xf32> to vector<34x34xf32>
    %124 = arith.subf %120, %123 : vector<34x34xf32>
    %125 = math.exp %124 : vector<34x34xf32>
    %cst_42 = arith.constant dense<0.000000e+00> : vector<34xf32>
    %126 = vector.multi_reduction <add>, %125, %cst_42 [1] : vector<34x34xf32> to vector<34xf32>
    %127 = vector.shape_cast %126 : vector<34xf32> to vector<34x1xf32>
    %128 = tpu.reciprocal %127 {approx = true} : vector<34x1xf32> -> vector<34x1xf32>
    %129 = vector.broadcast %128 : vector<34x1xf32> to vector<34x34xf32>
    %130 = arith.mulf %125, %129 : vector<34x34xf32>
    %131 = arith.truncf %130 : vector<34x34xf32> to vector<34x34xbf16>
    %cst_43 = arith.constant dense<0.000000e+00> : vector<34x8xf32>
    %132 = tpu.matmul %131, %116, %cst_43 {dimension_numbers = #tpu.dot_dimension_numbers<[1], [0], [0], [1], [0, 0, 1, 1], [], []>} : vector<34x34xbf16>, vector<34x8xbf16>, vector<34x8xf32> -> vector<34x8xf32>
    %133 = tpu.concatenate %66, %88, %110, %132 in 1 : vector<34x8xf32>, vector<34x8xf32>, vector<34x8xf32>, vector<34x8xf32> -> vector<34x32xf32>
    %134 = arith.truncf %133 : vector<34x32xf32> to vector<34x32xbf16>
    %cst_44 = arith.constant dense<0.000000e+00> : vector<34x32xf32>
    %135 = tpu.matmul %134, %32, %cst_44 {dimension_numbers = #tpu.dot_dimension_numbers<[1], [0], [0], [1], [0, 0, 1, 1], [], []>} : vector<34x32xbf16>, vector<32x32xbf16>, vector<34x32xf32> -> vector<34x32xf32>
    %136 = vector.broadcast %34 : vector<1x32xf32> to vector<34x32xf32>
    %137 = arith.addf %135, %136 : vector<34x32xf32>
    %138 = arith.addf %4, %137 : vector<34x32xf32>
    %cst_45 = arith.constant dense<0.000000e+00> : vector<34xf32>
    %139 = vector.multi_reduction <add>, %138, %cst_45 [1] : vector<34x32xf32> to vector<34xf32>
    %140 = vector.shape_cast %139 : vector<34xf32> to vector<34x1xf32>
    %cst_46 = arith.constant 3.200000e+01 : f32
    %141 = vector.broadcast %cst_46 : f32 to vector<34x1xf32>
    %142 = arith.divf %140, %141 : vector<34x1xf32>
    %143 = arith.mulf %138, %138 : vector<34x32xf32>
    %cst_47 = arith.constant dense<0.000000e+00> : vector<34xf32>
    %144 = vector.multi_reduction <add>, %143, %cst_47 [1] : vector<34x32xf32> to vector<34xf32>
    %145 = vector.shape_cast %144 : vector<34xf32> to vector<34x1xf32>
    %cst_48 = arith.constant 3.200000e+01 : f32
    %146 = vector.broadcast %cst_48 : f32 to vector<34x1xf32>
    %147 = arith.divf %145, %146 : vector<34x1xf32>
    %148 = vector.broadcast %142 : vector<34x1xf32> to vector<34x32xf32>
    %149 = arith.subf %138, %148 : vector<34x32xf32>
    %150 = arith.mulf %142, %142 : vector<34x1xf32>
    %151 = arith.subf %147, %150 : vector<34x1xf32>
    %cst_49 = arith.constant 9.99999974E-6 : f32
    %152 = vector.broadcast %cst_49 : f32 to vector<34x1xf32>
    %153 = arith.addf %151, %152 : vector<34x1xf32>
    %154 = math.rsqrt %153 : vector<34x1xf32>
    %155 = vector.broadcast %154 : vector<34x1xf32> to vector<34x32xf32>
    %156 = arith.mulf %149, %155 : vector<34x32xf32>
    %157 = vector.broadcast %36 : vector<1x32xf32> to vector<34x32xf32>
    %158 = arith.mulf %156, %157 : vector<34x32xf32>
    %159 = vector.broadcast %37 : vector<1x32xf32> to vector<34x32xf32>
    %160 = arith.addf %158, %159 : vector<34x32xf32>
    %161 = arith.truncf %160 : vector<34x32xf32> to vector<34x32xbf16>
    %cst_50 = arith.constant dense<0.000000e+00> : vector<34x128xf32>
    %162 = tpu.matmul %161, %26, %cst_50 {dimension_numbers = #tpu.dot_dimension_numbers<[1], [0], [0], [1], [0, 0, 1, 1], [], []>} : vector<34x32xbf16>, vector<32x128xbf16>, vector<34x128xf32> -> vector<34x128xf32>
    %163 = vector.broadcast %35 : vector<1x128xf32> to vector<34x128xf32>
    %164 = arith.addf %162, %163 : vector<34x128xf32>
    %cst_51 = arith.constant 0.000000e+00 : f32
    %165 = vector.broadcast %cst_51 : f32 to vector<34x128xf32>
    %166 = arith.maximumf %164, %165 : vector<34x128xf32>
    %167 = arith.truncf %166 : vector<34x128xf32> to vector<34x128xbf16>
    %cst_52 = arith.constant dense<0.000000e+00> : vector<34x32xf32>
    %168 = tpu.matmul %167, %28, %cst_52 {dimension_numbers = #tpu.dot_dimension_numbers<[1], [0], [0], [1], [0, 0, 1, 1], [], []>} : vector<34x128xbf16>, vector<128x32xbf16>, vector<34x32xf32> -> vector<34x32xf32>
    %169 = vector.broadcast %40 : vector<1x32xf32> to vector<34x32xf32>
    %170 = arith.addf %168, %169 : vector<34x32xf32>
    %171 = arith.addf %160, %170 : vector<34x32xf32>
    %cst_53 = arith.constant dense<0.000000e+00> : vector<34xf32>
    %172 = vector.multi_reduction <add>, %171, %cst_53 [1] : vector<34x32xf32> to vector<34xf32>
    %173 = vector.shape_cast %172 : vector<34xf32> to vector<34x1xf32>
    %cst_54 = arith.constant 3.200000e+01 : f32
    %174 = vector.broadcast %cst_54 : f32 to vector<34x1xf32>
    %175 = arith.divf %173, %174 : vector<34x1xf32>
    %176 = arith.mulf %171, %171 : vector<34x32xf32>
    %cst_55 = arith.constant dense<0.000000e+00> : vector<34xf32>
    %177 = vector.multi_reduction <add>, %176, %cst_55 [1] : vector<34x32xf32> to vector<34xf32>
    %178 = vector.shape_cast %177 : vector<34xf32> to vector<34x1xf32>
    %cst_56 = arith.constant 3.200000e+01 : f32
    %179 = vector.broadcast %cst_56 : f32 to vector<34x1xf32>
    %180 = arith.divf %178, %179 : vector<34x1xf32>
    %181 = vector.broadcast %175 : vector<34x1xf32> to vector<34x32xf32>
    %182 = arith.subf %171, %181 : vector<34x32xf32>
    %183 = arith.mulf %175, %175 : vector<34x1xf32>
    %184 = arith.subf %180, %183 : vector<34x1xf32>
    %cst_57 = arith.constant 9.99999974E-6 : f32
    %185 = vector.broadcast %cst_57 : f32 to vector<34x1xf32>
    %186 = arith.addf %184, %185 : vector<34x1xf32>
    %187 = math.rsqrt %186 : vector<34x1xf32>
    %188 = vector.broadcast %187 : vector<34x1xf32> to vector<34x32xf32>
    %189 = arith.mulf %182, %188 : vector<34x32xf32>
    %190 = vector.broadcast %38 : vector<1x32xf32> to vector<34x32xf32>
    %191 = arith.mulf %189, %190 : vector<34x32xf32>
    %192 = vector.broadcast %39 : vector<1x32xf32> to vector<34x32xf32>
    %193 = arith.addf %191, %192 : vector<34x32xf32>
    %c1 = arith.constant 1 : index
    %c0_58 = arith.constant 0 : index
    %c0_59 = arith.constant 0 : index
    %194 = vector.load %arg3[%c1, %c0_58, %c0_59] : memref<2x32x128xbf16, #tpu.memory_space<vmem>>, vector<1x32x128xbf16>
    %195 = vector.shape_cast %194 : vector<1x32x128xbf16> to vector<32x128xbf16>
    %c1_60 = arith.constant 1 : index
    %c0_61 = arith.constant 0 : index
    %c0_62 = arith.constant 0 : index
    %196 = vector.load %arg4[%c1_60, %c0_61, %c0_62] : memref<2x32x128xbf16, #tpu.memory_space<vmem>>, vector<1x32x128xbf16>
    %197 = vector.shape_cast %196 : vector<1x32x128xbf16> to vector<32x128xbf16>
    %c1_63 = arith.constant 1 : index
    %c0_64 = arith.constant 0 : index
    %c0_65 = arith.constant 0 : index
    %198 = vector.load %arg5[%c1_63, %c0_64, %c0_65] : memref<2x128x32xbf16, #tpu.memory_space<vmem>>, vector<1x128x32xbf16>
    %199 = vector.shape_cast %198 : vector<1x128x32xbf16> to vector<128x32xbf16>
    %c1_66 = arith.constant 1 : index
    %c0_67 = arith.constant 0 : index
    %c0_68 = arith.constant 0 : index
    %200 = vector.load %arg6[%c1_66, %c0_67, %c0_68] : memref<2x4x128xf32, #tpu.memory_space<vmem>>, vector<1x4x128xf32>
    %201 = vector.shape_cast %200 : vector<1x4x128xf32> to vector<4x128xf32>
    %202 = vector.extract_strided_slice %195 {offsets = [0, 0], sizes = [32, 96], strides = [1, 1]} : vector<32x128xbf16> to vector<32x96xbf16>
    %203 = vector.extract_strided_slice %195 {offsets = [0, 96], sizes = [32, 32], strides = [1, 1]} : vector<32x128xbf16> to vector<32x32xbf16>
    %204 = vector.extract_strided_slice %201 {offsets = [0, 0], sizes = [1, 96], strides = [1, 1]} : vector<4x128xf32> to vector<1x96xf32>
    %205 = vector.extract_strided_slice %201 {offsets = [0, 96], sizes = [1, 32], strides = [1, 1]} : vector<4x128xf32> to vector<1x32xf32>
    %206 = vector.extract_strided_slice %201 {offsets = [1, 0], sizes = [1, 128], strides = [1, 1]} : vector<4x128xf32> to vector<1x128xf32>
    %207 = vector.extract_strided_slice %201 {offsets = [2, 0], sizes = [1, 32], strides = [1, 1]} : vector<4x128xf32> to vector<1x32xf32>
    %208 = vector.extract_strided_slice %201 {offsets = [2, 32], sizes = [1, 32], strides = [1, 1]} : vector<4x128xf32> to vector<1x32xf32>
    %209 = vector.extract_strided_slice %201 {offsets = [2, 64], sizes = [1, 32], strides = [1, 1]} : vector<4x128xf32> to vector<1x32xf32>
    %210 = vector.extract_strided_slice %201 {offsets = [2, 96], sizes = [1, 32], strides = [1, 1]} : vector<4x128xf32> to vector<1x32xf32>
    %211 = vector.extract_strided_slice %201 {offsets = [3, 0], sizes = [1, 32], strides = [1, 1]} : vector<4x128xf32> to vector<1x32xf32>
    %212 = arith.truncf %193 : vector<34x32xf32> to vector<34x32xbf16>
    %cst_69 = arith.constant dense<0.000000e+00> : vector<34x96xf32>
    %213 = tpu.matmul %212, %202, %cst_69 {dimension_numbers = #tpu.dot_dimension_numbers<[1], [0], [0], [1], [0, 0, 1, 1], [], []>} : vector<34x32xbf16>, vector<32x96xbf16>, vector<34x96xf32> -> vector<34x96xf32>
    %214 = vector.broadcast %204 : vector<1x96xf32> to vector<34x96xf32>
    %215 = arith.addf %213, %214 : vector<34x96xf32>
    %216 = vector.extract_strided_slice %215 {offsets = [0, 0], sizes = [34, 8], strides = [1, 1]} : vector<34x96xf32> to vector<34x8xf32>
    %217 = arith.truncf %216 : vector<34x8xf32> to vector<34x8xbf16>
    %218 = vector.extract_strided_slice %215 {offsets = [0, 32], sizes = [34, 8], strides = [1, 1]} : vector<34x96xf32> to vector<34x8xf32>
    %219 = arith.truncf %218 : vector<34x8xf32> to vector<34x8xbf16>
    %220 = vector.extract_strided_slice %215 {offsets = [0, 64], sizes = [34, 8], strides = [1, 1]} : vector<34x96xf32> to vector<34x8xf32>
    %221 = arith.truncf %220 : vector<34x8xf32> to vector<34x8xbf16>
    %cst_70 = arith.constant dense<0.000000e+00> : vector<34x34xf32>
    %222 = tpu.matmul %217, %219, %cst_70 {dimension_numbers = #tpu.dot_dimension_numbers<[1], [1], [0], [0], [0, 0, 1, 0], [], []>} : vector<34x8xbf16>, vector<34x8xbf16>, vector<34x34xf32> -> vector<34x34xf32>
    %cst_71 = arith.constant 0.353553385 : f32
    %223 = vector.broadcast %cst_71 : f32 to vector<34x34xf32>
    %224 = arith.mulf %222, %223 : vector<34x34xf32>
    %225 = arith.addf %224, %22 : vector<34x34xf32>
    %cst_72 = arith.constant dense<0xFF800000> : vector<34xf32>
    %226 = vector.multi_reduction <maximumf>, %225, %cst_72 [1] : vector<34x34xf32> to vector<34xf32>
    %227 = vector.shape_cast %226 : vector<34xf32> to vector<34x1xf32>
    %228 = vector.broadcast %227 : vector<34x1xf32> to vector<34x34xf32>
    %229 = arith.subf %225, %228 : vector<34x34xf32>
    %230 = math.exp %229 : vector<34x34xf32>
    %cst_73 = arith.constant dense<0.000000e+00> : vector<34xf32>
    %231 = vector.multi_reduction <add>, %230, %cst_73 [1] : vector<34x34xf32> to vector<34xf32>
    %232 = vector.shape_cast %231 : vector<34xf32> to vector<34x1xf32>
    %233 = tpu.reciprocal %232 {approx = true} : vector<34x1xf32> -> vector<34x1xf32>
    %234 = vector.broadcast %233 : vector<34x1xf32> to vector<34x34xf32>
    %235 = arith.mulf %230, %234 : vector<34x34xf32>
    %236 = arith.truncf %235 : vector<34x34xf32> to vector<34x34xbf16>
    %cst_74 = arith.constant dense<0.000000e+00> : vector<34x8xf32>
    %237 = tpu.matmul %236, %221, %cst_74 {dimension_numbers = #tpu.dot_dimension_numbers<[1], [0], [0], [1], [0, 0, 1, 1], [], []>} : vector<34x34xbf16>, vector<34x8xbf16>, vector<34x8xf32> -> vector<34x8xf32>
    %238 = vector.extract_strided_slice %215 {offsets = [0, 8], sizes = [34, 8], strides = [1, 1]} : vector<34x96xf32> to vector<34x8xf32>
    %239 = arith.truncf %238 : vector<34x8xf32> to vector<34x8xbf16>
    %240 = vector.extract_strided_slice %215 {offsets = [0, 40], sizes = [34, 8], strides = [1, 1]} : vector<34x96xf32> to vector<34x8xf32>
    %241 = arith.truncf %240 : vector<34x8xf32> to vector<34x8xbf16>
    %242 = vector.extract_strided_slice %215 {offsets = [0, 72], sizes = [34, 8], strides = [1, 1]} : vector<34x96xf32> to vector<34x8xf32>
    %243 = arith.truncf %242 : vector<34x8xf32> to vector<34x8xbf16>
    %cst_75 = arith.constant dense<0.000000e+00> : vector<34x34xf32>
    %244 = tpu.matmul %239, %241, %cst_75 {dimension_numbers = #tpu.dot_dimension_numbers<[1], [1], [0], [0], [0, 0, 1, 0], [], []>} : vector<34x8xbf16>, vector<34x8xbf16>, vector<34x34xf32> -> vector<34x34xf32>
    %cst_76 = arith.constant 0.353553385 : f32
    %245 = vector.broadcast %cst_76 : f32 to vector<34x34xf32>
    %246 = arith.mulf %244, %245 : vector<34x34xf32>
    %247 = arith.addf %246, %22 : vector<34x34xf32>
    %cst_77 = arith.constant dense<0xFF800000> : vector<34xf32>
    %248 = vector.multi_reduction <maximumf>, %247, %cst_77 [1] : vector<34x34xf32> to vector<34xf32>
    %249 = vector.shape_cast %248 : vector<34xf32> to vector<34x1xf32>
    %250 = vector.broadcast %249 : vector<34x1xf32> to vector<34x34xf32>
    %251 = arith.subf %247, %250 : vector<34x34xf32>
    %252 = math.exp %251 : vector<34x34xf32>
    %cst_78 = arith.constant dense<0.000000e+00> : vector<34xf32>
    %253 = vector.multi_reduction <add>, %252, %cst_78 [1] : vector<34x34xf32> to vector<34xf32>
    %254 = vector.shape_cast %253 : vector<34xf32> to vector<34x1xf32>
    %255 = tpu.reciprocal %254 {approx = true} : vector<34x1xf32> -> vector<34x1xf32>
    %256 = vector.broadcast %255 : vector<34x1xf32> to vector<34x34xf32>
    %257 = arith.mulf %252, %256 : vector<34x34xf32>
    %258 = arith.truncf %257 : vector<34x34xf32> to vector<34x34xbf16>
    %cst_79 = arith.constant dense<0.000000e+00> : vector<34x8xf32>
    %259 = tpu.matmul %258, %243, %cst_79 {dimension_numbers = #tpu.dot_dimension_numbers<[1], [0], [0], [1], [0, 0, 1, 1], [], []>} : vector<34x34xbf16>, vector<34x8xbf16>, vector<34x8xf32> -> vector<34x8xf32>
    %260 = vector.extract_strided_slice %215 {offsets = [0, 16], sizes = [34, 8], strides = [1, 1]} : vector<34x96xf32> to vector<34x8xf32>
    %261 = arith.truncf %260 : vector<34x8xf32> to vector<34x8xbf16>
    %262 = vector.extract_strided_slice %215 {offsets = [0, 48], sizes = [34, 8], strides = [1, 1]} : vector<34x96xf32> to vector<34x8xf32>
    %263 = arith.truncf %262 : vector<34x8xf32> to vector<34x8xbf16>
    %264 = vector.extract_strided_slice %215 {offsets = [0, 80], sizes = [34, 8], strides = [1, 1]} : vector<34x96xf32> to vector<34x8xf32>
    %265 = arith.truncf %264 : vector<34x8xf32> to vector<34x8xbf16>
    %cst_80 = arith.constant dense<0.000000e+00> : vector<34x34xf32>
    %266 = tpu.matmul %261, %263, %cst_80 {dimension_numbers = #tpu.dot_dimension_numbers<[1], [1], [0], [0], [0, 0, 1, 0], [], []>} : vector<34x8xbf16>, vector<34x8xbf16>, vector<34x34xf32> -> vector<34x34xf32>
    %cst_81 = arith.constant 0.353553385 : f32
    %267 = vector.broadcast %cst_81 : f32 to vector<34x34xf32>
    %268 = arith.mulf %266, %267 : vector<34x34xf32>
    %269 = arith.addf %268, %22 : vector<34x34xf32>
    %cst_82 = arith.constant dense<0xFF800000> : vector<34xf32>
    %270 = vector.multi_reduction <maximumf>, %269, %cst_82 [1] : vector<34x34xf32> to vector<34xf32>
    %271 = vector.shape_cast %270 : vector<34xf32> to vector<34x1xf32>
    %272 = vector.broadcast %271 : vector<34x1xf32> to vector<34x34xf32>
    %273 = arith.subf %269, %272 : vector<34x34xf32>
    %274 = math.exp %273 : vector<34x34xf32>
    %cst_83 = arith.constant dense<0.000000e+00> : vector<34xf32>
    %275 = vector.multi_reduction <add>, %274, %cst_83 [1] : vector<34x34xf32> to vector<34xf32>
    %276 = vector.shape_cast %275 : vector<34xf32> to vector<34x1xf32>
    %277 = tpu.reciprocal %276 {approx = true} : vector<34x1xf32> -> vector<34x1xf32>
    %278 = vector.broadcast %277 : vector<34x1xf32> to vector<34x34xf32>
    %279 = arith.mulf %274, %278 : vector<34x34xf32>
    %280 = arith.truncf %279 : vector<34x34xf32> to vector<34x34xbf16>
    %cst_84 = arith.constant dense<0.000000e+00> : vector<34x8xf32>
    %281 = tpu.matmul %280, %265, %cst_84 {dimension_numbers = #tpu.dot_dimension_numbers<[1], [0], [0], [1], [0, 0, 1, 1], [], []>} : vector<34x34xbf16>, vector<34x8xbf16>, vector<34x8xf32> -> vector<34x8xf32>
    %282 = vector.extract_strided_slice %215 {offsets = [0, 24], sizes = [34, 8], strides = [1, 1]} : vector<34x96xf32> to vector<34x8xf32>
    %283 = arith.truncf %282 : vector<34x8xf32> to vector<34x8xbf16>
    %284 = vector.extract_strided_slice %215 {offsets = [0, 56], sizes = [34, 8], strides = [1, 1]} : vector<34x96xf32> to vector<34x8xf32>
    %285 = arith.truncf %284 : vector<34x8xf32> to vector<34x8xbf16>
    %286 = vector.extract_strided_slice %215 {offsets = [0, 88], sizes = [34, 8], strides = [1, 1]} : vector<34x96xf32> to vector<34x8xf32>
    %287 = arith.truncf %286 : vector<34x8xf32> to vector<34x8xbf16>
    %cst_85 = arith.constant dense<0.000000e+00> : vector<34x34xf32>
    %288 = tpu.matmul %283, %285, %cst_85 {dimension_numbers = #tpu.dot_dimension_numbers<[1], [1], [0], [0], [0, 0, 1, 0], [], []>} : vector<34x8xbf16>, vector<34x8xbf16>, vector<34x34xf32> -> vector<34x34xf32>
    %cst_86 = arith.constant 0.353553385 : f32
    %289 = vector.broadcast %cst_86 : f32 to vector<34x34xf32>
    %290 = arith.mulf %288, %289 : vector<34x34xf32>
    %291 = arith.addf %290, %22 : vector<34x34xf32>
    %cst_87 = arith.constant dense<0xFF800000> : vector<34xf32>
    %292 = vector.multi_reduction <maximumf>, %291, %cst_87 [1] : vector<34x34xf32> to vector<34xf32>
    %293 = vector.shape_cast %292 : vector<34xf32> to vector<34x1xf32>
    %294 = vector.broadcast %293 : vector<34x1xf32> to vector<34x34xf32>
    %295 = arith.subf %291, %294 : vector<34x34xf32>
    %296 = math.exp %295 : vector<34x34xf32>
    %cst_88 = arith.constant dense<0.000000e+00> : vector<34xf32>
    %297 = vector.multi_reduction <add>, %296, %cst_88 [1] : vector<34x34xf32> to vector<34xf32>
    %298 = vector.shape_cast %297 : vector<34xf32> to vector<34x1xf32>
    %299 = tpu.reciprocal %298 {approx = true} : vector<34x1xf32> -> vector<34x1xf32>
    %300 = vector.broadcast %299 : vector<34x1xf32> to vector<34x34xf32>
    %301 = arith.mulf %296, %300 : vector<34x34xf32>
    %302 = arith.truncf %301 : vector<34x34xf32> to vector<34x34xbf16>
    %cst_89 = arith.constant dense<0.000000e+00> : vector<34x8xf32>
    %303 = tpu.matmul %302, %287, %cst_89 {dimension_numbers = #tpu.dot_dimension_numbers<[1], [0], [0], [1], [0, 0, 1, 1], [], []>} : vector<34x34xbf16>, vector<34x8xbf16>, vector<34x8xf32> -> vector<34x8xf32>
    %304 = tpu.concatenate %237, %259, %281, %303 in 1 : vector<34x8xf32>, vector<34x8xf32>, vector<34x8xf32>, vector<34x8xf32> -> vector<34x32xf32>
    %305 = arith.truncf %304 : vector<34x32xf32> to vector<34x32xbf16>
    %cst_90 = arith.constant dense<0.000000e+00> : vector<34x32xf32>
    %306 = tpu.matmul %305, %203, %cst_90 {dimension_numbers = #tpu.dot_dimension_numbers<[1], [0], [0], [1], [0, 0, 1, 1], [], []>} : vector<34x32xbf16>, vector<32x32xbf16>, vector<34x32xf32> -> vector<34x32xf32>
    %307 = vector.broadcast %205 : vector<1x32xf32> to vector<34x32xf32>
    %308 = arith.addf %306, %307 : vector<34x32xf32>
    %309 = arith.addf %193, %308 : vector<34x32xf32>
    %cst_91 = arith.constant dense<0.000000e+00> : vector<34xf32>
    %310 = vector.multi_reduction <add>, %309, %cst_91 [1] : vector<34x32xf32> to vector<34xf32>
    %311 = vector.shape_cast %310 : vector<34xf32> to vector<34x1xf32>
    %cst_92 = arith.constant 3.200000e+01 : f32
    %312 = vector.broadcast %cst_92 : f32 to vector<34x1xf32>
    %313 = arith.divf %311, %312 : vector<34x1xf32>
    %314 = arith.mulf %309, %309 : vector<34x32xf32>
    %cst_93 = arith.constant dense<0.000000e+00> : vector<34xf32>
    %315 = vector.multi_reduction <add>, %314, %cst_93 [1] : vector<34x32xf32> to vector<34xf32>
    %316 = vector.shape_cast %315 : vector<34xf32> to vector<34x1xf32>
    %cst_94 = arith.constant 3.200000e+01 : f32
    %317 = vector.broadcast %cst_94 : f32 to vector<34x1xf32>
    %318 = arith.divf %316, %317 : vector<34x1xf32>
    %319 = vector.broadcast %313 : vector<34x1xf32> to vector<34x32xf32>
    %320 = arith.subf %309, %319 : vector<34x32xf32>
    %321 = arith.mulf %313, %313 : vector<34x1xf32>
    %322 = arith.subf %318, %321 : vector<34x1xf32>
    %cst_95 = arith.constant 9.99999974E-6 : f32
    %323 = vector.broadcast %cst_95 : f32 to vector<34x1xf32>
    %324 = arith.addf %322, %323 : vector<34x1xf32>
    %325 = math.rsqrt %324 : vector<34x1xf32>
    %326 = vector.broadcast %325 : vector<34x1xf32> to vector<34x32xf32>
    %327 = arith.mulf %320, %326 : vector<34x32xf32>
    %328 = vector.broadcast %207 : vector<1x32xf32> to vector<34x32xf32>
    %329 = arith.mulf %327, %328 : vector<34x32xf32>
    %330 = vector.broadcast %208 : vector<1x32xf32> to vector<34x32xf32>
    %331 = arith.addf %329, %330 : vector<34x32xf32>
    %332 = arith.truncf %331 : vector<34x32xf32> to vector<34x32xbf16>
    %cst_96 = arith.constant dense<0.000000e+00> : vector<34x128xf32>
    %333 = tpu.matmul %332, %197, %cst_96 {dimension_numbers = #tpu.dot_dimension_numbers<[1], [0], [0], [1], [0, 0, 1, 1], [], []>} : vector<34x32xbf16>, vector<32x128xbf16>, vector<34x128xf32> -> vector<34x128xf32>
    %334 = vector.broadcast %206 : vector<1x128xf32> to vector<34x128xf32>
    %335 = arith.addf %333, %334 : vector<34x128xf32>
    %cst_97 = arith.constant 0.000000e+00 : f32
    %336 = vector.broadcast %cst_97 : f32 to vector<34x128xf32>
    %337 = arith.maximumf %335, %336 : vector<34x128xf32>
    %338 = arith.truncf %337 : vector<34x128xf32> to vector<34x128xbf16>
    %cst_98 = arith.constant dense<0.000000e+00> : vector<34x32xf32>
    %339 = tpu.matmul %338, %199, %cst_98 {dimension_numbers = #tpu.dot_dimension_numbers<[1], [0], [0], [1], [0, 0, 1, 1], [], []>} : vector<34x128xbf16>, vector<128x32xbf16>, vector<34x32xf32> -> vector<34x32xf32>
    %340 = vector.broadcast %211 : vector<1x32xf32> to vector<34x32xf32>
    %341 = arith.addf %339, %340 : vector<34x32xf32>
    %342 = arith.addf %331, %341 : vector<34x32xf32>
    %cst_99 = arith.constant dense<0.000000e+00> : vector<34xf32>
    %343 = vector.multi_reduction <add>, %342, %cst_99 [1] : vector<34x32xf32> to vector<34xf32>
    %344 = vector.shape_cast %343 : vector<34xf32> to vector<34x1xf32>
    %cst_100 = arith.constant 3.200000e+01 : f32
    %345 = vector.broadcast %cst_100 : f32 to vector<34x1xf32>
    %346 = arith.divf %344, %345 : vector<34x1xf32>
    %347 = arith.mulf %342, %342 : vector<34x32xf32>
    %cst_101 = arith.constant dense<0.000000e+00> : vector<34xf32>
    %348 = vector.multi_reduction <add>, %347, %cst_101 [1] : vector<34x32xf32> to vector<34xf32>
    %349 = vector.shape_cast %348 : vector<34xf32> to vector<34x1xf32>
    %cst_102 = arith.constant 3.200000e+01 : f32
    %350 = vector.broadcast %cst_102 : f32 to vector<34x1xf32>
    %351 = arith.divf %349, %350 : vector<34x1xf32>
    %352 = vector.broadcast %346 : vector<34x1xf32> to vector<34x32xf32>
    %353 = arith.subf %342, %352 : vector<34x32xf32>
    %354 = arith.mulf %346, %346 : vector<34x1xf32>
    %355 = arith.subf %351, %354 : vector<34x1xf32>
    %cst_103 = arith.constant 9.99999974E-6 : f32
    %356 = vector.broadcast %cst_103 : f32 to vector<34x1xf32>
    %357 = arith.addf %355, %356 : vector<34x1xf32>
    %358 = math.rsqrt %357 : vector<34x1xf32>
    %359 = vector.broadcast %358 : vector<34x1xf32> to vector<34x32xf32>
    %360 = arith.mulf %353, %359 : vector<34x32xf32>
    %361 = vector.broadcast %209 : vector<1x32xf32> to vector<34x32xf32>
    %362 = arith.mulf %360, %361 : vector<34x32xf32>
    %363 = vector.broadcast %210 : vector<1x32xf32> to vector<34x32xf32>
    %364 = arith.addf %362, %363 : vector<34x32xf32>
    %c0_104 = arith.constant 0 : index
    %c0_105 = arith.constant 0 : index
    %365 = vector.load %arg8[%c0_104, %c0_105] : memref<2x128xf32, #tpu.memory_space<vmem>>, vector<2x128xf32>
    %366 = vector.extract_strided_slice %365 {offsets = [0, 0], sizes = [1, 32], strides = [1, 1]} : vector<2x128xf32> to vector<1x32xf32>
    %367 = vector.extract_strided_slice %365 {offsets = [0, 32], sizes = [1, 32], strides = [1, 1]} : vector<2x128xf32> to vector<1x32xf32>
    %368 = vector.extract_strided_slice %365 {offsets = [1, 0], sizes = [1, 128], strides = [1, 1]} : vector<2x128xf32> to vector<1x128xf32>
    %cst_106 = arith.constant dense<0.000000e+00> : vector<34xf32>
    %369 = vector.multi_reduction <add>, %364, %cst_106 [1] : vector<34x32xf32> to vector<34xf32>
    %370 = vector.shape_cast %369 : vector<34xf32> to vector<34x1xf32>
    %cst_107 = arith.constant 3.200000e+01 : f32
    %371 = vector.broadcast %cst_107 : f32 to vector<34x1xf32>
    %372 = arith.divf %370, %371 : vector<34x1xf32>
    %373 = arith.mulf %364, %364 : vector<34x32xf32>
    %cst_108 = arith.constant dense<0.000000e+00> : vector<34xf32>
    %374 = vector.multi_reduction <add>, %373, %cst_108 [1] : vector<34x32xf32> to vector<34xf32>
    %375 = vector.shape_cast %374 : vector<34xf32> to vector<34x1xf32>
    %cst_109 = arith.constant 3.200000e+01 : f32
    %376 = vector.broadcast %cst_109 : f32 to vector<34x1xf32>
    %377 = arith.divf %375, %376 : vector<34x1xf32>
    %378 = vector.broadcast %372 : vector<34x1xf32> to vector<34x32xf32>
    %379 = arith.subf %364, %378 : vector<34x32xf32>
    %380 = arith.mulf %372, %372 : vector<34x1xf32>
    %381 = arith.subf %377, %380 : vector<34x1xf32>
    %cst_110 = arith.constant 9.99999974E-6 : f32
    %382 = vector.broadcast %cst_110 : f32 to vector<34x1xf32>
    %383 = arith.addf %381, %382 : vector<34x1xf32>
    %384 = math.rsqrt %383 : vector<34x1xf32>
    %385 = vector.broadcast %384 : vector<34x1xf32> to vector<34x32xf32>
    %386 = arith.mulf %379, %385 : vector<34x32xf32>
    %387 = vector.broadcast %366 : vector<1x32xf32> to vector<34x32xf32>
    %388 = arith.mulf %386, %387 : vector<34x32xf32>
    %389 = vector.broadcast %367 : vector<1x32xf32> to vector<34x32xf32>
    %390 = arith.addf %388, %389 : vector<34x32xf32>
    %391 = arith.truncf %390 : vector<34x32xf32> to vector<34x32xbf16>
    %c0_111 = arith.constant 0 : index
    %c0_112 = arith.constant 0 : index
    %392 = vector.load %arg7[%c0_111, %c0_112] : memref<32x128xbf16, #tpu.memory_space<vmem>>, vector<32x128xbf16>
    %cst_113 = arith.constant dense<0.000000e+00> : vector<34x128xf32>
    %393 = tpu.matmul %391, %392, %cst_113 {dimension_numbers = #tpu.dot_dimension_numbers<[1], [0], [0], [1], [0, 0, 1, 1], [], []>} : vector<34x32xbf16>, vector<32x128xbf16>, vector<34x128xf32> -> vector<34x128xf32>
    %394 = vector.broadcast %368 : vector<1x128xf32> to vector<34x128xf32>
    %395 = arith.addf %393, %394 : vector<34x128xf32>
    %c0_114 = arith.constant 0 : index
    %c0_115 = arith.constant 0 : index
    %396 = vector.load %arg9[%c0_114, %c0_115] : memref<34x128xf32, #tpu.memory_space<vmem>>, vector<34x128xf32>
    tpu.vector_store %arg9[%c0_114, %c0_115], %395 {strides = array<i32>} : memref<34x128xf32, #tpu.memory_space<vmem>>, vector<34x128xf32>,
    return
  }
}

</mosaic_0001>

<bundles_post_ra>
// kernel: vit_forward.1
= control target key start
LH: loop header
LB: loop body
LE: loop exit
PB: predicated region body
PF: predicated region fallthrough
CT: control target
= control target key end

     0   :  { %v4643_v0 = vmov 0.0   ;;  %vm4644_vm0 = vmmov 0   ;;  %vm88_vm1 = vcmask 523264   ;;  %vm240_vm2 = vcmask 261120   ;;  %s4645_s15 = smov 96   ;;  %s4646_s16 = smov 88   ;;  %s6308_s2 = inlined_call_operand.vmem [shape: bf16[64,32], index: 2, kind: input, shape index: {}]   ;;  %s6309_s0 = inlined_call_operand.vmem [shape: bf16[34,64], index: 0, kind: input, shape index: {}]   ;;  %s6310_s3 = inlined_call_operand.vmem [shape: bf16[2,32,128], index: 3, kind: input, shape index: {}]   ;;  %s6311_s1 = inlined_call_operand.vmem [shape: f32[34,32], index: 1, kind: input, shape index: {}]   ;;  %s6312_s6 = inlined_call_operand.vmem [shape: f32[2,4,128], index: 6, kind: input, shape index: {}]   ;;  %s6313_s4 = inlined_call_operand.vmem [shape: bf16[2,32,128], index: 4, kind: input, shape index: {}]   ;;  %s6314_s5 = inlined_call_operand.vmem [shape: bf16[2,128,32], index: 5, kind: input, shape index: {}]   ;;  %s6315_s7 = inlined_call_operand.vmem [shape: bf16[32,128], index: 7, kind: input, shape index: {}]   ;;  %s6316_s8 = inlined_call_operand.vmem [shape: f32[2,128], index: 8, kind: input, shape index: {}]   ;;  %s6317_s9 = inlined_call_operand.vmem [shape: f32[34,128], index: 9, kind: output, shape index: {}]  }
   0x1   :  { %3842 = vmatprep.subr.bf16.mxu0 %v4643_v0  ;;  %v4396_v1 = vld [vmem:[%s6308_s2 + $0x18] sm:$0xff]   ;;  %3850 = vmatprep.mubr.msk.bf16.mxu0 %vm4644_vm0, %v4643_v0  ;;  %v4397_v2 = vld [vmem:[%s6308_s2 + $0x10] sm:$0xff]   ;;  %v4398_v3 = vld [vmem:[%s6308_s2 + $0x8] sm:$0xff]   ;;  %v154_v35 = vlaneseq  ;;  %s4647_s17 = smov 80   ;;  %s4648_s18 = smov 120   ;;  %vm318_vm3 = vcmask 64512  }
   0x2   :  { %3862 = vmatprep.subr.bf16.mxu1 %v4643_v0  ;;  %3866 = vmatprep.mubr.msk.bf16.mxu1 %vm4644_vm0, %v4643_v0  ;;  %v4399_v4 = vld [vmem:[%s6308_s2] sm:$0xff]   ;;  %v4401_v6 = vld [vmem:[%s6309_s0 + $0x8] sm:$0xff]   ;;  %v4402_v7 = vld [vmem:[%s6309_s0 + $0x10] ss:$0 sps:$4 sm:$0x11]   ;;  %s4649_s19 = smov 72  }
   0x3   :  { %3843 = vmatpush3.bf16.msra.mxu0 %v4396_v1  ;;  %v4400_v5 = vld [vmem:[%s6309_s0] sm:$0xff]   ;;  %v4403_v8 = vld [vmem:[%s6310_s3 + $0x8] sm:$0xff]   ;;  %v48_v20 = vld [vmem:[%s6311_s1 + $0x10] sm:$0xff]  ;;  %v4797_v36 = vshrl.u32 %v154_v35, 7  ;;  %s4650_s20 = smov 112   ;;  %s4651_s2 = smov 104  }
   0x4   :  { %3844 = vmatprep.subr.bf16.mxu0 %v4643_v0  ;;  %3863 = vmatpush3.bf16.msra.mxu1 %v4403_v8  ;;  %v4404_v9 = vld [vmem:[%s6310_s3] sm:$0xff]   ;;  %v47_v13 = vld [vmem:[%s6311_s1 + $0x8] sm:$0xff]  ;;  %v49_v22 = vld [vmem:[%s6311_s1 + $0x18] sm:$0xff]  ;;  %s4652_s21 = smov 64   ;;  %s4653_s22 = smov 56   ;;  %vm480_vm4 = vcmask 1040384  }
   0x5   :  { %3864 = vmatprep.subr.bf16.mxu1 %v4643_v0  ;;  %v46_v11 = vld [vmem:[%s6311_s1] sm:$0xff]  ;;  %v4800_v37 = vsub.s32 0, %v4797_v36  ;;  %vm403_vm7 = vcmask 277504   ;;  %vm416_vm11 = vcmask 271360   ;;  %s4655_s23 = smov 48   ;;  %s4656_s24 = smov 40  }
   0x6   :  { %v50_v27 = vld [vmem:[%s6311_s1 + $0x20] sm:$0x3]  ;;  %s4657_s26 = smov 32   ;;  %s4658_s29 = smov 8   ;;  %vm1295_vm12 = vcmask 130048   ;;  %vm1301_vm13 = vcmask 195584  }
   0x7   :  { %3845 = vmatpush3.bf16.msra.mxu0 %v4397_v2  ;;  %v220_v38 = vld [vmem:[%s6312_s6] sm:$0xf]  ;;  %s4659_s30 = smov 16   ;;  %s4660_s10 = smov 24   ;;  %vm1402_vm14 = vcmask 254976  }
   0x8   :  { %3846 = vmatprep.subr.bf16.mxu0 %v4643_v0  ;;  %3865 = vmatpush3.bf16.msra.mxu1 %v4404_v9  ;;  %v4806_v40 = vrot.slane %v220_v38, %v4800_v37 }
   0x9   :  { %3878 = vmatprep.subr.bf16.mxu1 %v4643_v0 }
   0xb   :  { %3847 = vmatpush3.bf16.msra.mxu0 %v4398_v3 }
   0xc   :  { %3848 = vmatprep.subr.bf16.mxu0 %v4643_v0 }
   0xf   :  { %3849 = vmatpush3.bf16.msra.mxu0 %v4399_v4 }
  0x10   :  { %3896 = vmatprep.subr.bf16.mxu0 %v4643_v0 }
  0x12   :  { %3851 = vmatmul.mubr.msk.bf16.vlgmr.msra.gmra.mxu0 %vm88_vm1, %v4400_v5 }
  0x13   :  { %3854 = vmatprep.mubr.msk.bf16.mxu0 %vm4644_vm0, %v4643_v0 }
  0x1a   :  { %3855 = vmatmul.mubr.msk.bf16.gmra.mxu0 %vm88_vm1, %v4401_v6 }
  0x1b   :  { %3858 = vmatprep.mubr.msk.bf16.mxu0 %vm4644_vm0, %v4643_v0 }
  0x22   :  { %3859 = vmatmul.mubr.msk.bf16.gmra.mxu0 %vm88_vm1, %v4402_v7 }
  0x23   :  { %3902 = vmatprep.mubr.msk.bf16.mxu0 %vm4644_vm0, %v4643_v0 }
  0xd2   :  { %v132_v10 = vpop.f32.mrf.mxu0 }
  0xd3   :  { %v4762_v15 = vadd.f32 %v132_v10, %v46_v11 }
  0xd4   :  { %v3852_v12 = vpop.f32.mrf.mxu0 }
  0xd6   :  { %v135_v14 = vpop.f32.mrf.mxu0 }
  0xd7   :  { %v4764_v16 = vadd.f32 %v135_v14, %v47_v13 }
  0xd8   :  { %v3853_v17 = vpop.f32.mrf.mxu0 }
  0xd9   :  { %v221_v18 = vpack.c.bf16 %v4764_v16, %v4762_v15 }
  0xda   :  { %v140_v19 = vpop.f32.mrf.mxu0 }
  0xdb   :  { %3867 = vmatmul.mubr.msk.bf16.vlgmr.msra.gmra.mxu1 %vm240_vm2, %v221_v18  ;;  %v4777_v24 = vadd.f32 %v140_v19, %v48_v20 }
  0xdc   :  { %v3856_v21 = vpop.f32.mrf.mxu0  ;;  %3870 = vmatprep.mubr.msk.bf16.mxu1 %vm4644_vm0, %v4643_v0 }
  0xde   :  { %v143_v23 = vpop.f32.mrf.mxu0 }
  0xdf   :  { %v4779_v25 = vadd.f32 %v143_v23, %v49_v22 }
  0xe0   :  { %v3857_v26 = vpop.f32.mrf.mxu0 }
  0xe1   :  { %v222_v28 = vpack.c.bf16 %v4779_v25, %v4777_v24 }
  0xe2   :  { %v148_v29 = vpop.f32.mrf.mxu0 }
  0xe3   :  { %v4786_v30 = vadd.f32 %v148_v29, %v50_v27  ;;  %3871 = vmatmul.mubr.msk.bf16.gmra.mxu1 %vm240_vm2, %v222_v28 }
  0xe4   :  { %v3860_v31 = vpop.f32.mrf.mxu0  ;;  %3874 = vmatprep.mubr.msk.bf16.mxu1 %vm4644_vm0, %v4643_v0 }
  0xe5   :  { %v223_v33 = vpack.c.bf16 %v4786_v30, %v4786_v30 }
  0xe6   :  { %v151_v32 = vpop.f32.mrf.mxu0 }
  0xe8   :  { %v3861_v34 = vpop.f32.mrf.mxu0 }
  0xeb   :  { %3875 = vmatmul.mubr.msk.bf16.gmra.mxu1 %vm240_vm2, %v223_v33 }
  0xec   :  { %3884 = vmatprep.mubr.msk.bf16.mxu1 %vm4644_vm0, %v4643_v0 }
 0x19b   :  { %v284_v39 = vpop.f32.mrf.mxu1 }
 0x19c   :  { %v285_v43 = vadd.f32 %v284_v39, %v4806_v40 }
 0x19d   :  { %v3868_v41 = vpop.f32.mrf.mxu1 }
 0x19f   :  { %v287_v42 = vpop.f32.mrf.mxu1 }
 0x1a0   :  { %v288_v44 = vadd.f32 %v287_v42, %v4806_v40 }
 0x1a1   :  { %v3869_v45 = vpop.f32.mrf.mxu1 }
 0x1a2   :  { %v4810_v46 = vpack.c.bf16 %v288_v44, %v285_v43  ;;  %v166_v43 = vand.u32 127, %v154_v35  ;;  %v160_v44 = vcvt.s32.f32 %v4797_v36 }
 0x1a3   :  { %v292_v47 = vpop.f32.mrf.mxu1 }
 0x1a4   :  { %312 = vrot.lane.b32.xlu1 %v4810_v46, %s4645_s15  ;;  %v293_v57 = vadd.f32 %v292_v47, %v4806_v40  ;;  %v167_v45 = vcvt.s32.f32 %v166_v43  ;;  %v156_v47 = vadd.s32 8, %v4797_v36 }
 0x1a5   :  { %v3872_v48 = vpop.f32.mrf.mxu1 }
 0x1a6   :  { %v168_v48 = vadd.f32 0.5, %v160_v44 }
 0x1a7   :  { %v295_v49 = vpop.f32.mrf.mxu1 }
 0x1a8   :  { %v296_v54 = vadd.f32 %v295_v49, %v4806_v40  ;;  %v183_v49 = vadd.f32 0.5, %v167_v45 }
 0x1a9   :  { %v3873_v50 = vpop.f32.mrf.mxu1 }
 0x1aa   :  { %v4823_v59 = vpack.c.bf16 %v296_v54, %v293_v57  ;;  %v157_v50 = vadd.s32 16, %v4797_v36  ;;  %v158_v57 = vadd.s32 24, %v4797_v36 }
 0x1ab   :  { %v300_v51 = vpop.f32.mrf.mxu1 }
 0x1ac   :  { %v301_v52 = vadd.f32 %v300_v51, %v4806_v40  ;;  %v161_v51 = vcvt.s32.f32 %v156_v47  ;;  %v162_v54 = vcvt.s32.f32 %v157_v50 }
 0x1ad   :  { %v3876_v53 = vpop.f32.mrf.mxu1 }
 0x1ae   :  { %v4816_v55 = vpack.c.bf16 %v301_v52, %v301_v52  ;;  %v173_v52 = vmul.f32 0.05882353, %v168_v48  ;;  %v184_v53 = vmul.f32 0.05882353, %v183_v49 }
 0x1af   :  { %v303_v56 = vpop.f32.mrf.mxu1 }
 0x1b0   :  { %550 = vrot.lane.b32.xlu1 %v4816_v55, %s4646_s16  ;;  %316 = vrot.lane.b32.xlu0 %v4816_v55, %s4645_s15  ;;  %v169_v56 = vadd.f32 0.5, %v161_v51 }
 0x1b1   :  { %v3877_v58 = vpop.f32.mrf.mxu1 }
 0x1b2   :  { %v178_v58 = vfloor.f32 %v173_v52  ;;  %v174_v35 = vmul.f32 0.05882353, %v169_v56 }
 0x1b4   :  { %546 = vrot.lane.b32.xlu1 %v4810_v46, %s4646_s16  ;;  %314 = vrot.lane.b32.xlu0 %v4823_v59, %s4645_s15 }
 0x1b8   :  { %780 = vrot.lane.b32.xlu1 %v4816_v55, %s4647_s17  ;;  %548 = vrot.lane.b32.xlu0 %v4823_v59, %s4646_s16 }
 0x1bc   :  { %778 = vrot.lane.b32.xlu1 %v4823_v59, %s4647_s17  ;;  %540 = vrot.lane.b32.xlu0 %v4810_v46, %s4648_s18 }
 0x1c0   :  { %776 = vrot.lane.b32.xlu1 %v4810_v46, %s4647_s17  ;;  %542 = vrot.lane.b32.xlu0 %v4823_v59, %s4648_s18 }
 0x1c4   :  { %1010 = vrot.lane.b32.xlu1 %v4816_v55, %s4649_s19  ;;  %544 = vrot.lane.b32.xlu0 %v4816_v55, %s4648_s18 }
 0x1c8   :  { %1008 = vrot.lane.b32.xlu1 %v4823_v59, %s4649_s19  ;;  %770 = vrot.lane.b32.xlu0 %v4810_v46, %s4650_s20 }
 0x1cc   :  { %1006 = vrot.lane.b32.xlu1 %v4810_v46, %s4649_s19  ;;  %772 = vrot.lane.b32.xlu0 %v4823_v59, %s4650_s20 }
 0x1d0   :  { %1002 = vrot.lane.b32.xlu1 %v4823_v59, %s4651_s2  ;;  %774 = vrot.lane.b32.xlu0 %v4816_v55, %s4650_s20 }
 0x1d4   :  { %463 = vrot.lane.b32.xlu1 %v4810_v46, %s4652_s21  ;;  %1000 = vrot.lane.b32.xlu0 %v4810_v46, %s4651_s2 }
 0x1d8   :  { %467 = vrot.lane.b32.xlu1 %v4816_v55, %s4652_s21  ;;  %1004 = vrot.lane.b32.xlu0 %v4816_v55, %s4651_s2 }
 0x1dc   :  { %465 = vrot.lane.b32.xlu0 %v4823_v59, %s4652_s21 }
 0x1e0   :  { %698 = vrot.lane.b32.xlu0 %v4816_v55, %s4653_s22 }
 0x216   :  { %v313_v60 = vpop.permute.xlu1 %312 }
 0x217   :  { %v329_v10 = vsel %vm318_vm3, %v313_v60, 0  ;;  %v185_v60 = vfloor.f32 %v184_v53 }
 0x219   :  { %vm186_vm5 = vcmp.eq.f32.partialorder %v178_v58, %v185_v60 }
 0x222   :  { %v551_v61 = vpop.permute.xlu1 %550  ;;  %v317_v62 = vpop.permute.xlu0 %316 }
 0x223   :  { %v335_v63 = vsel %vm318_vm3, %v317_v62, 0  ;;  %v568_v17 = vsel %vm318_vm3, %v551_v61, 0  ;;  %v170_v61 = vadd.f32 0.5, %v162_v54  ;;  %v163_v62 = vcvt.s32.f32 %v158_v57 }
 0x224   :  { %3879 = vmatpush3.bf16.xpose.msra.mxu1 %v335_v63  ;;  %v159_v63 = vadd.s32 32, %v4797_v36 }
 0x225   :  { %3880 = vmatprep.subr.bf16.mxu1 %v4643_v0 }
 0x226   :  { %v547_v1 = vpop.permute.xlu1 %546  ;;  %v315_v2 = vpop.permute.xlu0 %314 }
 0x227   :  { %v332_v5 = vsel %vm318_vm3, %v315_v2, 0  ;;  %v562_v29 = vsel %vm318_vm3, %v547_v1, 0  ;;  %v175_v1 = vmul.f32 0.05882353, %v170_v61  ;;  %v179_v2 = vfloor.f32 %v174_v35 }
 0x229   :  { %vm187_vm6 = vcmp.eq.f32.partialorder %v179_v2, %v185_v60 }
 0x22a   :  { %v781_v3 = vpop.permute.xlu1 %780  ;;  %v549_v4 = vpop.permute.xlu0 %548 }
 0x22b   :  { %v565_v22 = vsel %vm318_vm3, %v549_v4, 0  ;;  %v798_v33 = vsel %vm318_vm3, %v781_v3, 0  ;;  %v171_v3 = vadd.f32 0.5, %v163_v62  ;;  %v164_v4 = vcvt.s32.f32 %v159_v63 }
 0x22c   :  { %3881 = vmatpush3.bf16.xpose.msra.mxu1 %v332_v5 }
 0x22d   :  { %3882 = vmatprep.subr.bf16.mxu1 %v4643_v0 }
 0x22e   :  { %v779_v6 = vpop.permute.xlu1 %778  ;;  %v541_v7 = vpop.permute.xlu0 %540 }
 0x22f   :  { %v795_v34 = vsel %vm318_vm3, %v779_v6, 0  ;;  %v4654_v6 = vmov -1e+30  }
 0x232   :  { %v777_v8 = vpop.permute.xlu1 %776  ;;  %v543_v9 = vpop.permute.xlu0 %542 }
 0x233   :  { %v792_v38 = vsel %vm318_vm3, %v777_v8, 0  ;;  %v180_v8 = vfloor.f32 %v175_v1 }
 0x234   :  { %3883 = vmatpush3.bf16.xpose.msra.mxu1 %v329_v10  ;;  %v176_v10 = vmul.f32 0.05882353, %v171_v3 }
 0x235   :  { %3914 = vmatprep.subr.bf16.mxu1 %v4643_v0  ;;  %vm188_vm8 = vcmp.eq.f32.partialorder %v180_v8, %v185_v60 }
 0x236   :  { %v1011_v11 = vpop.permute.xlu1 %1010  ;;  %v545_v12 = vpop.permute.xlu0 %544 }
 0x237   :  { %v1028_v39 = vsel %vm318_vm3, %v1011_v11, 0  ;;  %v172_v11 = vadd.f32 0.5, %v164_v4 }
 0x23a   :  { %v1009_v13 = vpop.permute.xlu1 %1008  ;;  %v771_v14 = vpop.permute.xlu0 %770 }
 0x23b   :  { %3885 = vmatmul.mubr.msk.bf16.vlgmr.msra.gmra.mxu1 %vm318_vm3, %v4810_v46  ;;  %v1025_v41 = vsel %vm318_vm3, %v1009_v13, 0 }
 0x23c   :  { %3915 = vmatpush3.bf16.xpose.msra.mxu1 %v568_v17  ;;  %3888 = vmatprep.mubr.msk.bf16.mxu1 %vm4644_vm0, %v4643_v0  ;;  %v4947_v17 = vsel %vm187_vm6, 0.0, %v4654_v6 }
 0x23d   :  { %3916 = vmatprep.subr.bf16.mxu1 %v4643_v0 }
 0x23e   :  { %v1007_v18 = vpop.permute.xlu1 %1006  ;;  %v773_v19 = vpop.permute.xlu0 %772 }
 0x23f   :  { %v1022_v42 = vsel %vm318_vm3, %v1007_v18, 0 }
 0x242   :  { %v1003_v20 = vpop.permute.xlu1 %1002  ;;  %v775_v21 = vpop.permute.xlu0 %774 }
 0x243   :  { %3889 = vmatmul.mubr.msk.bf16.gmra.mxu1 %vm318_vm3, %v4823_v59 }
 0x244   :  { %3917 = vmatpush3.bf16.xpose.msra.mxu1 %v565_v22  ;;  %3892 = vmatprep.mubr.msk.bf16.mxu1 %vm4644_vm0, %v4643_v0 }
 0x245   :  { %3918 = vmatprep.subr.bf16.mxu1 %v4643_v0 }
 0x246   :  { %v464_v23 = vpop.permute.xlu1 %463  ;;  %v1001_v26 = vpop.permute.xlu0 %1000 }
 0x24a   :  { %v468_v27 = vpop.permute.xlu1 %467  ;;  %v1005_v28 = vpop.permute.xlu0 %1004 }
 0x24b   :  { %v482_v31 = vsel %vm480_vm4, %v468_v27, 0  ;;  %3893 = vmatmul.mubr.msk.bf16.gmra.mxu1 %vm318_vm3, %v4816_v55  ;;  %v4954_v27 = vsel %vm188_vm8, 0.0, %v4654_v6 }
 0x24c   :  { %3897 = vmatpush3.bf16.msra.mxu0 %v482_v31  ;;  %3919 = vmatpush3.bf16.xpose.msra.mxu1 %v562_v29 }
 0x24d   :  { %3898 = vmatprep.subr.bf16.mxu0 %v4643_v0  ;;  %3920 = vmatprep.mubr.msk.bf16.mxu1 %vm4644_vm0, %v4643_v0 }
 0x24e   :  { %v466_v32 = vpop.permute.xlu0 %465  ;;  %3950 = vmatprep.subr.bf16.mxu1 %v4643_v0 }
 0x250   :  { %3899 = vmatpush3.bf16.msra.mxu0 %v466_v32 }
 0x251   :  { %3900 = vmatprep.subr.bf16.mxu0 %v4643_v0 }
 0x253   :  { %3921 = vmatmul.mubr.msk.bf16.vlgmr.msra.gmra.mxu1 %vm318_vm3, %v541_v7  ;;  %v4942_v7 = vsel %vm186_vm5, 0.0, %v4654_v6 }
 0x254   :  { %3901 = vmatpush3.bf16.msra.mxu0 %v464_v23  ;;  %3951 = vmatpush3.bf16.xpose.msra.mxu1 %v798_v33 }
 0x255   :  { %3924 = vmatprep.mubr.msk.bf16.mxu1 %vm4644_vm0, %v4643_v0  ;;  %3952 = vmatprep.subr.bf16.mxu1 %v4643_v0 }
 0x256   :  { %3932 = vmatprep.subr.bf16.mxu0 %v4643_v0 }
 0x25b   :  { %3925 = vmatmul.mubr.msk.bf16.gmra.mxu1 %vm318_vm3, %v543_v9 }
 0x25c   :  { %3953 = vmatpush3.bf16.xpose.msra.mxu1 %v795_v34  ;;  %3928 = vmatprep.mubr.msk.bf16.mxu1 %vm4644_vm0, %v4643_v0 }
 0x25d   :  { %3954 = vmatprep.subr.bf16.mxu1 %v4643_v0 }
 0x263   :  { %3929 = vmatmul.mubr.msk.bf16.gmra.mxu1 %vm318_vm3, %v545_v12 }
 0x264   :  { %3955 = vmatpush3.bf16.xpose.msra.mxu1 %v792_v38  ;;  %3956 = vmatprep.mubr.msk.bf16.mxu1 %vm4644_vm0, %v4643_v0 }
 0x265   :  { %3986 = vmatprep.subr.bf16.mxu1 %v4643_v0 }
 0x26b   :  { %3957 = vmatmul.mubr.msk.bf16.vlgmr.msra.gmra.mxu1 %vm318_vm3, %v771_v14 }
 0x26c   :  { %3987 = vmatpush3.bf16.xpose.msra.mxu1 %v1028_v39  ;;  %3960 = vmatprep.mubr.msk.bf16.mxu1 %vm4644_vm0, %v4643_v0 }
 0x26d   :  { %3988 = vmatprep.subr.bf16.mxu1 %v4643_v0 }
 0x273   :  { %3961 = vmatmul.mubr.msk.bf16.gmra.mxu1 %vm318_vm3, %v773_v19 }
 0x274   :  { %3989 = vmatpush3.bf16.xpose.msra.mxu1 %v1025_v41  ;;  %3964 = vmatprep.mubr.msk.bf16.mxu1 %vm4644_vm0, %v4643_v0 }
 0x275   :  { %3990 = vmatprep.subr.bf16.mxu1 %v4643_v0 }
 0x27b   :  { %3965 = vmatmul.mubr.msk.bf16.gmra.mxu1 %vm318_vm3, %v775_v21  ;;  %v177_v21 = vmul.f32 0.05882353, %v172_v11 }
 0x27c   :  { %3991 = vmatpush3.bf16.xpose.msra.mxu1 %v1022_v42  ;;  %3992 = vmatprep.mubr.msk.bf16.mxu1 %vm4644_vm0, %v4643_v0 }
 0x27d   :  { %4022 = vmatprep.subr.bf16.mxu1 %v4643_v0  ;;  %v182_v31 = vfloor.f32 %v177_v21 }
 0x27f   :  { %vm190_vm10 = vcmp.eq.f32.partialorder %v182_v31, %v185_v60 }
 0x280   :  { %v4968_v45 = vsel %vm190_vm10, 0.0, %v4654_v6 }
 0x283   :  { %3993 = vmatmul.mubr.msk.bf16.vlgmr.msra.gmra.mxu1 %vm318_vm3, %v1001_v26 }
 0x284   :  { %3996 = vmatprep.mubr.msk.bf16.mxu1 %vm4644_vm0, %v4643_v0 }
 0x28b   :  { %3997 = vmatmul.mubr.msk.bf16.gmra.mxu1 %vm318_vm3, %v1003_v20  ;;  %v181_v20 = vfloor.f32 %v176_v10 }
 0x28c   :  { %4000 = vmatprep.mubr.msk.bf16.mxu1 %vm4644_vm0, %v4643_v0 }
 0x28d   :  { %vm189_vm9 = vcmp.eq.f32.partialorder %v181_v20, %v185_v60 }
 0x28e   :  { %v4961_v38 = vsel %vm189_vm9, 0.0, %v4654_v6 }
 0x293   :  { %4001 = vmatmul.mubr.msk.bf16.gmra.mxu1 %vm318_vm3, %v1005_v28 }
 0x294   :  { %4026 = vmatprep.mubr.msk.bf16.mxu1 %vm4644_vm0, %v4643_v0 }
 0x2fb   :  { %v371_v5 = vpop.f32.mrf.mxu1 }
 0x2fc   :  { %v393_v9 = vmul.f32 0.35355338, %v371_v5 }
 0x2fd   :  { %v3886_v12 = vpop.f32.mrf.mxu1 }
 0x2fe   :  { %v4945_v13 = vadd.f32 %v393_v9, %v4942_v7 }
 0x2ff   :  { %v374_v14 = vpop.f32.mrf.mxu1 }
 0x300   :  { %v394_v18 = vmul.f32 0.35355338, %v374_v14  ;;  %v404_v19 = vsel %vm403_vm7, %v4945_v13, -inf }
 0x301   :  { %405 = vmax.xlane.f32.xlu1 %v404_v19  ;;  %v3887_v22 = vpop.f32.mrf.mxu1 }
 0x302   :  { %v4952_v23 = vadd.f32 %v394_v18, %v4947_v17 }
 0x303   :  { %v379_v26 = vpop.f32.mrf.mxu1 }
 0x304   :  { %v395_v28 = vmul.f32 0.35355338, %v379_v26  ;;  %v407_v29 = vsel %vm403_vm7, %v4952_v23, -inf }
 0x305   :  { %408 = vmax.xlane.f32.xlu0 %v407_v29  ;;  %v3890_v32 = vpop.f32.mrf.mxu1 }
 0x306   :  { %v4959_v33 = vadd.f32 %v395_v28, %v4954_v27 }
 0x307   :  { %v382_v34 = vpop.f32.mrf.mxu1 }
 0x308   :  { %v396_v39 = vmul.f32 0.35355338, %v382_v34  ;;  %v410_v41 = vsel %vm403_vm7, %v4959_v33, -inf }
 0x309   :  { %411 = vmax.xlane.f32.xlu0 %v410_v41  ;;  %v3891_v42 = vpop.f32.mrf.mxu1 }
 0x30a   :  { %v4966_v43 = vadd.f32 %v396_v39, %v4961_v38 }
 0x30b   :  { %v387_v44 = vpop.f32.mrf.mxu1 }
 0x30c   :  { %v397_v47 = vmul.f32 0.35355338, %v387_v44  ;;  %v413_v48 = vsel %vm403_vm7, %v4966_v43, -inf }
 0x30d   :  { %414 = vmax.xlane.f32.xlu1 %v413_v48  ;;  %v3894_v49 = vpop.f32.mrf.mxu1 }
 0x30e   :  { %v4973_v50 = vadd.f32 %v397_v47, %v4968_v45 }
 0x30f   :  { %v390_v51 = vpop.f32.mrf.mxu1 }
 0x310   :  { %v417_v52 = vsel %vm416_vm11, %v4973_v50, -inf }
 0x311   :  { %418 = vmax.xlane.f32.xlu0 %v417_v52  ;;  %v3895_v53 = vpop.f32.mrf.mxu1 }
 0x313   :  { %v604_v54 = vpop.f32.mrf.mxu1 }
 0x314   :  { %v626_v34 = vmul.f32 0.35355338, %v604_v54 }
 0x315   :  { %v3922_v56 = vpop.f32.mrf.mxu1 }
 0x316   :  { %v5000_v48 = vadd.f32 %v626_v34, %v4942_v7 }
 0x317   :  { %v607_v57 = vpop.f32.mrf.mxu1 }
 0x318   :  { %v627_v58 = vmul.f32 0.35355338, %v607_v57  ;;  %v636_v54 = vsel %vm403_vm7, %v5000_v48, -inf }
 0x319   :  { %v3923_v60 = vpop.f32.mrf.mxu1 }
 0x31a   :  { %v4978_v61 = vadd.f32 %v627_v58, %v4947_v17 }
 0x31b   :  { %v612_v35 = vpop.f32.mrf.mxu1 }
 0x31c   :  { %v639_v62 = vsel %vm403_vm7, %v4978_v61, -inf  ;;  %v628_v44 = vmul.f32 0.35355338, %v612_v35 }
 0x31d   :  { %640 = vmax.xlane.f32.xlu0 %v639_v62  ;;  %v3926_v63 = vpop.f32.mrf.mxu1 }
 0x31e   :  { %696 = vrot.lane.b32.xlu1 %v4823_v59, %s4653_s22  ;;  %v5010_v57 = vadd.f32 %v628_v44, %v4954_v27 }
 0x31f   :  { %v615_v1 = vpop.f32.mrf.mxu1 }
 0x320   :  { %v629_v2 = vmul.f32 0.35355338, %v615_v1  ;;  %v642_v62 = vsel %vm403_vm7, %v5010_v57, -inf }
 0x321   :  { %v3927_v3 = vpop.f32.mrf.mxu1 }
 0x322   :  { %v4985_v4 = vadd.f32 %v629_v2, %v4961_v38 }
 0x323   :  { %v620_v5 = vpop.f32.mrf.mxu1 }
 0x324   :  { %v645_v6 = vsel %vm403_vm7, %v4985_v4, -inf  ;;  %v630_v53 = vmul.f32 0.35355338, %v620_v5 }
 0x325   :  { %646 = vmax.xlane.f32.xlu0 %v645_v6  ;;  %v3930_v8 = vpop.f32.mrf.mxu1 }
 0x326   :  { %v5015_v63 = vadd.f32 %v630_v53, %v4968_v45 }
 0x327   :  { %v623_v9 = vpop.f32.mrf.mxu1 }
 0x328   :  { %v648_v6 = vsel %vm416_vm11, %v5015_v63, -inf }
 0x329   :  { %v3931_v10 = vpop.f32.mrf.mxu1 }
 0x32b   :  { %v834_v11 = vpop.f32.mrf.mxu1 }
 0x32c   :  { %v856_v12 = vmul.f32 0.35355338, %v834_v11 }
 0x32d   :  { %v3958_v14 = vpop.f32.mrf.mxu1 }
 0x32e   :  { %v4990_v18 = vadd.f32 %v856_v12, %v4942_v7 }
 0x32f   :  { %v837_v19 = vpop.f32.mrf.mxu1 }
 0x330   :  { %v866_v20 = vsel %vm403_vm7, %v4990_v18, -inf  ;;  %v857_v60 = vmul.f32 0.35355338, %v837_v19 }
 0x331   :  { %867 = vmax.xlane.f32.xlu0 %v866_v20  ;;  %v3959_v21 = vpop.f32.mrf.mxu1 }
 0x332   :  { %v5020_v8 = vadd.f32 %v857_v60, %v4947_v17  ;;  %v5054_v60 = vpop.permute.xlu0 %698 }
 0x333   :  { %v842_v22 = vpop.f32.mrf.mxu1 }
 0x334   :  { %v858_v26 = vmul.f32 0.35355338, %v842_v22  ;;  %v869_v19 = vsel %vm403_vm7, %v5020_v8, -inf }
 0x335   :  { %v3962_v28 = vpop.f32.mrf.mxu1 }
 0x336   :  { %v4995_v29 = vadd.f32 %v858_v26, %v4954_v27 }
 0x337   :  { %v845_v31 = vpop.f32.mrf.mxu1 }
 0x338   :  { %v872_v32 = vsel %vm403_vm7, %v4995_v29, -inf  ;;  %v859_v3 = vmul.f32 0.35355338, %v845_v31 }
 0x339   :  { %873 = vmax.xlane.f32.xlu0 %v872_v32  ;;  %v3963_v39 = vpop.f32.mrf.mxu1 }
 0x33a   :  { %v5030_v20 = vadd.f32 %v859_v3, %v4961_v38 }
 0x33b   :  { %v850_v41 = vpop.f32.mrf.mxu1 }
 0x33c   :  { %v860_v42 = vmul.f32 0.35355338, %v850_v41  ;;  %v875_v31 = vsel %vm403_vm7, %v5030_v20, -inf }
 0x33d   :  { %v3966_v47 = vpop.f32.mrf.mxu1 }
 0x33e   :  { %v5003_v49 = vadd.f32 %v860_v42, %v4968_v45 }
 0x33f   :  { %v853_v51 = vpop.f32.mrf.mxu1 }
 0x340   :  { %v878_v52 = vsel %vm416_vm11, %v5003_v49, -inf }
 0x341   :  { %879 = vmax.xlane.f32.xlu0 %v878_v52  ;;  %v3967_v56 = vpop.f32.mrf.mxu1 }
 0x342   :  { %637 = vmax.xlane.f32.xlu1 %v636_v54 }
 0x343   :  { %v1064_v58 = vpop.f32.mrf.mxu1 }
 0x344   :  { %v1086_v12 = vmul.f32 0.35355338, %v1064_v58 }
 0x345   :  { %v3994_v35 = vpop.f32.mrf.mxu1 }
 0x346   :  { %643 = vmax.xlane.f32.xlu1 %v642_v62  ;;  %v5035_v32 = vadd.f32 %v1086_v12, %v4942_v7 }
 0x347   :  { %v1067_v1 = vpop.f32.mrf.mxu1 }
 0x348   :  { %v1087_v2 = vmul.f32 0.35355338, %v1067_v1  ;;  %v1096_v47 = vsel %vm403_vm7, %v5035_v32, -inf }
 0x349   :  { %v3995_v5 = vpop.f32.mrf.mxu1 }
 0x34a   :  { %649 = vmax.xlane.f32.xlu1 %v648_v6  ;;  %v5023_v9 = vadd.f32 %v1087_v2, %v4947_v17 }
 0x34b   :  { %v1072_v10 = vpop.f32.mrf.mxu1 }
 0x34c   :  { %v1099_v11 = vsel %vm403_vm7, %v5023_v9, -inf  ;;  %v1088_v26 = vmul.f32 0.35355338, %v1072_v10 }
 0x34d   :  { %1100 = vmax.xlane.f32.xlu0 %v1099_v11  ;;  %v3998_v14 = vpop.f32.mrf.mxu1 }
 0x34e   :  { %870 = vmax.xlane.f32.xlu1 %v869_v19  ;;  %v5045_v51 = vadd.f32 %v1088_v26, %v4954_v27 }
 0x34f   :  { %v1075_v21 = vpop.f32.mrf.mxu1 }
 0x350   :  { %v1089_v22 = vmul.f32 0.35355338, %v1075_v21  ;;  %v1102_v56 = vsel %vm403_vm7, %v5045_v51, -inf }
 0x351   :  { %v3999_v28 = vpop.f32.mrf.mxu1 }
 0x352   :  { %876 = vmax.xlane.f32.xlu1 %v875_v31  ;;  %v5038_v34 = vadd.f32 %v1089_v22, %v4961_v38 }
 0x353   :  { %v1080_v39 = vpop.f32.mrf.mxu1 }
 0x354   :  { %v1105_v41 = vsel %vm403_vm7, %v5038_v34, -inf  ;;  %v1090_v42 = vmul.f32 0.35355338, %v1080_v39 }
 0x355   :  { %1106 = vmax.xlane.f32.xlu0 %v1105_v41  ;;  %v4002_v44 = vpop.f32.mrf.mxu1 }
 0x356   :  { %1097 = vmax.xlane.f32.xlu1 %v1096_v47  ;;  %v5050_v54 = vadd.f32 %v1090_v42, %v4968_v45 }
 0x357   :  { %v1083_v52 = vpop.f32.mrf.mxu1 }
 0x358   :  { %v1108_v58 = vsel %vm416_vm11, %v5050_v54, -inf }
 0x359   :  { %v4003_v53 = vpop.f32.mrf.mxu1 }
 0x35a   :  { %1103 = vmax.xlane.f32.xlu1 %v1102_v56 }
 0x35e   :  { %1109 = vmax.xlane.f32.xlu1 %v1108_v58 }
 0x38a   :  { %v406_v35 = vpop.xlane.xlu1 %405 }
 0x38b   :  { %v420_v62 = vsub.f32 %v4945_v13, %v406_v35 }
 0x38d   :  { %v425_v1 = vmul.f32 1.442695, %v420_v62 }
 0x38e   :  { %v409_v2 = vpop.xlane.xlu0 %408 }
 0x38f   :  { %4429 = vpow2.f32 %v425_v1  ;;  %v421_v3 = vsub.f32 %v4952_v23, %v409_v2 }
 0x391   :  { %v427_v5 = vmul.f32 1.442695, %v421_v3 }
 0x392   :  { %v412_v6 = vpop.xlane.xlu0 %411 }
 0x393   :  { %4431 = vpow2.f32 %v427_v5  ;;  %v422_v10 = vsub.f32 %v4959_v33, %v412_v6 }
 0x395   :  { %v429_v11 = vmul.f32 1.442695, %v422_v10 }
 0x396   :  { %v415_v28 = vpop.xlane.xlu1 %414 }
 0x397   :  { %4433 = vpow2.f32 %v429_v11  ;;  %v423_v31 = vsub.f32 %v4966_v43, %v415_v28 }
 0x399   :  { %v431_v41 = vmul.f32 1.442695, %v423_v31 }
 0x39a   :  { %v419_v33 = vpop.xlane.xlu0 %418  ;;  %v5079_v47 = vpop.permute.xlu1 %696 }
 0x39b   :  { %v424_v42 = vsub.f32 %v4973_v50, %v419_v33  ;;  %4435 = vpow2.f32 %v431_v41 }
 0x39c   :  { %v5059_v12 = vpop.eup %4429 }
 0x39d   :  { %v435_v14 = vsel %vm403_vm7, %v5059_v12, 0.0  ;;  %v433_v53 = vmul.f32 1.442695, %v424_v42 }
 0x39e   :  { %436 = vadd.xlane.f32.xlu1 %v435_v14 }
 0x39f   :  { %4437 = vpow2.f32 %v433_v53 }
 0x3a0   :  { %v5063_v19 = vpop.eup %4431 }
 0x3a1   :  { %v438_v13 = vsel %vm403_vm7, %v5063_v19, 0.0 }
 0x3a2   :  { %439 = vadd.xlane.f32.xlu0 %v438_v13 }
 0x3a4   :  { %v5067_v23 = vpop.eup %4433 }
 0x3a5   :  { %v441_v21 = vsel %vm403_vm7, %v5067_v23, 0.0 }
 0x3a6   :  { %442 = vadd.xlane.f32.xlu1 %v441_v21  ;;  %v641_v22 = vpop.xlane.xlu0 %640 }
 0x3a7   :  { %v652_v52 = vsub.f32 %v4978_v61, %v641_v22 }
 0x3a8   :  { %v5088_v14 = vpop.eup %4435 }
 0x3a9   :  { %v658_v1 = vmul.f32 1.442695, %v652_v52 }
 0x3ae   :  { %v647_v26 = vpop.xlane.xlu0 %646 }
 0x3af   :  { %v654_v6 = vsub.f32 %v4985_v4, %v647_v26  ;;  %v444_v4 = vsel %vm403_vm7, %v5088_v14, 0.0  ;;  %v5094_v26 = vpop.eup %4437 }
 0x3b0   :  { %v447_v41 = vsel %vm416_vm11, %v5094_v26, 0.0 }
 0x3b1   :  { %v662_v11 = vmul.f32 1.442695, %v654_v6 }
 0x3b7   :  { %694 = vrot.lane.b32.xlu1 %v4810_v46, %s4653_s22 }
 0x3b8   :  { %928 = vrot.lane.b32.xlu0 %v4816_v55, %s4655_s23 }
 0x3ba   :  { %v868_v39 = vpop.xlane.xlu0 %867 }
 0x3bb   :  { %v881_v56 = vsub.f32 %v4990_v18, %v868_v39 }
 0x3bc   :  { %926 = vrot.lane.b32.xlu0 %v4823_v59, %s4655_s23 }
 0x3bd   :  { %v886_v2 = vmul.f32 1.442695, %v881_v56 }
 0x3c2   :  { %v874_v44 = vpop.xlane.xlu0 %873 }
 0x3ca   :  { %v880_v58 = vpop.xlane.xlu0 %879 }
 0x3cb   :  { %v638_v35 = vpop.xlane.xlu1 %637  ;;  %v885_v43 = vsub.f32 %v5003_v49, %v880_v58 }
 0x3cc   :  { %v651_v62 = vsub.f32 %v5000_v48, %v638_v35 }
 0x3cd   :  { %v894_v61 = vmul.f32 1.442695, %v885_v43 }
 0x3ce   :  { %v656_v3 = vmul.f32 1.442695, %v651_v62 }
 0x3cf   :  { %v644_v50 = vpop.xlane.xlu1 %643 }
 0x3d0   :  { %4439 = vpow2.f32 %v656_v3  ;;  %v653_v5 = vsub.f32 %v5010_v57, %v644_v50 }
 0x3d1   :  { %4441 = vpow2.f32 %v658_v1 }
 0x3d2   :  { %4443 = vpow2.f32 %v886_v2  ;;  %v660_v18 = vmul.f32 1.442695, %v653_v5 }
 0x3d3   :  { %v650_v10 = vpop.xlane.xlu1 %649  ;;  %4445 = vpow2.f32 %v894_v61 }
 0x3d4   :  { %4447 = vpow2.f32 %v660_v18  ;;  %v655_v48 = vsub.f32 %v5015_v63, %v650_v10  ;;  %v883_v63 = vsub.f32 %v4995_v29, %v874_v44 }
 0x3d5   :  { %4449 = vpow2.f32 %v662_v11 }
 0x3d6   :  { %v1101_v49 = vpop.xlane.xlu0 %1100  ;;  %v664_v57 = vmul.f32 1.442695, %v655_v48  ;;  %v890_v52 = vmul.f32 1.442695, %v883_v63 }
 0x3d7   :  { %v1112_v13 = vsub.f32 %v5023_v9, %v1101_v49  ;;  %v871_v21 = vpop.xlane.xlu1 %870 }
 0x3d8   :  { %v882_v22 = vsub.f32 %v5020_v8, %v871_v21 }
 0x3d9   :  { %v1118_v33 = vmul.f32 1.442695, %v1112_v13 }
 0x3da   :  { %v888_v9 = vmul.f32 1.442695, %v882_v22 }
 0x3db   :  { %4451 = vpow2.f32 %v1118_v33  ;;  %445 = vadd.xlane.f32.xlu0 %v444_v4  ;;  %v877_v31 = vpop.xlane.xlu1 %876 }
 0x3dc   :  { %4453 = vpow2.f32 %v664_v57  ;;  %v884_v29 = vsub.f32 %v5030_v20, %v877_v31 }
 0x3dd   :  { %v5096_v28 = vpop.eup %4439  ;;  %4455 = vpow2.f32 %v888_v9 }
 0x3de   :  { %v5099_v39 = vpop.eup %4441  ;;  %v666_v8 = vsel %vm403_vm7, %v5096_v28, 0.0  ;;  %4457 = vpow2.f32 %v890_v52  ;;  %v892_v62 = vmul.f32 1.442695, %v884_v29  ;;  %v1107_v31 = vpop.xlane.xlu0 %1106 }
 0x3df   :  { %v5105_v42 = vpop.eup %4443  ;;  %448 = vadd.xlane.f32.xlu0 %v447_v41  ;;  %667 = vadd.xlane.f32.xlu1 %v666_v8  ;;  %v669_v44 = vsel %vm403_vm7, %v5099_v39, 0.0  ;;  %v1098_v35 = vpop.xlane.xlu1 %1097  ;;  %v1114_v9 = vsub.f32 %v5038_v34, %v1107_v31 }
 0x3e0   :  { %v5107_v53 = vpop.eup %4445  ;;  %v896_v56 = vsel %vm403_vm7, %v5105_v42, 0.0  ;;  %v1111_v1 = vsub.f32 %v5035_v32, %v1098_v35  ;;  %4459 = vpow2.f32 %v892_v62 }
 0x3e1   :  { %v5114_v58 = vpop.eup %4447  ;;  %v908_v20 = vsel %vm416_vm11, %v5107_v53, 0.0  ;;  %v1122_v8 = vmul.f32 1.442695, %v1114_v9 }
 0x3e2   :  { %v672_v43 = vsel %vm403_vm7, %v5114_v58, 0.0  ;;  %v5121_v2 = vpop.eup %4449  ;;  %v1116_v5 = vmul.f32 1.442695, %v1111_v1  ;;  %v712_v1 = vsel %vm480_vm4, %v5054_v60, 0 }
 0x3e3   :  { %670 = vadd.xlane.f32.xlu0 %v669_v44  ;;  %897 = vadd.xlane.f32.xlu1 %v896_v56  ;;  %v675_v32 = vsel %vm403_vm7, %v5121_v2, 0.0  ;;  %v1104_v57 = vpop.xlane.xlu1 %1103 }
 0x3e4   :  { %4461 = vpow2.f32 %v1116_v5  ;;  %v1113_v22 = vsub.f32 %v5045_v51, %v1104_v57 }
 0x3e6   :  { %v1120_v4 = vmul.f32 1.442695, %v1113_v22 }
 0x3e7   :  { %673 = vadd.xlane.f32.xlu0 %v672_v43  ;;  %909 = vadd.xlane.f32.xlu1 %v908_v20  ;;  %v1110_v51 = vpop.xlane.xlu1 %1109 }
 0x3e8   :  { %v5123_v3 = vpop.eup %4451  ;;  %4463 = vpow2.f32 %v1120_v4  ;;  %v1115_v60 = vsub.f32 %v5050_v54, %v1110_v51 }
 0x3e9   :  { %v1129_v50 = vsel %vm403_vm7, %v5123_v3, 0.0  ;;  %v5129_v61 = vpop.eup %4453  ;;  %4465 = vpow2.f32 %v1122_v8 }
 0x3ea   :  { %v678_v6 = vsel %vm416_vm11, %v5129_v61, 0.0  ;;  %v5133_v18 = vpop.eup %4455 }
 0x3eb   :  { %676 = vadd.xlane.f32.xlu0 %v675_v32  ;;  %1130 = vadd.xlane.f32.xlu1 %v1129_v50  ;;  %v5135_v10 = vpop.eup %4457  ;;  %v899_v11 = vsel %vm403_vm7, %v5133_v18, 0.0 }
 0x3ec   :  { %v902_v48 = vsel %vm403_vm7, %v5135_v10, 0.0 }
 0x3ed   :  { %v5141_v49 = vpop.eup %4459 }
 0x3ee   :  { %v905_v13 = vsel %vm403_vm7, %v5141_v49, 0.0 }
 0x3ef   :  { %679 = vadd.xlane.f32.xlu0 %v678_v6 }
 0x3f1   :  { %v5145_v21 = vpop.eup %4461 }
 0x3f2   :  { %v1126_v33 = vsel %vm403_vm7, %v5145_v21, 0.0 }
 0x3f3   :  { %900 = vadd.xlane.f32.xlu0 %v899_v11 }
 0x3f5   :  { %v5156_v63 = vpop.eup %4463 }
 0x3f6   :  { %v1132_v41 = vsel %vm403_vm7, %v5156_v63, 0.0 }
 0x3f7   :  { %903 = vadd.xlane.f32.xlu0 %v902_v48 }
 0x3fb   :  { %906 = vadd.xlane.f32.xlu0 %v905_v13 }
 0x3fc   :  { %924 = vrot.lane.b32.xlu1 %v4810_v46, %s4655_s23 }
 0x3ff   :  { %1127 = vadd.xlane.f32.xlu0 %v1126_v33 }
 0x415   :  { %1158 = vrot.lane.b32.xlu0 %v4816_v55, %s4656_s24  ;;  %v5161_v55 = vpop.eup %4465 }
 0x419   :  { %1156 = vrot.lane.b32.xlu0 %v4823_v59, %s4656_s24  ;;  %v1135_v59 = vsel %vm403_vm7, %v5161_v55, 0.0 }
 0x420   :  { %1133 = vadd.xlane.f32.xlu1 %v1132_v41 }
 0x427   :  { %v437_v52 = vpop.xlane.xlu1 %436 }
 0x428   :  { %4467 = vrcp.f32 %v437_v52 }
 0x42b   :  { %v440_v29 = vpop.xlane.xlu0 %439 }
 0x42c   :  { %4469 = vrcp.f32 %v440_v29 }
 0x42f   :  { %v443_v43 = vpop.xlane.xlu1 %442  ;;  %v929_v20 = vpop.permute.xlu0 %928 }
 0x433   :  { %v927_v50 = vpop.permute.xlu0 %926 }
 0x435   :  { %v4468_v44 = vpop.eup %4467 }
 0x436   :  { %v455_v34 = vmul.f32 %v4468_v44, %v5059_v12  ;;  %v695_v12 = vpop.permute.xlu1 %694 }
 0x438   :  { %1136 = vadd.xlane.f32.xlu0 %v1135_v59 }
 0x439   :  { %v4470_v56 = vpop.eup %4469 }
 0x43a   :  { %v456_v35 = vmul.f32 %v4470_v56, %v5063_v19  ;;  %v1124_v19 = vmul.f32 1.442695, %v1115_v60 }
 0x43c   :  { %v460_v62 = vpack.c.bf16 %v456_v35, %v455_v34  ;;  %4471 = vpow2.f32 %v1124_v19  ;;  %v942_v34 = vsel %vm480_vm4, %v929_v20, 0 }
 0x43d   :  { %4473 = vrcp.f32 %v443_v43 }
 0x43e   :  { %3903 = vmatmul.mubr.msk.bf16.vlgmr.msra.gmra.mxu0 %vm403_vm7, %v460_v62 }
 0x43f   :  { %3933 = vmatpush3.bf16.msra.mxu0 %v712_v1  ;;  %3906 = vmatprep.mubr.msk.bf16.mxu0 %vm4644_vm0, %v4643_v0 }
 0x440   :  { %3934 = vmatprep.subr.bf16.mxu0 %v4643_v0 }
 0x443   :  { %3935 = vmatpush3.bf16.msra.mxu0 %v5079_v47 }
 0x444   :  { %3936 = vmatprep.subr.bf16.mxu0 %v4643_v0 }
 0x447   :  { %3937 = vmatpush3.bf16.msra.mxu0 %v695_v12 }
 0x448   :  { %3968 = vmatprep.subr.bf16.mxu0 %v4643_v0 }
 0x449   :  { %v5179_v47 = vpop.eup %4471 }
 0x44a   :  { %v1138_v11 = vsel %vm416_vm11, %v5179_v47, 0.0  ;;  %v4474_v48 = vpop.eup %4473 }
 0x44b   :  { %v457_v33 = vmul.f32 %v4474_v48, %v5067_v23 }
 0x44e   :  { %1154 = vrot.lane.b32.xlu0 %v4810_v46, %s4656_s24 }
 0x464   :  { %v446_v5 = vpop.xlane.xlu0 %445 }
 0x465   :  { %4475 = vrcp.f32 %v446_v5 }
 0x468   :  { %v449_v32 = vpop.xlane.xlu0 %448  ;;  %v668_v46 = vpop.xlane.xlu1 %667 }
 0x469   :  { %4477 = vrcp.f32 %v449_v32 }
 0x46c   :  { %v671_v6 = vpop.xlane.xlu0 %670  ;;  %v898_v8 = vpop.xlane.xlu1 %897 }
 0x46d   :  { %1139 = vadd.xlane.f32.xlu0 %v1138_v11  ;;  %4479 = vrcp.f32 %v671_v6 }
 0x46e   :  { %4481 = vrcp.f32 %v668_v46 }
 0x470   :  { %v674_v13 = vpop.xlane.xlu0 %673  ;;  %v910_v59 = vpop.xlane.xlu1 %909 }
 0x472   :  { %v4476_v54 = vpop.eup %4475 }
 0x473   :  { %v458_v57 = vmul.f32 %v4476_v54, %v5088_v14 }
 0x474   :  { %v677_v31 = vpop.xlane.xlu0 %676  ;;  %v1131_v1 = vpop.xlane.xlu1 %1130 }
 0x475   :  { %v461_v22 = vpack.c.bf16 %v458_v57, %v457_v33  ;;  %4483 = vrcp.f32 %v677_v31 }
 0x476   :  { %v4478_v4 = vpop.eup %4477  ;;  %4485 = vrcp.f32 %v674_v13 }
 0x477   :  { %3907 = vmatmul.mubr.msk.bf16.gmra.mxu0 %vm403_vm7, %v461_v22  ;;  %v459_v9 = vmul.f32 %v4478_v4, %v5094_v26 }
 0x478   :  { %3910 = vmatprep.mubr.msk.bf16.mxu0 %vm4644_vm0, %v4643_v0  ;;  %v680_v41 = vpop.xlane.xlu0 %679  ;;  %v925_v19 = vpop.permute.xlu1 %924 }
 0x479   :  { %v462_v51 = vpack.c.bf16 %v459_v9, %v459_v9  ;;  %4487 = vrcp.f32 %v680_v41 }
 0x47a   :  { %v4480_v52 = vpop.eup %4479 }
 0x47b   :  { %v4482_v23 = vpop.eup %4481  ;;  %v687_v14 = vmul.f32 %v4480_v52, %v5099_v39 }
 0x47c   :  { %v901_v29 = vpop.xlane.xlu0 %900  ;;  %v686_v44 = vmul.f32 %v4482_v23, %v5096_v28 }
 0x47d   :  { %4489 = vrcp.f32 %v901_v29 }
 0x47e   :  { %v691_v56 = vpack.c.bf16 %v687_v14, %v686_v44  ;;  %4491 = vrcp.f32 %v898_v8 }
 0x47f   :  { %3911 = vmatmul.mubr.msk.bf16.gmra.mxu0 %vm403_vm7, %v462_v51 }
 0x480   :  { %3938 = vmatprep.mubr.msk.bf16.mxu0 %vm4644_vm0, %v4643_v0  ;;  %v904_v62 = vpop.xlane.xlu0 %903 }
 0x482   :  { %v4484_v26 = vpop.eup %4483 }
 0x483   :  { %v4486_v35 = vpop.eup %4485  ;;  %v689_v39 = vmul.f32 %v4484_v26, %v5121_v2 }
 0x484   :  { %v688_v28 = vmul.f32 %v4486_v35, %v5114_v58  ;;  %v907_v60 = vpop.xlane.xlu0 %906 }
 0x485   :  { %4493 = vrcp.f32 %v907_v60 }
 0x486   :  { %v692_v43 = vpack.c.bf16 %v689_v39, %v688_v28  ;;  %v4488_v12 = vpop.eup %4487  ;;  %4495 = vrcp.f32 %v904_v62 }
 0x487   :  { %3939 = vmatmul.mubr.msk.bf16.vlgmr.msra.gmra.mxu0 %vm403_vm7, %v691_v56  ;;  %v690_v20 = vmul.f32 %v4488_v12, %v5129_v61  ;;  %4497 = vrcp.f32 %v910_v59 }
 0x488   :  { %3969 = vmatpush3.bf16.msra.mxu0 %v942_v34  ;;  %3942 = vmatprep.mubr.msk.bf16.mxu0 %vm4644_vm0, %v4643_v0 }
 0x489   :  { %3970 = vmatprep.subr.bf16.mxu0 %v4643_v0  ;;  %v693_v58 = vpack.c.bf16 %v690_v20, %v690_v20 }
 0x48a   :  { %v4490_v2 = vpop.eup %4489 }
 0x48b   :  { %v4492_v5 = vpop.eup %4491  ;;  %v917_v32 = vmul.f32 %v4490_v2, %v5133_v18 }
 0x48c   :  { %3971 = vmatpush3.bf16.msra.mxu0 %v927_v50  ;;  %v1128_v50 = vpop.xlane.xlu0 %1127  ;;  %v916_v6 = vmul.f32 %v4492_v5, %v5105_v42 }
 0x48d   :  { %3972 = vmatprep.subr.bf16.mxu0 %v4643_v0  ;;  %4499 = vrcp.f32 %v1128_v50 }
 0x48e   :  { %v921_v48 = vpack.c.bf16 %v917_v32, %v916_v6  ;;  %4501 = vrcp.f32 %v1131_v1 }
 0x48f   :  { %3943 = vmatmul.mubr.msk.bf16.gmra.mxu0 %vm403_vm7, %v692_v43 }
 0x490   :  { %3973 = vmatpush3.bf16.msra.mxu0 %v925_v19  ;;  %3946 = vmatprep.mubr.msk.bf16.mxu0 %vm4644_vm0, %v4643_v0  ;;  %v1159_v11 = vpop.permute.xlu0 %1158 }
 0x491   :  { %4004 = vmatprep.subr.bf16.mxu0 %v4643_v0  ;;  %v1172_v46 = vsel %vm480_vm4, %v1159_v11, 0 }
 0x492   :  { %v4494_v61 = vpop.eup %4493 }
 0x493   :  { %v4496_v13 = vpop.eup %4495  ;;  %v919_v54 = vmul.f32 %v4494_v61, %v5141_v49 }
 0x494   :  { %v1157_v33 = vpop.permute.xlu0 %1156  ;;  %v918_v18 = vmul.f32 %v4496_v13, %v5135_v10  ;;  %v4498_v57 = vpop.eup %4497 }
 0x495   :  { %v920_v22 = vmul.f32 %v4498_v57, %v5107_v53  ;;  %v4639_v53 = vld [vmem:[%s6310_s3 + $0x8] sm:$0xff]  }
 0x496   :  { %v922_v42 = vpack.c.bf16 %v919_v54, %v918_v18  ;;  %1312 = vrot.lane.b32.xlu1 %v4639_v53, %s4657_s26 }
 0x497   :  { %3947 = vmatmul.mubr.msk.bf16.gmra.mxu0 %vm403_vm7, %v693_v58  ;;  %v923_v4 = vpack.c.bf16 %v920_v22, %v920_v22 }
 0x498   :  { %3974 = vmatprep.mubr.msk.bf16.mxu0 %vm4644_vm0, %v4643_v0 }
 0x49a   :  { %v4500_v49 = vpop.eup %4499 }
 0x49b   :  { %v4502_v9 = vpop.eup %4501  ;;  %v1146_v41 = vmul.f32 %v4500_v49, %v5145_v21 }
 0x49c   :  { %v1147_v8 = vmul.f32 %v4502_v9, %v5123_v3  ;;  %v4640_v3 = vld [vmem:[%s6310_s3] sm:$0xff]  }
 0x49d   :  { %1310 = vrot.lane.b32.xlu1 %v4640_v3, %s4657_s26 }
 0x49e   :  { %v1151_v52 = vpack.c.bf16 %v1147_v8, %v1146_v41 }
 0x49f   :  { %3975 = vmatmul.mubr.msk.bf16.vlgmr.msra.gmra.mxu0 %vm403_vm7, %v921_v48 }
 0x4a0   :  { %4005 = vmatpush3.bf16.msra.mxu0 %v1172_v46  ;;  %3978 = vmatprep.mubr.msk.bf16.mxu0 %vm4644_vm0, %v4643_v0 }
 0x4a1   :  { %4006 = vmatprep.subr.bf16.mxu0 %v4643_v0 }
 0x4a4   :  { %4007 = vmatpush3.bf16.msra.mxu0 %v1157_v33 }
 0x4a5   :  { %4008 = vmatprep.subr.bf16.mxu0 %v4643_v0 }
 0x4a7   :  { %3979 = vmatmul.mubr.msk.bf16.gmra.mxu0 %vm403_vm7, %v922_v42 }
 0x4a8   :  { %3982 = vmatprep.mubr.msk.bf16.mxu0 %vm4644_vm0, %v4643_v0 }
 0x4a9   :  { %v1134_v10 = vpop.xlane.xlu1 %1133 }
 0x4aa   :  { %4503 = vrcp.f32 %v1134_v10 }
 0x4af   :  { %3983 = vmatmul.mubr.msk.bf16.gmra.mxu0 %vm403_vm7, %v923_v4 }
 0x4b0   :  { %4010 = vmatprep.mubr.msk.bf16.mxu0 %vm4644_vm0, %v4643_v0 }
 0x4b7   :  { %v4504_v21 = vpop.eup %4503 }
 0x4b8   :  { %v1148_v14 = vmul.f32 %v4504_v21, %v5156_v63 }
 0x4c1   :  { %v1137_v31 = vpop.xlane.xlu0 %1136 }
 0x4c2   :  { %4505 = vrcp.f32 %v1137_v31 }
 0x4c5   :  { %v1155_v51 = vpop.permute.xlu0 %1154 }
 0x4c6   :  { %4009 = vmatpush3.bf16.msra.mxu0 %v1155_v51 }
 0x4c7   :  { %4038 = vmatprep.subr.bf16.mxu0 %v4643_v0 }
 0x4c9   :  { %4011 = vmatmul.mubr.msk.bf16.vlgmr.msra.gmra.mxu0 %vm403_vm7, %v1151_v52 }
 0x4ca   :  { %4014 = vmatprep.mubr.msk.bf16.mxu0 %vm4644_vm0, %v4643_v0 }
 0x4cf   :  { %v4506_v23 = vpop.eup %4505 }
 0x4d0   :  { %v1149_v29 = vmul.f32 %v4506_v23, %v5161_v55 }
 0x4d2   :  { %v1152_v44 = vpack.c.bf16 %v1149_v29, %v1148_v14 }
 0x4d4   :  { %4015 = vmatmul.mubr.msk.bf16.gmra.mxu0 %vm403_vm7, %v1152_v44 }
 0x4d5   :  { %4018 = vmatprep.mubr.msk.bf16.mxu0 %vm4644_vm0, %v4643_v0 }
 0x4f6   :  { %v1140_v59 = vpop.xlane.xlu0 %1139 }
 0x4f7   :  { %4507 = vrcp.f32 %v1140_v59 }
 0x4fe   :  { %v5246_v56 = vpop.f32.mrf.mxu0 }
 0x500   :  { %v3904_v26 = vpop.f32.mrf.mxu0 }
 0x502   :  { %v5248_v34 = vpop.f32.mrf.mxu0 }
 0x504   :  { %v4508_v35 = vpop.eup %4507  ;;  %v3905_v62 = vpop.f32.mrf.mxu0 }
 0x505   :  { %v1150_v1 = vmul.f32 %v4508_v35, %v5179_v47 }
 0x507   :  { %v1153_v63 = vpack.c.bf16 %v1150_v1, %v1150_v1 }
 0x508   :  { %v1313_v39 = vpop.permute.xlu1 %1312 }
 0x509   :  { %4019 = vmatmul.mubr.msk.bf16.gmra.mxu0 %vm403_vm7, %v1153_v63  ;;  %4023 = vmatpush3.bf16.msra.mxu1 %v1313_v39 }
 0x50a   :  { %4042 = vmatprep.mubr.msk.bf16.mxu0 %vm4644_vm0, %v4643_v0  ;;  %4024 = vmatprep.subr.bf16.mxu1 %v4643_v0 }
 0x50f   :  { %v1311_v12 = vpop.permute.xlu1 %1310 }
 0x510   :  { %4025 = vmatpush3.bf16.msra.mxu1 %v1311_v12 }
 0x511   :  { %4054 = vmatprep.subr.bf16.mxu1 %v4643_v0 }
 0x537   :  { %v5254_v55 = vpop.f32.mrf.mxu0 }
 0x539   :  { %v3908_v28 = vpop.f32.mrf.mxu0 }
 0x53b   :  { %v5257_v43 = vpop.f32.mrf.mxu0 }
 0x53d   :  { %v3909_v60 = vpop.f32.mrf.mxu0 }
 0x53f   :  { %v5260_v47 = vpop.f32.mrf.mxu0 }
 0x541   :  { %v3912_v19 = vpop.f32.mrf.mxu0 }
 0x543   :  { %v537_v20 = vpop.f32.mrf.mxu0 }
 0x545   :  { %v3913_v58 = vpop.f32.mrf.mxu0 }
 0x547   :  { %v748_v2 = vpop.f32.mrf.mxu0 }
 0x549   :  { %v3940_v50 = vpop.f32.mrf.mxu0 }
 0x54b   :  { %v751_v5 = vpop.f32.mrf.mxu0 }
 0x54c   :  { %v4336_v32 = vpack.i.bf16 %v751_v5, %v748_v2 }
 0x54d   :  { %v3941_v6 = vpop.f32.mrf.mxu0 }
 0x54e   :  { %4337 = vrot.lane.b32.xlu1 %v4336_v32, %s4658_s29 }
 0x54f   :  { %v756_v11 = vpop.f32.mrf.mxu0 }
 0x551   :  { %v3944_v48 = vpop.f32.mrf.mxu0 }
 0x553   :  { %v759_v61 = vpop.f32.mrf.mxu0 }
 0x554   :  { %v4341_v46 = vpack.i.bf16 %v759_v61, %v756_v11 }
 0x555   :  { %v3945_v13 = vpop.f32.mrf.mxu0 }
 0x556   :  { %4342 = vrot.lane.b32.xlu0 %v4341_v46, %s4658_s29 }
 0x557   :  { %v764_v54 = vpop.f32.mrf.mxu0 }
 0x559   :  { %v3948_v33 = vpop.f32.mrf.mxu0 }
 0x55a   :  { %1317 = vrot.lane.b32.xlu0 %v4806_v40, %s4657_s26 }
 0x55b   :  { %v767_v18 = vpop.f32.mrf.mxu0 }
 0x55d   :  { %v3949_v42 = vpop.f32.mrf.mxu0 }
 0x55f   :  { %v978_v57 = vpop.f32.mrf.mxu0 }
 0x561   :  { %v3976_v22 = vpop.f32.mrf.mxu0 }
 0x563   :  { %v981_v4 = vpop.f32.mrf.mxu0 }
 0x564   :  { %v4346_v10 = vpack.i.bf16 %v981_v4, %v978_v57 }
 0x565   :  { %v3977_v49 = vpop.f32.mrf.mxu0 }
 0x566   :  { %4347 = vrot.lane.b32.xlu1 %v4346_v10, %s4659_s30 }
 0x567   :  { %v986_v31 = vpop.f32.mrf.mxu0 }
 0x569   :  { %v3980_v9 = vpop.f32.mrf.mxu0 }
 0x56b   :  { %v989_v41 = vpop.f32.mrf.mxu0 }
 0x56c   :  { %v4356_v44 = vpack.i.bf16 %v989_v41, %v986_v31 }
 0x56d   :  { %v3981_v8 = vpop.f32.mrf.mxu0 }
 0x56f   :  { %v994_v51 = vpop.f32.mrf.mxu0 }
 0x571   :  { %v3984_v53 = vpop.f32.mrf.mxu0 }
 0x573   :  { %v997_v52 = vpop.f32.mrf.mxu0 }
 0x575   :  { %v3985_v3 = vpop.f32.mrf.mxu0 }
 0x589   :  { %v1208_v21 = vpop.f32.mrf.mxu0 }
 0x58b   :  { %v4012_v40 = vpop.f32.mrf.mxu0 }
 0x58d   :  { %v1211_v23 = vpop.f32.mrf.mxu0 }
 0x58e   :  { %v4351_v14 = vpack.i.bf16 %v1211_v23, %v1208_v21 }
 0x58f   :  { %v4013_v29 = vpop.f32.mrf.mxu0 }
 0x590   :  { %4352 = vrot.lane.b32.xlu1 %v4351_v14, %s4660_s10 }
 0x594   :  { %4357 = vrot.lane.b32.xlu1 %v4356_v44, %s4659_s30  ;;  %v1216_v59 = vpop.f32.mrf.mxu0 }
 0x596   :  { %v4016_v26 = vpop.f32.mrf.mxu0 }
 0x598   :  { %v1219_v35 = vpop.f32.mrf.mxu0 }
 0x599   :  { %v4361_v62 = vpack.i.bf16 %v1219_v35, %v1216_v59 }
 0x59a   :  { %v4017_v1 = vpop.f32.mrf.mxu0 }
 0x59b   :  { %4362 = vrot.lane.b32.xlu1 %v4361_v62, %s4660_s10 }
 0x59f   :  { %1243 = vrot.lane.b32.xlu1 %v764_v54, %s4658_s29 }
 0x5a3   :  { %1263 = vrot.lane.b32.xlu1 %v994_v51, %s4659_s30 }
 0x5c0   :  { %v4338_v60 = vpop.permute.xlu1 %4337 }
 0x5c1   :  { %v4340_v20 = vunpack.i.h.bf16 %v4338_v60  ;;  %v4339_v58 = vunpack.i.l.bf16 %v4338_v60 }
 0x5c3   :  { %v1291_v32 = vsel %vm318_vm3, %v5248_v34, %v4340_v20  ;;  %v1290_v6 = vsel %vm318_vm3, %v5246_v56, %v4339_v58 }
 0x5c8   :  { %v4343_v18 = vpop.permute.xlu0 %4342 }
 0x5c9   :  { %v1224_v63 = vpop.f32.mrf.mxu0  ;;  %v4345_v34 = vunpack.i.h.bf16 %v4343_v18  ;;  %v4344_v56 = vunpack.i.l.bf16 %v4343_v18 }
 0x5ca   :  { %1283 = vrot.lane.b32.xlu1 %v1224_v63, %s4660_s10 }
 0x5cb   :  { %v4020_v39 = vpop.f32.mrf.mxu0  ;;  %v1293_v10 = vsel %vm318_vm3, %v5257_v43, %v4345_v34  ;;  %v1292_v49 = vsel %vm318_vm3, %v5254_v55, %v4344_v56 }
 0x5cc   :  { %v1318_v29 = vpop.permute.xlu0 %1317 }
 0x5cd   :  { %v1227_v28 = vpop.f32.mrf.mxu0 }
 0x5cf   :  { %v4021_v12 = vpop.f32.mrf.mxu0 }
 0x5d8   :  { %v4348_v19 = vpop.permute.xlu1 %4347 }
 0x5d9   :  { %v4350_v2 = vunpack.i.h.bf16 %v4348_v19  ;;  %v4349_v50 = vunpack.i.l.bf16 %v4348_v19 }
 0x5db   :  { %v1297_v61 = vsel %vm1295_vm12, %v1291_v32, %v4350_v2  ;;  %v1296_v46 = vsel %vm1295_vm12, %v1290_v6, %v4349_v50 }
 0x602   :  { %v4353_v5 = vpop.permute.xlu1 %4352 }
 0x603   :  { %v4355_v11 = vunpack.i.h.bf16 %v4353_v5  ;;  %v4354_v48 = vunpack.i.l.bf16 %v4353_v5 }
 0x605   :  { %v1303_v13 = vsel %vm1301_vm13, %v1297_v61, %v4355_v11  ;;  %v1302_v54 = vsel %vm1301_vm13, %v1296_v46, %v4354_v48 }
 0x606   :  { %v1307_v33 = vpack.c.bf16 %v1303_v13, %v1302_v54  ;;  %v4358_v42 = vpop.permute.xlu1 %4357  ;;  %v4405_v54 = vld [vmem:[%s6313_s4 + $0x8] sm:$0xff]  }
 0x607   :  { %v4360_v57 = vunpack.i.h.bf16 %v4358_v42  ;;  %v4359_v22 = vunpack.i.l.bf16 %v4358_v42  ;;  %4039 = vmatpush3.bf16.msra.mxu0 %v4405_v54 }
 0x608   :  { %4027 = vmatmul.mubr.msk.bf16.vlgmr.msra.gmra.mxu1 %vm240_vm2, %v1307_v33  ;;  %4040 = vmatprep.subr.bf16.mxu0 %v4643_v0 }
 0x609   :  { %4030 = vmatprep.mubr.msk.bf16.mxu1 %vm4644_vm0, %v4643_v0  ;;  %v1299_v41 = vsel %vm1295_vm12, %v1293_v10, %v4360_v57  ;;  %v1298_v8 = vsel %vm1295_vm12, %v1292_v49, %v4359_v22  ;;  %v1469_v49 = vsub.s32 2, %v4797_v36 }
 0x60d   :  { %v4363_v4 = vpop.permute.xlu1 %4362 }
 0x60e   :  { %v4365_v31 = vunpack.i.h.bf16 %v4363_v4  ;;  %v4364_v9 = vunpack.i.l.bf16 %v4363_v4 }
 0x610   :  { %v1305_v51 = vsel %vm1301_vm13, %v1299_v41, %v4365_v31  ;;  %v1304_v53 = vsel %vm1301_vm13, %v1298_v8, %v4364_v9  ;;  %v5354_v31 = vld [vmem:[%s6312_s6] sm:$0xf]  ;;  %v4407_v9 = vld [vmem:[%s6314_s5 + $0x38] sm:$0xff]   ;;  %v4408_v41 = vld [vmem:[%s6314_s5 + $0x30] sm:$0xff]  }
 0x611   :  { %v1308_v52 = vpack.c.bf16 %v1305_v51, %v1304_v53  ;;  %v1244_v43 = vpop.permute.xlu1 %1243  ;;  %4055 = vmatpush3.bf16.msra.mxu1 %v4407_v9  ;;  %v4409_v8 = vld [vmem:[%s6314_s5 + $0x28] sm:$0xff]   ;;  %v4410_v51 = vld [vmem:[%s6314_s5 + $0x20] sm:$0xff]   ;;  %v4411_v53 = vld [vmem:[%s6314_s5 + $0x18] sm:$0xff]  }
 0x612   :  { %v1294_v55 = vsel %vm318_vm3, %v5260_v47, %v1244_v43  ;;  %4056 = vmatprep.subr.bf16.mxu1 %v4643_v0 }
 0x613   :  { %4031 = vmatmul.mubr.msk.bf16.gmra.mxu1 %vm240_vm2, %v1308_v52 }
 0x614   :  { %4034 = vmatprep.mubr.msk.bf16.mxu1 %vm4644_vm0, %v4643_v0 }
 0x615   :  { %v1264_v3 = vpop.permute.xlu1 %1263  ;;  %4057 = vmatpush3.bf16.msra.mxu1 %v4408_v41 }
 0x616   :  { %v1300_v21 = vsel %vm1295_vm12, %v1294_v55, %v1264_v3  ;;  %4058 = vmatprep.subr.bf16.mxu1 %v4643_v0 }
 0x619   :  { %4059 = vmatpush3.bf16.msra.mxu1 %v4409_v8 }
 0x61a   :  { %4060 = vmatprep.subr.bf16.mxu1 %v4643_v0 }
 0x61d   :  { %4061 = vmatpush3.bf16.msra.mxu1 %v4410_v51 }
 0x61e   :  { %4062 = vmatprep.subr.bf16.mxu1 %v4643_v0 }
 0x621   :  { %4063 = vmatpush3.bf16.msra.mxu1 %v4411_v53 }
 0x622   :  { %4064 = vmatprep.subr.bf16.mxu1 %v4643_v0 }
 0x63c   :  { %v1284_v40 = vpop.permute.xlu1 %1283 }
 0x63d   :  { %v1306_v23 = vsel %vm1301_vm13, %v1300_v21, %v1284_v40 }
 0x63e   :  { %v1309_v14 = vpack.c.bf16 %v1306_v23, %v1306_v23 }
 0x640   :  { %4035 = vmatmul.mubr.msk.bf16.gmra.mxu1 %vm240_vm2, %v1309_v14 }
 0x641   :  { %4070 = vmatprep.mubr.msk.bf16.mxu1 %vm4644_vm0, %v4643_v0 }
 0x6c8   :  { %v1363_v44 = vpop.f32.mrf.mxu1 }
 0x6c9   :  { %v1364_v59 = vadd.f32 %v1363_v44, %v1318_v29 }
 0x6ca   :  { %v4028_v26 = vpop.f32.mrf.mxu1 }
 0x6cb   :  { %v5303_v35 = vadd.f32 %v1364_v59, %v4762_v15 }
 0x6cc   :  { %v1366_v62 = vpop.f32.mrf.mxu1 }
 0x6cd   :  { %v1367_v47 = vadd.f32 %v1366_v62, %v1318_v29  ;;  %v1390_v1 = vsel %vm240_vm2, %v5303_v35, 0.0  ;;  %v1412_v63 = vmul.f32 %v5303_v35, %v5303_v35 }
 0x6ce   :  { %v4029_v39 = vpop.f32.mrf.mxu1  ;;  %1391 = vadd.xlane.f32.xlu1 %v1390_v1 }
 0x6cf   :  { %v5310_v28 = vadd.f32 %v1367_v47, %v4764_v16  ;;  %v1417_v12 = vsel %vm240_vm2, %v1412_v63, 0.0 }
 0x6d0   :  { %1418 = vadd.xlane.f32.xlu0 %v1417_v12 }
 0x6d1   :  { %v1413_v15 = vmul.f32 %v5310_v28, %v5310_v28  ;;  %v1393_v19 = vsel %vm240_vm2, %v5310_v28, 0.0 }
 0x6d3   :  { %v1371_v60 = vpop.f32.mrf.mxu1  ;;  %v1420_v20 = vsel %vm240_vm2, %v1413_v15, 0.0 }
 0x6d4   :  { %v1372_v58 = vadd.f32 %v1371_v60, %v1318_v29  ;;  %1394 = vadd.xlane.f32.xlu0 %v1393_v19  ;;  %1421 = vadd.xlane.f32.xlu1 %v1420_v20 }
 0x6d5   :  { %v4032_v2 = vpop.f32.mrf.mxu1 }
 0x6d6   :  { %v5319_v50 = vadd.f32 %v1372_v58, %v4777_v24 }
 0x6d7   :  { %v1374_v16 = vpop.f32.mrf.mxu1 }
 0x6d8   :  { %v1375_v5 = vadd.f32 %v1374_v16, %v1318_v29  ;;  %v1396_v32 = vsel %vm240_vm2, %v5319_v50, 0.0  ;;  %v1414_v6 = vmul.f32 %v5319_v50, %v5319_v50 }
 0x6d9   :  { %1397 = vadd.xlane.f32.xlu0 %v1396_v32  ;;  %v4033_v11 = vpop.f32.mrf.mxu1 }
 0x6da   :  { %v5326_v48 = vadd.f32 %v1375_v5, %v4779_v25  ;;  %v1423_v61 = vsel %vm240_vm2, %v1414_v6, 0.0  ;;  %v4406_v25 = vld [vmem:[%s6313_s4] sm:$0xff]  }
 0x6db   :  { %4041 = vmatpush3.bf16.msra.mxu0 %v4406_v25 }
 0x6dc   :  { %v1399_v46 = vsel %vm240_vm2, %v5326_v48, 0.0  ;;  %v1415_v24 = vmul.f32 %v5326_v48, %v5326_v48  ;;  %4082 = vmatprep.subr.bf16.mxu0 %v4643_v0 }
 0x6dd   :  { %1424 = vadd.xlane.f32.xlu0 %v1423_v61  ;;  %1400 = vadd.xlane.f32.xlu1 %v1399_v46 }
 0x6de   :  { %v1426_v13 = vsel %vm240_vm2, %v1415_v24, 0.0 }
 0x6e1   :  { %1427 = vadd.xlane.f32.xlu1 %v1426_v13 }
 0x700   :  { %v1379_v33 = vpop.f32.mrf.mxu1 }
 0x701   :  { %v1380_v18 = vadd.f32 %v1379_v33, %v1318_v29 }
 0x702   :  { %v4036_v42 = vpop.f32.mrf.mxu1 }
 0x703   :  { %v5343_v34 = vadd.f32 %v1380_v18, %v4786_v30  ;;  %v5359_v30 = vrot.slane %v5354_v31, %v1469_v49 }
 0x704   :  { %v1382_v56 = vpop.f32.mrf.mxu1 }
 0x705   :  { %v1403_v57 = vsel %vm1402_vm14, %v5343_v34, 0.0  ;;  %v1416_v22 = vmul.f32 %v5343_v34, %v5343_v34 }
 0x706   :  { %1404 = vadd.xlane.f32.xlu0 %v1403_v57  ;;  %v4037_v4 = vpop.f32.mrf.mxu1 }
 0x707   :  { %v1429_v10 = vsel %vm1402_vm14, %v1416_v22, 0.0 }
 0x708   :  { %1430 = vadd.xlane.f32.xlu1 %v1429_v10 }
 0x71c   :  { %1477 = vrot.lane.b32.xlu0 %v5359_v30, %s4645_s15 }
 0x757   :  { %v1392_v43 = vpop.xlane.xlu1 %1391 }
 0x758   :  { %v1407_v21 = vmul.f32 0.03125, %v1392_v43 }
 0x759   :  { %v1419_v52 = vpop.xlane.xlu0 %1418 }
 0x75a   :  { %v1442_v29 = vmul.f32 %v1407_v21, %v1407_v21  ;;  %v1432_v44 = vmul.f32 0.03125, %v1419_v52  ;;  %v1437_v46 = vsub.f32 %v5303_v35, %v1407_v21 }
 0x75c   :  { %v1447_v47 = vsub.f32 %v1432_v44, %v1442_v29 }
 0x75d   :  { %v1395_v3 = vpop.xlane.xlu0 %1394  ;;  %v1422_v55 = vpop.xlane.xlu1 %1421 }
 0x75e   :  { %v1408_v40 = vmul.f32 0.03125, %v1395_v3  ;;  %v1433_v26 = vmul.f32 0.03125, %v1422_v55  ;;  %v1452_v19 = vadd.f32 1e-05, %v1447_v47  ;;  %v4414_v47 = vld [vmem:[%s6314_s5] sm:$0xff]  }
 0x760   :  { %v1443_v59 = vmul.f32 %v1408_v40, %v1408_v40  ;;  %4509 = vrsqrt.f32 %v1452_v19  ;;  %v1438_v24 = vsub.f32 %v5310_v28, %v1408_v40 }
 0x762   :  { %v1398_v23 = vpop.xlane.xlu0 %1397  ;;  %v1448_v39 = vsub.f32 %v1433_v26, %v1443_v59 }
 0x763   :  { %v1409_v1 = vmul.f32 0.03125, %v1398_v23 }
 0x764   :  { %v1453_v58 = vadd.f32 1e-05, %v1448_v39 }
 0x765   :  { %v1444_v20 = vmul.f32 %v1409_v1, %v1409_v1  ;;  %v1439_v56 = vsub.f32 %v5319_v50, %v1409_v1  ;;  %v5431_v1 = vsub.s32 1, %v4797_v36 }
 0x766   :  { %v1401_v14 = vpop.xlane.xlu1 %1400  ;;  %v1425_v62 = vpop.xlane.xlu0 %1424  ;;  %4511 = vrsqrt.f32 %v1453_v58 }
 0x767   :  { %v1410_v12 = vmul.f32 0.03125, %v1401_v14  ;;  %v1434_v15 = vmul.f32 0.03125, %v1425_v62  ;;  %v4412_v62 = vld [vmem:[%s6314_s5 + $0x10] sm:$0xff]  }
 0x768   :  { %4065 = vmatpush3.bf16.msra.mxu1 %v4412_v62 }
 0x769   :  { %v1445_v2 = vmul.f32 %v1410_v12, %v1410_v12  ;;  %v1449_v16 = vsub.f32 %v1434_v15, %v1444_v20  ;;  %v1440_v57 = vsub.f32 %v5326_v48, %v1410_v12  ;;  %4066 = vmatprep.subr.bf16.mxu1 %v4643_v0 }
 0x76a   :  { %v1428_v63 = vpop.xlane.xlu1 %1427 }
 0x76b   :  { %v1435_v60 = vmul.f32 0.03125, %v1428_v63  ;;  %v1454_v32 = vadd.f32 1e-05, %v1449_v16  ;;  %v1491_v63 = vrot.slane %v5354_v31, %v5431_v1 }
 0x76d   :  { %v1450_v5 = vsub.f32 %v1435_v60, %v1445_v2  ;;  %4513 = vrsqrt.f32 %v1454_v32  ;;  %v4510_v11 = vpop.eup %4509 }
 0x76e   :  { %v1462_v13 = vmul.f32 %v4510_v11, %v1437_v46 }
 0x76f   :  { %v1455_v6 = vadd.f32 1e-05, %v1450_v5 }
 0x770   :  { %v1471_v9 = vmul.f32 %v5359_v30, %v1462_v13 }
 0x771   :  { %4515 = vrsqrt.f32 %v1455_v6 }
 0x773   :  { %v4512_v61 = vpop.eup %4511 }
 0x774   :  { %v1463_v54 = vmul.f32 %v4512_v61, %v1438_v24 }
 0x776   :  { %v1472_v41 = vmul.f32 %v5359_v30, %v1463_v54 }
 0x77a   :  { %v4514_v33 = vpop.eup %4513 }
 0x77b   :  { %v1464_v8 = vmul.f32 %v4514_v33, %v1439_v56 }
 0x77d   :  { %v1473_v48 = vmul.f32 %v5359_v30, %v1464_v8 }
 0x77e   :  { %v4516_v42 = vpop.eup %4515 }
 0x77f   :  { %v1465_v52 = vmul.f32 %v4516_v42, %v1440_v57 }
 0x781   :  { %v1474_v3 = vmul.f32 %v5359_v30, %v1465_v52 }
 0x78f   :  { %v1405_v25 = vpop.xlane.xlu0 %1404 }
 0x790   :  { %v1411_v18 = vmul.f32 0.03125, %v1405_v25 }
 0x791   :  { %v1431_v22 = vpop.xlane.xlu1 %1430 }
 0x792   :  { %v1446_v4 = vmul.f32 %v1411_v18, %v1411_v18  ;;  %v1436_v10 = vmul.f32 0.03125, %v1431_v22  ;;  %v1441_v23 = vsub.f32 %v5343_v34, %v1411_v18  ;;  %v4413_v34 = vld [vmem:[%s6314_s5 + $0x8] sm:$0xff]  }
 0x793   :  { %v1478_v35 = vpop.permute.xlu0 %1477  ;;  %4067 = vmatpush3.bf16.msra.mxu1 %v4413_v34 }
 0x794   :  { %v1451_v28 = vsub.f32 %v1436_v10, %v1446_v4  ;;  %v5389_v51 = vadd.f32 %v1478_v35, %v1471_v9  ;;  %v5391_v53 = vadd.f32 %v1478_v35, %v1472_v41  ;;  %v5400_v55 = vadd.f32 %v1478_v35, %v1473_v48  ;;  %4068 = vmatprep.subr.bf16.mxu1 %v4643_v0 }
 0x795   :  { %v5402_v21 = vadd.f32 %v1478_v35, %v1474_v3  ;;  %v1579_v4 = vsub.s32 3, %v4797_v36 }
 0x796   :  { %v1456_v43 = vadd.f32 1e-05, %v1451_v28  ;;  %v1485_v50 = vpack.c.bf16 %v5391_v53, %v5389_v51 }
 0x797   :  { %v1486_v40 = vpack.c.bf16 %v5402_v21, %v5400_v55  ;;  %4069 = vmatpush3.bf16.msra.mxu1 %v4414_v47  ;;  %v1580_v10 = vrot.slane %v5354_v31, %v1579_v4 }
 0x798   :  { %4517 = vrsqrt.f32 %v1456_v43  ;;  %4043 = vmatmul.mubr.msk.bf16.vlgmr.msra.gmra.mxu0 %vm240_vm2, %v1485_v50  ;;  %4116 = vmatprep.subr.bf16.mxu1 %v4643_v0 }
 0x799   :  { %4046 = vmatprep.mubr.msk.bf16.mxu0 %vm4644_vm0, %v4643_v0 }
 0x7a0   :  { %4047 = vmatmul.mubr.msk.bf16.gmra.mxu0 %vm240_vm2, %v1486_v40 }
 0x7a1   :  { %4050 = vmatprep.mubr.msk.bf16.mxu0 %vm4644_vm0, %v4643_v0 }
 0x7a5   :  { %v4518_v14 = vpop.eup %4517 }
 0x7a6   :  { %v1466_v29 = vmul.f32 %v4518_v14, %v1441_v23 }
 0x7a8   :  { %v1475_v44 = vmul.f32 %v5359_v30, %v1466_v29 }
 0x7aa   :  { %v5411_v59 = vadd.f32 %v1478_v35, %v1475_v44 }
 0x7ac   :  { %v1487_v26 = vpack.c.bf16 %v5411_v59, %v5411_v59 }
 0x7ae   :  { %4051 = vmatmul.mubr.msk.bf16.gmra.mxu0 %vm240_vm2, %v1487_v26 }
 0x7af   :  { %4086 = vmatprep.mubr.msk.bf16.mxu0 %vm4644_vm0, %v4643_v0 }
 0x858   :  { %v1547_v39 = vpop.f32.mrf.mxu0 }
 0x859   :  { %v1548_v15 = vadd.f32 %v1547_v39, %v1491_v63 }
 0x85a   :  { %v4044_v12 = vpop.f32.mrf.mxu0 }
 0x85b   :  { %v1569_v58 = vmax.f32 %v1548_v15, 0.0 }
 0x85c   :  { %v1550_v60 = vpop.f32.mrf.mxu0 }
 0x85d   :  { %v1551_v19 = vadd.f32 %v1550_v60, %v1491_v63 }
 0x85e   :  { %v4045_v20 = vpop.f32.mrf.mxu0 }
 0x85f   :  { %v1570_v2 = vmax.f32 %v1551_v19, 0.0 }
 0x860   :  { %v1555_v16 = vpop.f32.mrf.mxu0 }
 0x861   :  { %v1574_v5 = vpack.c.bf16 %v1570_v2, %v1569_v58  ;;  %v1556_v6 = vadd.f32 %v1555_v16, %v1491_v63 }
 0x862   :  { %v4048_v32 = vpop.f32.mrf.mxu0 }
 0x863   :  { %4071 = vmatmul.mubr.bf16.vlgmr.msra.gmra.mxu1 %v1574_v5  ;;  %v1571_v24 = vmax.f32 %v1556_v6, 0.0 }
 0x864   :  { %v1558_v11 = vpop.f32.mrf.mxu0  ;;  %4074 = vmatprep.mubr.msk.bf16.mxu1 %vm4644_vm0, %v4643_v0 }
 0x865   :  { %v1559_v61 = vadd.f32 %v1558_v11, %v1491_v63  ;;  %v5497_v11 = vld [vmem:[%s6310_s3 + $0x10] sm:$0xff]  }
 0x866   :  { %v4049_v46 = vpop.f32.mrf.mxu0 }
 0x867   :  { %v1572_v13 = vmax.f32 %v1559_v61, 0.0 }
 0x869   :  { %v1575_v54 = vpack.c.bf16 %v1572_v13, %v1571_v24 }
 0x86b   :  { %4075 = vmatmul.mubr.bf16.gmra.mxu1 %v1575_v54 }
 0x86c   :  { %4078 = vmatprep.mubr.msk.bf16.mxu1 %vm4644_vm0, %v4643_v0 }
 0x86e   :  { %v1563_v25 = vpop.f32.mrf.mxu0 }
 0x86f   :  { %v1564_v33 = vadd.f32 %v1563_v25, %v1491_v63 }
 0x870   :  { %v4052_v18 = vpop.f32.mrf.mxu0 }
 0x871   :  { %v1573_v42 = vmax.f32 %v1564_v33, 0.0 }
 0x872   :  { %v1566_v56 = vpop.f32.mrf.mxu0 }
 0x873   :  { %v1576_v57 = vpack.c.bf16 %v1573_v42, %v1573_v42 }
 0x874   :  { %v4053_v22 = vpop.f32.mrf.mxu0 }
 0x875   :  { %4079 = vmatmul.mubr.bf16.gmra.mxu1 %v1576_v57 }
 0x876   :  { %4122 = vmatprep.mubr.msk.bf16.mxu1 %vm4644_vm0, %v4643_v0 }
 0x923   :  { %v1663_v9 = vpop.f32.mrf.mxu1 }
 0x924   :  { %v1664_v41 = vadd.f32 %v1663_v9, %v1580_v10 }
 0x925   :  { %v4072_v35 = vpop.f32.mrf.mxu1 }
 0x926   :  { %v5446_v8 = vadd.f32 %v1664_v41, %v5389_v51 }
 0x927   :  { %v1666_v28 = vpop.f32.mrf.mxu1 }
 0x928   :  { %v1667_v52 = vadd.f32 %v1666_v28, %v1580_v10  ;;  %v1690_v43 = vsel %vm240_vm2, %v5446_v8, 0.0  ;;  %v1710_v50 = vmul.f32 %v5446_v8, %v5446_v8 }
 0x929   :  { %1691 = vadd.xlane.f32.xlu1 %v1690_v43  ;;  %v4073_v48 = vpop.f32.mrf.mxu1 }
 0x92a   :  { %v5453_v40 = vadd.f32 %v1667_v52, %v5391_v53  ;;  %v1715_v23 = vsel %vm240_vm2, %v1710_v50, 0.0 }
 0x92b   :  { %v1671_v3 = vpop.f32.mrf.mxu1 }
 0x92c   :  { %v1672_v31 = vadd.f32 %v1671_v3, %v1580_v10  ;;  %v1693_v44 = vsel %vm240_vm2, %v5453_v40, 0.0  ;;  %v1711_v62 = vmul.f32 %v5453_v40, %v5453_v40 }
 0x92d   :  { %1716 = vadd.xlane.f32.xlu1 %v1715_v23  ;;  %v4076_v51 = vpop.f32.mrf.mxu1 }
 0x92e   :  { %v5457_v14 = vadd.f32 %v1672_v31, %v5400_v55  ;;  %v1718_v63 = vsel %vm240_vm2, %v1711_v62, 0.0 }
 0x92f   :  { %v1674_v29 = vpop.f32.mrf.mxu1 }
 0x930   :  { %v1712_v26 = vmul.f32 %v5457_v14, %v5457_v14  ;;  %v1675_v47 = vadd.f32 %v1674_v29, %v1580_v10  ;;  %v1696_v15 = vsel %vm240_vm2, %v5457_v14, 0.0 }
 0x931   :  { %1694 = vadd.xlane.f32.xlu1 %v1693_v44  ;;  %v4077_v53 = vpop.f32.mrf.mxu1 }
 0x932   :  { %v1721_v34 = vsel %vm240_vm2, %v1712_v26, 0.0  ;;  %v5468_v12 = vadd.f32 %v1675_v47, %v5402_v21 }
 0x933   :  { %1722 = vadd.xlane.f32.xlu0 %v1721_v34 }
 0x934   :  { %v1699_v58 = vsel %vm240_vm2, %v5468_v12, 0.0  ;;  %v1713_v2 = vmul.f32 %v5468_v12, %v5468_v12 }
 0x935   :  { %1719 = vadd.xlane.f32.xlu1 %v1718_v63  ;;  %v1679_v55 = vpop.f32.mrf.mxu1 }
 0x936   :  { %v1680_v20 = vadd.f32 %v1679_v55, %v1580_v10  ;;  %v1724_v21 = vsel %vm240_vm2, %v1713_v2, 0.0 }
 0x937   :  { %v4080_v39 = vpop.f32.mrf.mxu1 }
 0x938   :  { %v5477_v16 = vadd.f32 %v1680_v20, %v5411_v59  ;;  %v5490_v59 = vld [vmem:[%s6310_s3 + $0x18] sm:$0xff]  }
 0x939   :  { %1697 = vadd.xlane.f32.xlu1 %v1696_v15  ;;  %v1682_v60 = vpop.f32.mrf.mxu1  ;;  %4083 = vmatpush3.bf16.msra.mxu0 %v5490_v59 }
 0x93a   :  { %v1702_v5 = vsel %vm1402_vm14, %v5477_v16, 0.0  ;;  %v1714_v32 = vmul.f32 %v5477_v16, %v5477_v16  ;;  %4084 = vmatprep.subr.bf16.mxu0 %v4643_v0 }
 0x93b   :  { %v4081_v19 = vpop.f32.mrf.mxu1 }
 0x93c   :  { %v1727_v6 = vsel %vm1402_vm14, %v1714_v32, 0.0 }
 0x93d   :  { %1700 = vadd.xlane.f32.xlu1 %v1699_v58  ;;  %4085 = vmatpush3.bf16.msra.mxu0 %v5497_v11 }
 0x93e   :  { %4098 = vmatprep.subr.bf16.mxu0 %v4643_v0 }
 0x941   :  { %1725 = vadd.xlane.f32.xlu1 %v1724_v21 }
 0x945   :  { %1703 = vadd.xlane.f32.xlu1 %v1702_v5 }
 0x949   :  { %1728 = vadd.xlane.f32.xlu1 %v1727_v6  ;;  %1773 = vrot.lane.b32.xlu0 %v5359_v30, %s4657_s26 }
 0x95a   :  { %1765 = vrot.lane.b32.xlu1 %v5359_v30, %s4652_s21 }
 0x9b2   :  { %v1692_v61 = vpop.xlane.xlu1 %1691 }
 0x9b3   :  { %v1705_v46 = vmul.f32 0.03125, %v1692_v61 }
 0x9b5   :  { %v1740_v54 = vmul.f32 %v1705_v46, %v1705_v46  ;;  %v1735_v63 = vsub.f32 %v5446_v8, %v1705_v46 }
 0x9b6   :  { %v1717_v24 = vpop.xlane.xlu1 %1716 }
 0x9b7   :  { %v1730_v13 = vmul.f32 0.03125, %v1717_v24 }
 0x9b9   :  { %v1745_v18 = vsub.f32 %v1730_v13, %v1740_v54 }
 0x9ba   :  { %v1695_v25 = vpop.xlane.xlu1 %1694 }
 0x9bb   :  { %v1706_v33 = vmul.f32 0.03125, %v1695_v25  ;;  %v1750_v22 = vadd.f32 1e-05, %v1745_v18 }
 0x9bc   :  { %v1723_v9 = vpop.xlane.xlu0 %1722 }
 0x9bd   :  { %v1741_v56 = vmul.f32 %v1706_v33, %v1706_v33  ;;  %4519 = vrsqrt.f32 %v1750_v22  ;;  %v1732_v28 = vmul.f32 0.03125, %v1723_v9  ;;  %v1736_v55 = vsub.f32 %v5453_v40, %v1706_v33 }
 0x9be   :  { %v1720_v42 = vpop.xlane.xlu1 %1719 }
 0x9bf   :  { %v1731_v57 = vmul.f32 0.03125, %v1720_v42 }
 0x9c0   :  { %v1774_v2 = vpop.permute.xlu0 %1773 }
 0x9c1   :  { %v1746_v10 = vsub.f32 %v1731_v57, %v1741_v56 }
 0x9c2   :  { %v1698_v41 = vpop.xlane.xlu1 %1697 }
 0x9c3   :  { %v1751_v30 = vadd.f32 1e-05, %v1746_v10  ;;  %v1707_v35 = vmul.f32 0.03125, %v1698_v41 }
 0x9c5   :  { %4521 = vrsqrt.f32 %v1751_v30  ;;  %v1742_v52 = vmul.f32 %v1707_v35, %v1707_v35  ;;  %v1737_v61 = vsub.f32 %v5457_v14, %v1707_v35 }
 0x9c6   :  { %v1701_v43 = vpop.xlane.xlu1 %1700 }
 0x9c7   :  { %v1747_v50 = vsub.f32 %v1732_v28, %v1742_v52  ;;  %v1708_v48 = vmul.f32 0.03125, %v1701_v43 }
 0x9c9   :  { %v1752_v3 = vadd.f32 1e-05, %v1747_v50  ;;  %v1743_v23 = vmul.f32 %v1708_v48, %v1708_v48  ;;  %v1738_v46 = vsub.f32 %v5468_v12, %v1708_v48 }
 0x9ca   :  { %v1726_v31 = vpop.xlane.xlu1 %1725  ;;  %v4520_v53 = vpop.eup %4519 }
 0x9cb   :  { %4523 = vrsqrt.f32 %v1752_v3  ;;  %v1733_v51 = vmul.f32 0.03125, %v1726_v31  ;;  %v1760_v19 = vmul.f32 %v4520_v53, %v1735_v63 }
 0x9cd   :  { %v1748_v29 = vsub.f32 %v1733_v51, %v1743_v23 }
 0x9ce   :  { %v1704_v44 = vpop.xlane.xlu1 %1703 }
 0x9cf   :  { %v1753_v26 = vadd.f32 1e-05, %v1748_v29  ;;  %v1709_v62 = vmul.f32 0.03125, %v1704_v44 }
 0x9d1   :  { %4525 = vrsqrt.f32 %v1753_v26  ;;  %v1744_v39 = vmul.f32 %v1709_v62, %v1709_v62  ;;  %v1739_v56 = vsub.f32 %v5477_v16, %v1709_v62  ;;  %v3631_v16 = vld [vmem:[%s6312_s6 + $0x4] sm:$0xf] }
 0x9d2   :  { %v4522_v34 = vpop.eup %4521  ;;  %v1729_v47 = vpop.xlane.xlu1 %1728  ;;  %v5537_v35 = vrot.slane %v3631_v16, %v4800_v37 }
 0x9d3   :  { %v1734_v15 = vmul.f32 0.03125, %v1729_v47  ;;  %v1761_v20 = vmul.f32 %v4522_v34, %v1736_v55 }
 0x9d5   :  { %v1749_v60 = vsub.f32 %v1734_v15, %v1744_v39 }
 0x9d6   :  { %v1766_v58 = vpop.permute.xlu1 %1765 }
 0x9d7   :  { %v1754_v21 = vadd.f32 1e-05, %v1749_v60  ;;  %v1768_v5 = vmul.f32 %v1766_v58, %v1760_v19  ;;  %v1769_v32 = vmul.f32 %v1766_v58, %v1761_v20 }
 0x9d8   :  { %v4524_v6 = vpop.eup %4523 }
 0x9d9   :  { %4527 = vrsqrt.f32 %v1754_v21  ;;  %v5506_v24 = vadd.f32 %v1774_v2, %v1768_v5  ;;  %v5508_v13 = vadd.f32 %v1774_v2, %v1769_v32  ;;  %v1762_v8 = vmul.f32 %v4524_v6, %v1737_v61 }
 0x9db   :  { %v1810_v40 = vpack.c.bf16 %v5508_v13, %v5506_v24  ;;  %v1770_v33 = vmul.f32 %v1766_v58, %v1762_v8 }
 0x9dd   :  { %4087 = vmatmul.mubr.msk.bf16.vlgmr.msra.gmra.mxu0 %vm240_vm2, %v1810_v40  ;;  %v5516_v18 = vadd.f32 %v1774_v2, %v1770_v33 }
 0x9de   :  { %v4526_v54 = vpop.eup %4525  ;;  %4090 = vmatprep.mubr.msk.bf16.mxu0 %vm4644_vm0, %v4643_v0 }
 0x9df   :  { %v1763_v25 = vmul.f32 %v4526_v54, %v1738_v46 }
 0x9e1   :  { %v1771_v14 = vmul.f32 %v1766_v58, %v1763_v25 }
 0x9e3   :  { %v5518_v42 = vadd.f32 %v1774_v2, %v1771_v14 }
 0x9e5   :  { %v1811_v57 = vpack.c.bf16 %v5518_v42, %v5516_v18 }
 0x9e6   :  { %v4528_v22 = vpop.eup %4527 }
 0x9e7   :  { %4091 = vmatmul.mubr.msk.bf16.gmra.mxu0 %vm240_vm2, %v1811_v57  ;;  %v1764_v12 = vmul.f32 %v4528_v22, %v1739_v56 }
 0x9e8   :  { %4094 = vmatprep.mubr.msk.bf16.mxu0 %vm4644_vm0, %v4643_v0 }
 0x9e9   :  { %v1772_v10 = vmul.f32 %v1766_v58, %v1764_v12 }
 0x9eb   :  { %v5526_v9 = vadd.f32 %v1774_v2, %v1772_v10 }
 0x9ed   :  { %v1812_v41 = vpack.c.bf16 %v5526_v9, %v5526_v9 }
 0x9ef   :  { %4095 = vmatmul.mubr.msk.bf16.gmra.mxu0 %vm240_vm2, %v1812_v41 }
 0x9f0   :  { %4104 = vmatprep.mubr.msk.bf16.mxu0 %vm4644_vm0, %v4643_v0 }
 0xa9d   :  { %v1872_v30 = vpop.f32.mrf.mxu0 }
 0xa9e   :  { %v1873_v43 = vadd.f32 %v1872_v30, %v5537_v35 }
 0xa9f   :  { %v4088_v28 = vpop.f32.mrf.mxu0 }
 0xaa1   :  { %v1875_v52 = vpop.f32.mrf.mxu0 }
 0xaa2   :  { %v1876_v50 = vadd.f32 %v1875_v52, %v5537_v35 }
 0xaa3   :  { %v4089_v48 = vpop.f32.mrf.mxu0 }
 0xaa4   :  { %v5541_v3 = vpack.c.bf16 %v1876_v50, %v1873_v43 }
 0xaa6   :  { %2124 = vrot.lane.b32.xlu0 %v5541_v3, %s4648_s18 }
 0xaa7   :  { %v1880_v31 = vpop.f32.mrf.mxu0 }
 0xaa8   :  { %v1881_v29 = vadd.f32 %v1880_v31, %v5537_v35 }
 0xaa9   :  { %v4092_v23 = vpop.f32.mrf.mxu0 }
 0xaab   :  { %v1883_v51 = vpop.f32.mrf.mxu0 }
 0xaac   :  { %v1884_v44 = vadd.f32 %v1883_v51, %v5537_v35 }
 0xaad   :  { %v4093_v26 = vpop.f32.mrf.mxu0 }
 0xaae   :  { %v5547_v62 = vpack.c.bf16 %v1884_v44, %v1881_v29 }
 0xaaf   :  { %v1888_v53 = vpop.f32.mrf.mxu0 }
 0xab0   :  { %v1889_v34 = vadd.f32 %v1888_v53, %v5537_v35  ;;  %2126 = vrot.lane.b32.xlu0 %v5547_v62, %s4648_s18 }
 0xab1   :  { %v4096_v47 = vpop.f32.mrf.mxu0 }
 0xab2   :  { %v5552_v63 = vpack.c.bf16 %v1889_v34, %v1889_v34 }
 0xab3   :  { %v1891_v55 = vpop.f32.mrf.mxu0 }
 0xab4   :  { %2128 = vrot.lane.b32.xlu0 %v5552_v63, %s4648_s18  ;;  %1904 = vrot.lane.b32.xlu1 %v5552_v63, %s4645_s15 }
 0xab5   :  { %v4097_v39 = vpop.f32.mrf.mxu0 }
 0xab8   :  { %2354 = vrot.lane.b32.xlu0 %v5541_v3, %s4650_s20  ;;  %1902 = vrot.lane.b32.xlu1 %v5547_v62, %s4645_s15 }
 0xabc   :  { %2356 = vrot.lane.b32.xlu0 %v5547_v62, %s4650_s20  ;;  %1900 = vrot.lane.b32.xlu1 %v5541_v3, %s4645_s15 }
 0xac0   :  { %2358 = vrot.lane.b32.xlu0 %v5552_v63, %s4650_s20  ;;  %2134 = vrot.lane.b32.xlu1 %v5552_v63, %s4646_s16 }
 0xac4   :  { %2584 = vrot.lane.b32.xlu0 %v5541_v3, %s4651_s2  ;;  %2132 = vrot.lane.b32.xlu1 %v5547_v62, %s4646_s16 }
 0xac8   :  { %2588 = vrot.lane.b32.xlu0 %v5552_v63, %s4651_s2  ;;  %2130 = vrot.lane.b32.xlu1 %v5541_v3, %s4646_s16 }
 0xacc   :  { %2048 = vrot.lane.b32.xlu0 %v5541_v3, %s4652_s21  ;;  %2364 = vrot.lane.b32.xlu1 %v5552_v63, %s4647_s17 }
 0xad0   :  { %2052 = vrot.lane.b32.xlu0 %v5552_v63, %s4652_s21  ;;  %2362 = vrot.lane.b32.xlu1 %v5547_v62, %s4647_s17 }
 0xad4   :  { %2280 = vrot.lane.b32.xlu0 %v5547_v62, %s4653_s22  ;;  %2360 = vrot.lane.b32.xlu1 %v5541_v3, %s4647_s17 }
 0xad8   :  { %2278 = vrot.lane.b32.xlu0 %v5541_v3, %s4653_s22  ;;  %2594 = vrot.lane.b32.xlu1 %v5552_v63, %s4649_s19 }
 0xadc   :  { %2592 = vrot.lane.b32.xlu1 %v5547_v62, %s4649_s19 }
 0xae0   :  { %2590 = vrot.lane.b32.xlu1 %v5541_v3, %s4649_s19 }
 0xae4   :  { %2586 = vrot.lane.b32.xlu1 %v5547_v62, %s4651_s2 }
 0xae8   :  { %2050 = vrot.lane.b32.xlu1 %v5547_v62, %s4652_s21 }
 0xb18   :  { %v2125_v15 = vpop.permute.xlu0 %2124 }
 0xb22   :  { %v2127_v60 = vpop.permute.xlu0 %2126 }
 0xb26   :  { %v5602_v19 = vpop.permute.xlu0 %2128  ;;  %v1905_v20 = vpop.permute.xlu1 %1904 }
 0xb27   :  { %v1922_v58 = vsel %vm318_vm3, %v1905_v20, 0 }
 0xb28   :  { %4099 = vmatpush3.bf16.xpose.msra.mxu0 %v1922_v58 }
 0xb29   :  { %4100 = vmatprep.subr.bf16.mxu0 %v4643_v0 }
 0xb2a   :  { %v5606_v2 = vpop.permute.xlu0 %2354  ;;  %v1903_v21 = vpop.permute.xlu1 %1902 }
 0xb2b   :  { %v1919_v6 = vsel %vm318_vm3, %v1903_v21, 0 }
 0xb2e   :  { %v5608_v5 = vpop.permute.xlu0 %2356  ;;  %v1901_v32 = vpop.permute.xlu1 %1900 }
 0xb2f   :  { %v1916_v54 = vsel %vm318_vm3, %v1901_v32, 0 }
 0xb30   :  { %4101 = vmatpush3.bf16.xpose.msra.mxu0 %v1919_v6 }
 0xb31   :  { %4102 = vmatprep.subr.bf16.mxu0 %v4643_v0 }
 0xb32   :  { %v5612_v61 = vpop.permute.xlu0 %2358  ;;  %v2135_v8 = vpop.permute.xlu1 %2134 }
 0xb33   :  { %v2152_v57 = vsel %vm318_vm3, %v2135_v8, 0 }
 0xb36   :  { %v5614_v40 = vpop.permute.xlu0 %2584  ;;  %v2133_v46 = vpop.permute.xlu1 %2132 }
 0xb37   :  { %v2149_v16 = vsel %vm318_vm3, %v2133_v46, 0 }
 0xb38   :  { %4103 = vmatpush3.bf16.xpose.msra.mxu0 %v1916_v54 }
 0xb39   :  { %4134 = vmatprep.subr.bf16.mxu0 %v4643_v0 }
 0xb3a   :  { %v5618_v25 = vpop.permute.xlu0 %2588  ;;  %v2131_v33 = vpop.permute.xlu1 %2130 }
 0xb3b   :  { %v2146_v52 = vsel %vm318_vm3, %v2131_v33, 0 }
 0xb3e   :  { %v2049_v14 = vpop.permute.xlu0 %2048  ;;  %v2365_v56 = vpop.permute.xlu1 %2364 }
 0xb3f   :  { %4105 = vmatmul.mubr.msk.bf16.vlgmr.msra.gmra.mxu0 %vm318_vm3, %v5541_v3  ;;  %v2382_v48 = vsel %vm318_vm3, %v2365_v56, 0 }
 0xb40   :  { %4135 = vmatpush3.bf16.xpose.msra.mxu0 %v2152_v57  ;;  %4108 = vmatprep.mubr.msk.bf16.mxu0 %vm4644_vm0, %v4643_v0 }
 0xb41   :  { %4136 = vmatprep.subr.bf16.mxu0 %v4643_v0 }
 0xb42   :  { %v2053_v22 = vpop.permute.xlu0 %2052  ;;  %v2363_v12 = vpop.permute.xlu1 %2362 }
 0xb43   :  { %v2066_v10 = vsel %vm480_vm4, %v2053_v22, 0  ;;  %v2379_v23 = vsel %vm318_vm3, %v2363_v12, 0 }
 0xb44   :  { %4117 = vmatpush3.bf16.msra.mxu1 %v2066_v10 }
 0xb45   :  { %4118 = vmatprep.subr.bf16.mxu1 %v4643_v0 }
 0xb46   :  { %v2361_v41 = vpop.permute.xlu1 %2360 }
 0xb47   :  { %4109 = vmatmul.mubr.msk.bf16.gmra.mxu0 %vm318_vm3, %v5547_v62  ;;  %v2376_v51 = vsel %vm318_vm3, %v2361_v41, 0 }
 0xb48   :  { %4137 = vmatpush3.bf16.xpose.msra.mxu0 %v2149_v16  ;;  %4112 = vmatprep.mubr.msk.bf16.mxu0 %vm4644_vm0, %v4643_v0 }
 0xb49   :  { %4138 = vmatprep.subr.bf16.mxu0 %v4643_v0 }
 0xb4a   :  { %v2595_v30 = vpop.permute.xlu1 %2594 }
 0xb4b   :  { %v2612_v29 = vsel %vm318_vm3, %v2595_v30, 0 }
 0xb4e   :  { %v2593_v28 = vpop.permute.xlu1 %2592 }
 0xb4f   :  { %4113 = vmatmul.mubr.msk.bf16.gmra.mxu0 %vm318_vm3, %v5552_v63  ;;  %v2609_v44 = vsel %vm318_vm3, %v2593_v28, 0 }
 0xb50   :  { %4139 = vmatpush3.bf16.xpose.msra.mxu0 %v2146_v52  ;;  %4140 = vmatprep.mubr.msk.bf16.mxu0 %vm4644_vm0, %v4643_v0 }
 0xb51   :  { %4170 = vmatprep.subr.bf16.mxu0 %v4643_v0 }
 0xb52   :  { %v2591_v43 = vpop.permute.xlu1 %2590 }
 0xb53   :  { %v2606_v26 = vsel %vm318_vm3, %v2591_v43, 0 }
 0xb56   :  { %v2587_v50 = vpop.permute.xlu1 %2586 }
 0xb57   :  { %4141 = vmatmul.mubr.msk.bf16.vlgmr.msra.gmra.mxu0 %vm318_vm3, %v2125_v15 }
 0xb58   :  { %4171 = vmatpush3.bf16.xpose.msra.mxu0 %v2382_v48  ;;  %4144 = vmatprep.mubr.msk.bf16.mxu0 %vm4644_vm0, %v4643_v0 }
 0xb59   :  { %4172 = vmatprep.subr.bf16.mxu0 %v4643_v0 }
 0xb5a   :  { %v2051_v31 = vpop.permute.xlu1 %2050 }
 0xb5b   :  { %4119 = vmatpush3.bf16.msra.mxu1 %v2051_v31 }
 0xb5c   :  { %4120 = vmatprep.subr.bf16.mxu1 %v4643_v0 }
 0xb5f   :  { %4121 = vmatpush3.bf16.msra.mxu1 %v2049_v14  ;;  %4145 = vmatmul.mubr.msk.bf16.gmra.mxu0 %vm318_vm3, %v2127_v60 }
 0xb60   :  { %4173 = vmatpush3.bf16.xpose.msra.mxu0 %v2379_v23  ;;  %4148 = vmatprep.mubr.msk.bf16.mxu0 %vm4644_vm0, %v4643_v0 }
 0xb61   :  { %4174 = vmatprep.subr.bf16.mxu0 %v4643_v0  ;;  %4152 = vmatprep.subr.bf16.mxu1 %v4643_v0 }
 0xb67   :  { %4149 = vmatmul.mubr.msk.bf16.gmra.mxu0 %vm318_vm3, %v5602_v19 }
 0xb68   :  { %4175 = vmatpush3.bf16.xpose.msra.mxu0 %v2376_v51  ;;  %4176 = vmatprep.mubr.msk.bf16.mxu0 %vm4644_vm0, %v4643_v0 }
 0xb69   :  { %4206 = vmatprep.subr.bf16.mxu0 %v4643_v0 }
 0xb6f   :  { %4177 = vmatmul.mubr.msk.bf16.vlgmr.msra.gmra.mxu0 %vm318_vm3, %v5606_v2 }
 0xb70   :  { %4207 = vmatpush3.bf16.xpose.msra.mxu0 %v2612_v29  ;;  %4180 = vmatprep.mubr.msk.bf16.mxu0 %vm4644_vm0, %v4643_v0 }
 0xb71   :  { %4208 = vmatprep.subr.bf16.mxu0 %v4643_v0 }
 0xb77   :  { %4181 = vmatmul.mubr.msk.bf16.gmra.mxu0 %vm318_vm3, %v5608_v5 }
 0xb78   :  { %4209 = vmatpush3.bf16.xpose.msra.mxu0 %v2609_v44  ;;  %4184 = vmatprep.mubr.msk.bf16.mxu0 %vm4644_vm0, %v4643_v0 }
 0xb79   :  { %4210 = vmatprep.subr.bf16.mxu0 %v4643_v0 }
 0xb7f   :  { %4185 = vmatmul.mubr.msk.bf16.gmra.mxu0 %vm318_vm3, %v5612_v61 }
 0xb80   :  { %4211 = vmatpush3.bf16.xpose.msra.mxu0 %v2606_v26  ;;  %4212 = vmatprep.mubr.msk.bf16.mxu0 %vm4644_vm0, %v4643_v0 }
 0xb81   :  { %4242 = vmatprep.subr.bf16.mxu0 %v4643_v0 }
 0xb87   :  { %4213 = vmatmul.mubr.msk.bf16.vlgmr.msra.gmra.mxu0 %vm318_vm3, %v5614_v40 }
 0xb88   :  { %4216 = vmatprep.mubr.msk.bf16.mxu0 %vm4644_vm0, %v4643_v0 }
 0xb8f   :  { %4217 = vmatmul.mubr.msk.bf16.gmra.mxu0 %vm318_vm3, %v2587_v50 }
 0xb90   :  { %4220 = vmatprep.mubr.msk.bf16.mxu0 %vm4644_vm0, %v4643_v0 }
 0xb97   :  { %4221 = vmatmul.mubr.msk.bf16.gmra.mxu0 %vm318_vm3, %v5618_v25 }
 0xb98   :  { %4246 = vmatprep.mubr.msk.bf16.mxu0 %vm4644_vm0, %v4643_v0 }
 0xbff   :  { %v1958_v53 = vpop.f32.mrf.mxu0 }
 0xc00   :  { %v1980_v34 = vmul.f32 0.35355338, %v1958_v53 }
 0xc01   :  { %v4106_v47 = vpop.f32.mrf.mxu0 }
 0xc02   :  { %v5688_v55 = vadd.f32 %v1980_v34, %v4942_v7 }
 0xc03   :  { %v1961_v39 = vpop.f32.mrf.mxu0 }
 0xc04   :  { %v1981_v15 = vmul.f32 0.35355338, %v1961_v39  ;;  %v1990_v60 = vsel %vm403_vm7, %v5688_v55, -inf }
 0xc05   :  { %1991 = vmax.xlane.f32.xlu1 %v1990_v60  ;;  %v4107_v19 = vpop.f32.mrf.mxu0 }
 0xc06   :  { %v5693_v20 = vadd.f32 %v1981_v15, %v4947_v17 }
 0xc07   :  { %v1966_v58 = vpop.f32.mrf.mxu0 }
 0xc08   :  { %v1982_v2 = vmul.f32 0.35355338, %v1966_v58  ;;  %v1993_v21 = vsel %vm403_vm7, %v5693_v20, -inf }
 0xc09   :  { %1994 = vmax.xlane.f32.xlu0 %v1993_v21  ;;  %v4110_v5 = vpop.f32.mrf.mxu0 }
 0xc0a   :  { %v5698_v32 = vadd.f32 %v1982_v2, %v4954_v27 }
 0xc0b   :  { %v1969_v6 = vpop.f32.mrf.mxu0 }
 0xc0c   :  { %v1983_v61 = vmul.f32 0.35355338, %v1969_v6  ;;  %v1996_v8 = vsel %vm403_vm7, %v5698_v32, -inf }
 0xc0d   :  { %1997 = vmax.xlane.f32.xlu0 %v1996_v8  ;;  %v4111_v40 = vpop.f32.mrf.mxu0 }
 0xc0e   :  { %v5703_v46 = vadd.f32 %v1983_v61, %v4961_v38 }
 0xc0f   :  { %v1974_v54 = vpop.f32.mrf.mxu0 }
 0xc10   :  { %v1999_v25 = vsel %vm403_vm7, %v5703_v46, -inf  ;;  %v1984_v15 = vmul.f32 0.35355338, %v1974_v54 }
 0xc11   :  { %2000 = vmax.xlane.f32.xlu0 %v1999_v25  ;;  %v4114_v33 = vpop.f32.mrf.mxu0 }
 0xc12   :  { %v5725_v2 = vadd.f32 %v1984_v15, %v4968_v45 }
 0xc13   :  { %v1977_v14 = vpop.f32.mrf.mxu0 }
 0xc14   :  { %v2002_v33 = vsel %vm416_vm11, %v5725_v2, -inf }
 0xc15   :  { %v4115_v56 = vpop.f32.mrf.mxu0 }
 0xc16   :  { %2282 = vrot.lane.b32.xlu1 %v5552_v63, %s4653_s22 }
 0xc17   :  { %v2188_v57 = vpop.f32.mrf.mxu0 }
 0xc18   :  { %v2210_v22 = vmul.f32 0.35355338, %v2188_v57 }
 0xc19   :  { %v4142_v12 = vpop.f32.mrf.mxu0 }
 0xc1a   :  { %v5710_v10 = vadd.f32 %v2210_v22, %v4942_v7 }
 0xc1b   :  { %v2191_v41 = vpop.f32.mrf.mxu0 }
 0xc1c   :  { %v2220_v16 = vsel %vm403_vm7, %v5710_v10, -inf  ;;  %v2211_v21 = vmul.f32 0.35355338, %v2191_v41 }
 0xc1d   :  { %2221 = vmax.xlane.f32.xlu0 %v2220_v16  ;;  %v4143_v30 = vpop.f32.mrf.mxu0 }
 0xc1e   :  { %v5733_v40 = vadd.f32 %v2211_v21, %v4947_v17 }
 0xc1f   :  { %v2196_v28 = vpop.f32.mrf.mxu0 }
 0xc20   :  { %v2212_v52 = vmul.f32 0.35355338, %v2196_v28  ;;  %v2223_v41 = vsel %vm403_vm7, %v5733_v40, -inf }
 0xc21   :  { %v4146_v43 = vpop.f32.mrf.mxu0 }
 0xc22   :  { %v5715_v50 = vadd.f32 %v2212_v52, %v4954_v27 }
 0xc23   :  { %v2199_v48 = vpop.f32.mrf.mxu0 }
 0xc24   :  { %v2226_v31 = vsel %vm403_vm7, %v5715_v50, -inf  ;;  %v2213_v25 = vmul.f32 0.35355338, %v2199_v48 }
 0xc25   :  { %2227 = vmax.xlane.f32.xlu0 %v2226_v31  ;;  %v4147_v23 = vpop.f32.mrf.mxu0 }
 0xc26   :  { %v5738_v57 = vadd.f32 %v2213_v25, %v4961_v38 }
 0xc27   :  { %v2204_v51 = vpop.f32.mrf.mxu0 }
 0xc28   :  { %v2214_v29 = vmul.f32 0.35355338, %v2204_v51  ;;  %v2229_v31 = vsel %vm403_vm7, %v5738_v57, -inf }
 0xc29   :  { %v4150_v44 = vpop.f32.mrf.mxu0 }
 0xc2a   :  { %v5720_v26 = vadd.f32 %v2214_v29, %v4968_v45 }
 0xc2b   :  { %v2207_v53 = vpop.f32.mrf.mxu0 }
 0xc2c   :  { %v2232_v34 = vsel %vm416_vm11, %v5720_v26, -inf }
 0xc2d   :  { %2233 = vmax.xlane.f32.xlu0 %v2232_v34  ;;  %v4151_v47 = vpop.f32.mrf.mxu0 }
 0xc2f   :  { %v2418_v39 = vpop.f32.mrf.mxu0 }
 0xc30   :  { %v2440_v22 = vmul.f32 0.35355338, %v2418_v39 }
 0xc31   :  { %v4178_v60 = vpop.f32.mrf.mxu0 }
 0xc32   :  { %v5748_v52 = vadd.f32 %v2440_v22, %v4942_v7 }
 0xc33   :  { %v2421_v19 = vpop.f32.mrf.mxu0 }
 0xc34   :  { %v2441_v58 = vmul.f32 0.35355338, %v2421_v19  ;;  %v2450_v53 = vsel %vm403_vm7, %v5748_v52, -inf }
 0xc35   :  { %v4179_v5 = vpop.f32.mrf.mxu0 }
 0xc36   :  { %v5728_v6 = vadd.f32 %v2441_v58, %v4947_v17 }
 0xc37   :  { %v2426_v61 = vpop.f32.mrf.mxu0 }
 0xc38   :  { %v2453_v8 = vsel %vm403_vm7, %v5728_v6, -inf  ;;  %v2442_v43 = vmul.f32 0.35355338, %v2426_v61 }
 0xc39   :  { %2454 = vmax.xlane.f32.xlu0 %v2453_v8  ;;  %v4182_v54 = vpop.f32.mrf.mxu0 }
 0xc3a   :  { %2003 = vmax.xlane.f32.xlu1 %v2002_v33  ;;  %v5753_v51 = vadd.f32 %v2442_v43, %v4954_v27 }
 0xc3b   :  { %v2429_v14 = vpop.f32.mrf.mxu0 }
 0xc3c   :  { %v2443_v56 = vmul.f32 0.35355338, %v2429_v14  ;;  %v2456_v60 = vsel %vm403_vm7, %v5753_v51, -inf }
 0xc3d   :  { %v4183_v12 = vpop.f32.mrf.mxu0 }
 0xc3e   :  { %v5743_v16 = vadd.f32 %v2443_v56, %v4961_v38  ;;  %2224 = vmax.xlane.f32.xlu1 %v2223_v41 }
 0xc3f   :  { %v2434_v30 = vpop.f32.mrf.mxu0 }
 0xc40   :  { %v2459_v28 = vsel %vm403_vm7, %v5743_v16, -inf  ;;  %v2444_v29 = vmul.f32 0.35355338, %v2434_v30 }
 0xc41   :  { %2460 = vmax.xlane.f32.xlu0 %v2459_v28  ;;  %v4186_v48 = vpop.f32.mrf.mxu0 }
 0xc42   :  { %2230 = vmax.xlane.f32.xlu1 %v2229_v31  ;;  %v5758_v39 = vadd.f32 %v2444_v29, %v4968_v45 }
 0xc43   :  { %v2437_v23 = vpop.f32.mrf.mxu0 }
 0xc44   :  { %v2462_v8 = vsel %vm416_vm11, %v5758_v39, -inf }
 0xc45   :  { %v4187_v44 = vpop.f32.mrf.mxu0 }
 0xc46   :  { %2451 = vmax.xlane.f32.xlu1 %v2450_v53  ;;  %v5789_v53 = vpop.permute.xlu0 %2280 }
 0xc47   :  { %v2648_v34 = vpop.f32.mrf.mxu0 }
 0xc48   :  { %v2670_v47 = vmul.f32 0.35355338, %v2648_v34 }
 0xc49   :  { %v4214_v15 = vpop.f32.mrf.mxu0 }
 0xc4a   :  { %v5763_v19 = vadd.f32 %v2670_v47, %v4942_v7  ;;  %2457 = vmax.xlane.f32.xlu1 %v2456_v60 }
 0xc4b   :  { %v2651_v58 = vpop.f32.mrf.mxu0 }
 0xc4c   :  { %v2671_v21 = vmul.f32 0.35355338, %v2651_v58  ;;  %v2680_v5 = vsel %vm403_vm7, %v5763_v19, -inf }
 0xc4d   :  { %2681 = vmax.xlane.f32.xlu0 %v2680_v5  ;;  %v4215_v61 = vpop.f32.mrf.mxu0 }
 0xc4e   :  { %v5770_v25 = vadd.f32 %v2671_v21, %v4947_v17  ;;  %2463 = vmax.xlane.f32.xlu1 %v2462_v8 }
 0xc4f   :  { %v2656_v54 = vpop.f32.mrf.mxu0 }
 0xc50   :  { %v2672_v33 = vmul.f32 0.35355338, %v2656_v54  ;;  %v2683_v7 = vsel %vm403_vm7, %v5770_v25, -inf }
 0xc51   :  { %v4218_v14 = vpop.f32.mrf.mxu0 }
 0xc52   :  { %v5775_v56 = vadd.f32 %v2672_v33, %v4954_v27  ;;  %2684 = vmax.xlane.f32.xlu1 %v2683_v7 }
 0xc53   :  { %v2659_v22 = vpop.f32.mrf.mxu0 }
 0xc54   :  { %v2673_v12 = vmul.f32 0.35355338, %v2659_v22  ;;  %v2686_v41 = vsel %vm403_vm7, %v5775_v56, -inf }
 0xc55   :  { %2687 = vmax.xlane.f32.xlu0 %v2686_v41  ;;  %v4219_v30 = vpop.f32.mrf.mxu0 }
 0xc56   :  { %v5780_v17 = vadd.f32 %v2673_v12, %v4961_v38  ;;  %v5791_v38 = vpop.permute.xlu0 %2278 }
 0xc57   :  { %v2664_v28 = vpop.f32.mrf.mxu0 }
 0xc58   :  { %v2674_v43 = vmul.f32 0.35355338, %v2664_v28  ;;  %v2689_v48 = vsel %vm403_vm7, %v5780_v17, -inf }
 0xc59   :  { %2690 = vmax.xlane.f32.xlu1 %v2689_v48  ;;  %v4222_v31 = vpop.f32.mrf.mxu0 }
 0xc5a   :  { %v5785_v27 = vadd.f32 %v2674_v43, %v4968_v45 }
 0xc5b   :  { %v2667_v23 = vpop.f32.mrf.mxu0 }
 0xc5c   :  { %v2692_v29 = vsel %vm416_vm11, %v5785_v27, -inf }
 0xc5d   :  { %2693 = vmax.xlane.f32.xlu0 %v2692_v29  ;;  %v4223_v44 = vpop.f32.mrf.mxu0 }
 0xc8e   :  { %v1992_v34 = vpop.xlane.xlu1 %1991 }
 0xc8f   :  { %v2005_v47 = vsub.f32 %v5688_v55, %v1992_v34 }
 0xc91   :  { %v2010_v15 = vmul.f32 1.442695, %v2005_v47 }
 0xc92   :  { %v1995_v60 = vpop.xlane.xlu0 %1994  ;;  %v5813_v41 = vpop.permute.xlu1 %2282 }
 0xc93   :  { %4529 = vpow2.f32 %v2010_v15  ;;  %v2006_v58 = vsub.f32 %v5693_v20, %v1995_v60 }
 0xc95   :  { %v2012_v45 = vmul.f32 1.442695, %v2006_v58 }
 0xc96   :  { %v1998_v21 = vpop.xlane.xlu0 %1997 }
 0xc97   :  { %4531 = vpow2.f32 %v2012_v45  ;;  %v2007_v5 = vsub.f32 %v5698_v32, %v1998_v21 }
 0xc99   :  { %v2014_v61 = vmul.f32 1.442695, %v2007_v5 }
 0xc9a   :  { %v2001_v8 = vpop.xlane.xlu0 %2000 }
 0xc9b   :  { %4533 = vpow2.f32 %v2014_v61  ;;  %v2008_v54 = vsub.f32 %v5703_v46, %v2001_v8 }
 0xc9d   :  { %v2016_v33 = vmul.f32 1.442695, %v2008_v54 }
 0xc9f   :  { %4535 = vpow2.f32 %v2016_v33 }
 0xca0   :  { %v5797_v7 = vpop.eup %4529 }
 0xca1   :  { %v2020_v55 = vsel %vm403_vm7, %v5797_v7, 0.0 }
 0xca2   :  { %2021 = vadd.xlane.f32.xlu0 %v2020_v55 }
 0xca4   :  { %v5801_v14 = vpop.eup %4531 }
 0xca5   :  { %v2023_v20 = vsel %vm403_vm7, %v5801_v14, 0.0 }
 0xca6   :  { %2024 = vadd.xlane.f32.xlu1 %v2023_v20  ;;  %v2222_v31 = vpop.xlane.xlu0 %2221 }
 0xca7   :  { %v2235_v29 = vsub.f32 %v5710_v10, %v2222_v31 }
 0xca8   :  { %v5805_v32 = vpop.eup %4533 }
 0xca9   :  { %v2026_v22 = vsel %vm403_vm7, %v5805_v32, 0.0  ;;  %v2240_v47 = vmul.f32 1.442695, %v2235_v29 }
 0xcaa   :  { %2027 = vadd.xlane.f32.xlu0 %v2026_v22 }
 0xcac   :  { %v5809_v46 = vpop.eup %4535 }
 0xcad   :  { %v2029_v12 = vsel %vm403_vm7, %v5809_v46, 0.0 }
 0xcae   :  { %2030 = vadd.xlane.f32.xlu1 %v2029_v12  ;;  %v2228_v34 = vpop.xlane.xlu0 %2227 }
 0xcaf   :  { %v2237_v15 = vsub.f32 %v5715_v50, %v2228_v34 }
 0xcb1   :  { %v2244_v58 = vmul.f32 1.442695, %v2237_v15 }
 0xcb6   :  { %v2234_v45 = vpop.xlane.xlu0 %2233 }
 0xcbf   :  { %2512 = vrot.lane.b32.xlu1 %v5552_v63, %s4655_s23 }
 0xcc0   :  { %2510 = vrot.lane.b32.xlu0 %v5547_v62, %s4655_s23 }
 0xcc2   :  { %v2455_v10 = vpop.xlane.xlu0 %2454 }
 0xcc3   :  { %v2004_v30 = vpop.xlane.xlu1 %2003  ;;  %v2466_v54 = vsub.f32 %v5728_v6, %v2455_v10 }
 0xcc4   :  { %2508 = vrot.lane.b32.xlu0 %v5541_v3, %s4655_s23  ;;  %v2009_v43 = vsub.f32 %v5725_v2, %v2004_v30  ;;  %v2239_v2 = vsub.f32 %v5720_v26, %v2234_v45 }
 0xcc5   :  { %v2472_v55 = vmul.f32 1.442695, %v2466_v54 }
 0xcc6   :  { %v2018_v23 = vmul.f32 1.442695, %v2009_v43  ;;  %v2248_v61 = vmul.f32 1.442695, %v2239_v2 }
 0xcc7   :  { %v2225_v28 = vpop.xlane.xlu1 %2224 }
 0xcc8   :  { %v2236_v48 = vsub.f32 %v5733_v40, %v2225_v28  ;;  %4537 = vpow2.f32 %v2018_v23 }
 0xcca   :  { %v2242_v44 = vmul.f32 1.442695, %v2236_v48  ;;  %v2461_v12 = vpop.xlane.xlu0 %2460 }
 0xccb   :  { %v2231_v60 = vpop.xlane.xlu1 %2230  ;;  %v2468_v30 = vsub.f32 %v5743_v16, %v2461_v12 }
 0xccc   :  { %4539 = vpow2.f32 %v2242_v44  ;;  %v2238_v21 = vsub.f32 %v5738_v57, %v2231_v60 }
 0xccd   :  { %4541 = vpow2.f32 %v2240_v47  ;;  %v2476_v48 = vmul.f32 1.442695, %v2468_v30 }
 0xcce   :  { %4543 = vpow2.f32 %v2244_v58  ;;  %v2246_v5 = vmul.f32 1.442695, %v2238_v21 }
 0xccf   :  { %v5827_v40 = vpop.xlane.xlu1 %2451 }
 0xcd0   :  { %4545 = vpow2.f32 %v2246_v5 }
 0xcd1   :  { %4547 = vpow2.f32 %v2248_v61 }
 0xcd2   :  { %4549 = vpow2.f32 %v2472_v55 }
 0xcd3   :  { %v2458_v33 = vpop.xlane.xlu1 %2457 }
 0xcd4   :  { %v2467_v57 = vsub.f32 %v5753_v51, %v2458_v33 }
 0xcd5   :  { %v5829_v8 = vpop.eup %4537 }
 0xcd6   :  { %v2032_v26 = vsel %vm416_vm11, %v5829_v8, 0.0  ;;  %v2474_v28 = vmul.f32 1.442695, %v2467_v57  ;;  %v2682_v44 = vpop.xlane.xlu0 %2681 }
 0xcd7   :  { %v2464_v6 = vpop.xlane.xlu1 %2463 }
 0xcd8   :  { %4551 = vpow2.f32 %v2474_v28  ;;  %v2469_v31 = vsub.f32 %v5758_v39, %v2464_v6  ;;  %v2695_v6 = vsub.f32 %v5763_v19, %v2682_v44 }
 0xcd9   :  { %v5832_v50 = vpop.eup %4539  ;;  %4553 = vpow2.f32 %v2476_v48 }
 0xcda   :  { %v2253_v20 = vsel %vm403_vm7, %v5832_v50, 0.0  ;;  %v5839_v22 = vpop.eup %4541  ;;  %v2478_v47 = vmul.f32 1.442695, %v2469_v31 }
 0xcdb   :  { %v2250_v43 = vsel %vm403_vm7, %v5839_v22, 0.0  ;;  %v5844_v51 = vpop.eup %4543  ;;  %v2685_v34 = vpop.xlane.xlu1 %2684 }
 0xcdc   :  { %v2256_v23 = vsel %vm403_vm7, %v5844_v51, 0.0  ;;  %v2696_v15 = vsub.f32 %v5770_v25, %v2685_v34  ;;  %4555 = vpow2.f32 %v2478_v47 }
 0xcdd   :  { %v5849_v29 = vpop.eup %4545 }
 0xcde   :  { %v5851_v16 = vpop.eup %4547  ;;  %v2259_v60 = vsel %vm403_vm7, %v5849_v29, 0.0  ;;  %v2688_v58 = vpop.xlane.xlu0 %2687  ;;  %v2702_v39 = vmul.f32 1.442695, %v2696_v15 }
 0xcdf   :  { %v2697_v45 = vsub.f32 %v5775_v56, %v2688_v58  ;;  %v2262_v21 = vsel %vm416_vm11, %v5851_v16, 0.0  ;;  %v5859_v2 = vpop.eup %4549 }
 0xce0   :  { %4557 = vpow2.f32 %v2702_v39  ;;  %v2483_v61 = vsel %vm403_vm7, %v5859_v2, 0.0 }
 0xce1   :  { %v2704_v10 = vmul.f32 1.442695, %v2697_v45 }
 0xce2   :  { %v2691_v5 = vpop.xlane.xlu1 %2690 }
 0xce3   :  { %2033 = vadd.xlane.f32.xlu1 %v2032_v26  ;;  %2254 = vadd.xlane.f32.xlu0 %v2253_v20  ;;  %v2698_v25 = vsub.f32 %v5780_v17, %v2691_v5  ;;  %4559 = vpow2.f32 %v2704_v10  ;;  %v2465_v26 = vsub.f32 %v5748_v52, %v5827_v40  ;;  %v2296_v10 = vsel %vm480_vm4, %v5813_v41, 0 }
 0xce5   :  { %v5864_v54 = vpop.eup %4551  ;;  %v2706_v56 = vmul.f32 1.442695, %v2698_v25  ;;  %v2470_v12 = vmul.f32 1.442695, %v2465_v26 }
 0xce6   :  { %v2486_v33 = vsel %vm403_vm7, %v5864_v54, 0.0  ;;  %v5870_v55 = vpop.eup %4553  ;;  %v2694_v34 = vpop.xlane.xlu0 %2693 }
 0xce7   :  { %2251 = vadd.xlane.f32.xlu1 %v2250_v43  ;;  %4561 = vpow2.f32 %v2706_v56  ;;  %v2489_v17 = vsel %vm403_vm7, %v5870_v55, 0.0  ;;  %v2700_v43 = vmul.f32 1.442695, %v2695_v6  ;;  %v2699_v39 = vsub.f32 %v5785_v27, %v2694_v34 }
 0xce8   :  { %4563 = vpow2.f32 %v2470_v12 }
 0xce9   :  { %v5874_v57 = vpop.eup %4555  ;;  %4565 = vpow2.f32 %v2700_v43  ;;  %v2708_v45 = vmul.f32 1.442695, %v2699_v39 }
 0xceb   :  { %2257 = vadd.xlane.f32.xlu1 %v2256_v23 }
 0xced   :  { %v5880_v20 = vpop.eup %4557 }
 0xcee   :  { %v2713_v30 = vsel %vm403_vm7, %v5880_v20, 0.0 }
 0xcef   :  { %2260 = vadd.xlane.f32.xlu1 %v2259_v60 }
 0xcf0   :  { %v5885_v28 = vpop.eup %4559 }
 0xcf1   :  { %v2716_v52 = vsel %vm403_vm7, %v5885_v28, 0.0 }
 0xcf3   :  { %2263 = vadd.xlane.f32.xlu1 %v2262_v21 }
 0xcf4   :  { %v5889_v40 = vpop.eup %4561 }
 0xcf5   :  { %v2719_v48 = vsel %vm403_vm7, %v5889_v40, 0.0  ;;  %v5893_v19 = vpop.eup %4563 }
 0xcf6   :  { %v2480_v31 = vsel %vm403_vm7, %v5893_v19, 0.0  ;;  %v5897_v23 = vpop.eup %4565 }
 0xcf7   :  { %2484 = vadd.xlane.f32.xlu1 %v2483_v61  ;;  %v2710_v44 = vsel %vm403_vm7, %v5897_v23, 0.0 }
 0xcf9   :  { %2742 = vrot.lane.b32.xlu0 %v5552_v63, %s4656_s24  ;;  %v2492_v63 = vsel %vm416_vm11, %v5874_v57, 0.0 }
 0xcfb   :  { %2487 = vadd.xlane.f32.xlu1 %v2486_v33 }
 0xcff   :  { %2490 = vadd.xlane.f32.xlu1 %v2489_v17 }
 0xd03   :  { %2493 = vadd.xlane.f32.xlu1 %v2492_v63 }
 0xd07   :  { %2714 = vadd.xlane.f32.xlu1 %v2713_v30 }
 0xd0b   :  { %2717 = vadd.xlane.f32.xlu1 %v2716_v52 }
 0xd0f   :  { %2720 = vadd.xlane.f32.xlu1 %v2719_v48 }
 0xd18   :  { %2481 = vadd.xlane.f32.xlu0 %v2480_v31 }
 0xd1c   :  { %2711 = vadd.xlane.f32.xlu0 %v2710_v44 }
 0xd20   :  { %2740 = vrot.lane.b32.xlu1 %v5547_v62, %s4656_s24 }
 0xd24   :  { %2894 = vrot.lane.b32.xlu1 %v5490_v59, %s4657_s26 }
 0xd28   :  { %2892 = vrot.lane.b32.xlu1 %v5497_v11, %s4657_s26 }
 0xd2b   :  { %v2022_v47 = vpop.xlane.xlu0 %2021 }
 0xd2c   :  { %4567 = vrcp.f32 %v2022_v47 }
 0xd2f   :  { %v2025_v15 = vpop.xlane.xlu1 %2024 }
 0xd30   :  { %4569 = vrcp.f32 %v2025_v15 }
 0xd32   :  { %2738 = vrot.lane.b32.xlu0 %v5541_v3, %s4656_s24 }
 0xd33   :  { %v2028_v60 = vpop.xlane.xlu0 %2027 }
 0xd34   :  { %4571 = vrcp.f32 %v2028_v60 }
 0xd37   :  { %v2031_v58 = vpop.xlane.xlu1 %2030 }
 0xd38   :  { %4573 = vrcp.f32 %v2031_v58 }
 0xd39   :  { %v4568_v62 = vpop.eup %4567  ;;  %4575 = vpow2.f32 %v2708_v45 }
 0xd3a   :  { %v2040_v21 = vmul.f32 %v4568_v62, %v5797_v7 }
 0xd3d   :  { %v4570_v59 = vpop.eup %4569 }
 0xd3e   :  { %v2041_v11 = vmul.f32 %v4570_v59, %v5801_v14 }
 0xd40   :  { %v2045_v5 = vpack.c.bf16 %v2041_v11, %v2040_v21 }
 0xd41   :  { %v4572_v3 = vpop.eup %4571 }
 0xd42   :  { %4123 = vmatmul.mubr.msk.bf16.vlgmr.msra.gmra.mxu1 %vm403_vm7, %v2045_v5  ;;  %v2042_v25 = vmul.f32 %v4572_v3, %v5805_v32 }
 0xd43   :  { %4153 = vmatpush3.bf16.msra.mxu1 %v2296_v10  ;;  %4126 = vmatprep.mubr.msk.bf16.mxu1 %vm4644_vm0, %v4643_v0 }
 0xd44   :  { %4154 = vmatprep.subr.bf16.mxu1 %v4643_v0 }
 0xd45   :  { %v4574_v27 = vpop.eup %4573 }
 0xd46   :  { %v2043_v7 = vmul.f32 %v4574_v27, %v5809_v46  ;;  %v5927_v41 = vpop.eup %4575  ;;  %v2511_v46 = vpop.permute.xlu0 %2510 }
 0xd47   :  { %4155 = vmatpush3.bf16.msra.mxu1 %v5789_v53  ;;  %v2722_v32 = vsel %vm416_vm11, %v5927_v41, 0.0  ;;  %v2513_v53 = vpop.permute.xlu1 %2512 }
 0xd48   :  { %4156 = vmatprep.subr.bf16.mxu1 %v4643_v0  ;;  %v2046_v14 = vpack.c.bf16 %v2043_v7, %v2042_v25  ;;  %v2526_v47 = vsel %vm480_vm4, %v2513_v53, 0 }
 0xd4a   :  { %4127 = vmatmul.mubr.msk.bf16.gmra.mxu1 %vm403_vm7, %v2046_v14  ;;  %v2509_v61 = vpop.permute.xlu0 %2508 }
 0xd4b   :  { %4157 = vmatpush3.bf16.msra.mxu1 %v5791_v38  ;;  %4130 = vmatprep.mubr.msk.bf16.mxu1 %vm4644_vm0, %v4643_v0 }
 0xd4c   :  { %4188 = vmatprep.subr.bf16.mxu1 %v4643_v0 }
 0xd51   :  { %2723 = vadd.xlane.f32.xlu0 %v2722_v32 }
 0xd6c   :  { %v2034_v56 = vpop.xlane.xlu1 %2033  ;;  %v2255_v33 = vpop.xlane.xlu0 %2254 }
 0xd6d   :  { %4577 = vrcp.f32 %v2034_v56 }
 0xd70   :  { %v2252_v17 = vpop.xlane.xlu1 %2251  ;;  %v2743_v45 = vpop.permute.xlu0 %2742 }
 0xd71   :  { %4579 = vrcp.f32 %v2252_v17 }
 0xd72   :  { %4581 = vrcp.f32 %v2255_v33 }
 0xd74   :  { %v2258_v38 = vpop.xlane.xlu1 %2257 }
 0xd78   :  { %v2261_v26 = vpop.xlane.xlu1 %2260 }
 0xd79   :  { %4583 = vrcp.f32 %v2261_v26 }
 0xd7a   :  { %v4578_v63 = vpop.eup %4577  ;;  %4585 = vrcp.f32 %v2258_v38 }
 0xd7b   :  { %v2044_v12 = vmul.f32 %v4578_v63, %v5829_v8 }
 0xd7c   :  { %v2264_v43 = vpop.xlane.xlu1 %2263 }
 0xd7d   :  { %v2047_v6 = vpack.c.bf16 %v2044_v12, %v2044_v12  ;;  %4587 = vrcp.f32 %v2264_v43 }
 0xd7e   :  { %v4580_v30 = vpop.eup %4579 }
 0xd7f   :  { %4131 = vmatmul.mubr.msk.bf16.gmra.mxu1 %vm403_vm7, %v2047_v6  ;;  %v4582_v52 = vpop.eup %4581  ;;  %v2270_v48 = vmul.f32 %v4580_v30, %v5839_v22 }
 0xd80   :  { %4158 = vmatprep.mubr.msk.bf16.mxu1 %vm4644_vm0, %v4643_v0  ;;  %v2271_v31 = vmul.f32 %v4582_v52, %v5832_v50  ;;  %v2485_v58 = vpop.xlane.xlu1 %2484 }
 0xd81   :  { %4589 = vrcp.f32 %v2485_v58 }
 0xd82   :  { %v2275_v44 = vpack.c.bf16 %v2271_v31, %v2270_v48 }
 0xd84   :  { %v2488_v62 = vpop.xlane.xlu1 %2487 }
 0xd86   :  { %v4584_v34 = vpop.eup %4583 }
 0xd87   :  { %4159 = vmatmul.mubr.msk.bf16.vlgmr.msra.gmra.mxu1 %vm403_vm7, %v2275_v44  ;;  %v4586_v8 = vpop.eup %4585  ;;  %v2273_v15 = vmul.f32 %v4584_v34, %v5849_v29 }
 0xd88   :  { %4189 = vmatpush3.bf16.msra.mxu1 %v2526_v47  ;;  %4162 = vmatprep.mubr.msk.bf16.mxu1 %vm4644_vm0, %v4643_v0  ;;  %v2272_v22 = vmul.f32 %v4586_v8, %v5844_v51  ;;  %v2491_v51 = vpop.xlane.xlu1 %2490 }
 0xd89   :  { %4190 = vmatprep.subr.bf16.mxu1 %v4643_v0 }
 0xd8a   :  { %v2276_v50 = vpack.c.bf16 %v2273_v15, %v2272_v22  ;;  %v4588_v60 = vpop.eup %4587 }
 0xd8b   :  { %v2274_v39 = vmul.f32 %v4588_v60, %v5851_v16 }
 0xd8c   :  { %4191 = vmatpush3.bf16.msra.mxu1 %v2511_v46  ;;  %v2494_v59 = vpop.xlane.xlu1 %2493  ;;  %v2756_v46 = vsel %vm480_vm4, %v2743_v45, 0 }
 0xd8d   :  { %4192 = vmatprep.subr.bf16.mxu1 %v4643_v0  ;;  %v2277_v29 = vpack.c.bf16 %v2274_v39, %v2274_v39 }
 0xd8e   :  { %v4590_v16 = vpop.eup %4589 }
 0xd8f   :  { %4163 = vmatmul.mubr.msk.bf16.gmra.mxu1 %vm403_vm7, %v2276_v50  ;;  %v2501_v3 = vmul.f32 %v4590_v16, %v5859_v2 }
 0xd90   :  { %4193 = vmatpush3.bf16.msra.mxu1 %v2509_v61  ;;  %4166 = vmatprep.mubr.msk.bf16.mxu1 %vm4644_vm0, %v4643_v0  ;;  %v2715_v11 = vpop.xlane.xlu1 %2714 }
 0xd91   :  { %4224 = vmatprep.subr.bf16.mxu1 %v4643_v0 }
 0xd94   :  { %v2718_v5 = vpop.xlane.xlu1 %2717 }
 0xd97   :  { %4167 = vmatmul.mubr.msk.bf16.gmra.mxu1 %vm403_vm7, %v2277_v29 }
 0xd98   :  { %4194 = vmatprep.mubr.msk.bf16.mxu1 %vm4644_vm0, %v4643_v0  ;;  %v2721_v25 = vpop.xlane.xlu1 %2720 }
 0xda1   :  { %v2482_v21 = vpop.xlane.xlu0 %2481 }
 0xda2   :  { %4591 = vrcp.f32 %v2482_v21 }
 0xda3   :  { %4593 = vrcp.f32 %v2491_v51 }
 0xda4   :  { %4595 = vrcp.f32 %v2488_v62 }
 0xda5   :  { %4597 = vrcp.f32 %v2494_v59  ;;  %v2712_v32 = vpop.xlane.xlu0 %2711 }
 0xda6   :  { %4599 = vrcp.f32 %v2712_v32 }
 0xda7   :  { %4601 = vrcp.f32 %v2715_v11 }
 0xda8   :  { %4603 = vrcp.f32 %v2721_v25 }
 0xda9   :  { %v2739_v17 = vpop.permute.xlu0 %2738  ;;  %4605 = vrcp.f32 %v2718_v5 }
 0xdaf   :  { %v4592_v10 = vpop.eup %4591 }
 0xdb0   :  { %v2500_v27 = vmul.f32 %v4592_v10, %v5893_v19  ;;  %v4594_v14 = vpop.eup %4593  ;;  %v2741_v19 = vpop.permute.xlu1 %2740 }
 0xdb1   :  { %v4596_v53 = vpop.eup %4595  ;;  %v2503_v2 = vmul.f32 %v4594_v14, %v5870_v55 }
 0xdb2   :  { %v2505_v7 = vpack.c.bf16 %v2501_v3, %v2500_v27  ;;  %v2502_v61 = vmul.f32 %v4596_v53, %v5864_v54  ;;  %v4598_v33 = vpop.eup %4597 }
 0xdb3   :  { %v2504_v38 = vmul.f32 %v4598_v33, %v5874_v57  ;;  %v4600_v54 = vpop.eup %4599 }
 0xdb4   :  { %4195 = vmatmul.mubr.msk.bf16.vlgmr.msra.gmra.mxu1 %vm403_vm7, %v2505_v7  ;;  %v2506_v56 = vpack.c.bf16 %v2503_v2, %v2502_v61  ;;  %v4602_v26 = vpop.eup %4601  ;;  %v2730_v63 = vmul.f32 %v4600_v54, %v5897_v23  ;;  %v2895_v60 = vpop.permute.xlu1 %2894 }
 0xdb5   :  { %4225 = vmatpush3.bf16.msra.mxu1 %v2756_v46  ;;  %4198 = vmatprep.mubr.msk.bf16.mxu1 %vm4644_vm0, %v4643_v0  ;;  %v2507_v55 = vpack.c.bf16 %v2504_v38, %v2504_v38  ;;  %v2731_v12 = vmul.f32 %v4602_v26, %v5880_v20  ;;  %v4604_v30 = vpop.eup %4603 }
 0xdb6   :  { %4226 = vmatprep.subr.bf16.mxu1 %v4643_v0  ;;  %v4606_v57 = vpop.eup %4605  ;;  %v2733_v43 = vmul.f32 %v4604_v30, %v5889_v40  ;;  %4243 = vmatpush3.bf16.msra.mxu0 %v2895_v60 }
 0xdb7   :  { %v2735_v6 = vpack.c.bf16 %v2731_v12, %v2730_v63  ;;  %v2732_v52 = vmul.f32 %v4606_v57, %v5885_v28  ;;  %4244 = vmatprep.subr.bf16.mxu0 %v4643_v0 }
 0xdb9   :  { %4227 = vmatpush3.bf16.msra.mxu1 %v2741_v19  ;;  %v2736_v48 = vpack.c.bf16 %v2733_v43, %v2732_v52 }
 0xdba   :  { %4228 = vmatprep.subr.bf16.mxu1 %v4643_v0 }
 0xdbc   :  { %4199 = vmatmul.mubr.msk.bf16.gmra.mxu1 %vm403_vm7, %v2506_v56 }
 0xdbd   :  { %4229 = vmatpush3.bf16.msra.mxu1 %v2739_v17  ;;  %4202 = vmatprep.mubr.msk.bf16.mxu1 %vm4644_vm0, %v4643_v0 }
 0xdbe   :  { %4258 = vmatprep.subr.bf16.mxu1 %v4643_v0 }
 0xdc4   :  { %4203 = vmatmul.mubr.msk.bf16.gmra.mxu1 %vm403_vm7, %v2507_v55 }
 0xdc5   :  { %4230 = vmatprep.mubr.msk.bf16.mxu1 %vm4644_vm0, %v4643_v0 }
 0xdcc   :  { %4231 = vmatmul.mubr.msk.bf16.vlgmr.msra.gmra.mxu1 %vm403_vm7, %v2735_v6 }
 0xdcd   :  { %4234 = vmatprep.mubr.msk.bf16.mxu1 %vm4644_vm0, %v4643_v0 }
 0xdd4   :  { %4235 = vmatmul.mubr.msk.bf16.gmra.mxu1 %vm403_vm7, %v2736_v48 }
 0xdd5   :  { %4238 = vmatprep.mubr.msk.bf16.mxu1 %vm4644_vm0, %v4643_v0 }
 0xdda   :  { %v2724_v23 = vpop.xlane.xlu0 %2723 }
 0xddb   :  { %4607 = vrcp.f32 %v2724_v23 }
 0xde8   :  { %v4608_v20 = vpop.eup %4607 }
 0xde9   :  { %v2734_v31 = vmul.f32 %v4608_v20, %v5927_v41  ;;  %v2893_v41 = vpop.permute.xlu1 %2892 }
 0xdea   :  { %4245 = vmatpush3.bf16.msra.mxu0 %v2893_v41 }
 0xdeb   :  { %v2737_v44 = vpack.c.bf16 %v2734_v31, %v2734_v31  ;;  %4274 = vmatprep.subr.bf16.mxu0 %v4643_v0 }
 0xded   :  { %4239 = vmatmul.mubr.msk.bf16.gmra.mxu1 %vm403_vm7, %v2737_v44 }
 0xdee   :  { %4262 = vmatprep.mubr.msk.bf16.mxu1 %vm4644_vm0, %v4643_v0 }
 0xe02   :  { %v5985_v40 = vpop.f32.mrf.mxu1 }
 0xe04   :  { %v4124_v28 = vpop.f32.mrf.mxu1 }
 0xe06   :  { %v5987_v34 = vpop.f32.mrf.mxu1 }
 0xe08   :  { %v4125_v47 = vpop.f32.mrf.mxu1 }
 0xe0a   :  { %v5989_v8 = vpop.f32.mrf.mxu1 }
 0xe0c   :  { %v4128_v15 = vpop.f32.mrf.mxu1 }
 0xe0e   :  { %v5991_v22 = vpop.f32.mrf.mxu1 }
 0xe10   :  { %v4129_v50 = vpop.f32.mrf.mxu1 }
 0xe3f   :  { %v5995_v58 = vpop.f32.mrf.mxu1 }
 0xe41   :  { %v4132_v39 = vpop.f32.mrf.mxu1 }
 0xe43   :  { %v2121_v62 = vpop.f32.mrf.mxu1 }
 0xe45   :  { %v4133_v29 = vpop.f32.mrf.mxu1 }
 0xe47   :  { %v2332_v51 = vpop.f32.mrf.mxu1 }
 0xe49   :  { %v4160_v45 = vpop.f32.mrf.mxu1 }
 0xe4b   :  { %v2335_v59 = vpop.f32.mrf.mxu1 }
 0xe4c   :  { %v4366_v21 = vpack.i.bf16 %v2335_v59, %v2332_v51 }
 0xe4d   :  { %v4161_v11 = vpop.f32.mrf.mxu1 }
 0xe4e   :  { %4367 = vrot.lane.b32.xlu1 %v4366_v21, %s4658_s29 }
 0xe4f   :  { %v2340_v5 = vpop.f32.mrf.mxu1 }
 0xe51   :  { %v4164_v16 = vpop.f32.mrf.mxu1 }
 0xe53   :  { %v2343_v10 = vpop.f32.mrf.mxu1 }
 0xe54   :  { %v4371_v3 = vpack.i.bf16 %v2343_v10, %v2340_v5 }
 0xe55   :  { %v4165_v27 = vpop.f32.mrf.mxu1 }
 0xe56   :  { %4372 = vrot.lane.b32.xlu0 %v4371_v3, %s4658_s29 }
 0xe57   :  { %v2348_v25 = vpop.f32.mrf.mxu1 }
 0xe59   :  { %v4168_v7 = vpop.f32.mrf.mxu1 }
 0xe5b   :  { %v2351_v14 = vpop.f32.mrf.mxu1 }
 0xe5d   :  { %v4169_v32 = vpop.f32.mrf.mxu1 }
 0xe74   :  { %v2562_v46 = vpop.f32.mrf.mxu1 }
 0xe76   :  { %v4196_v53 = vpop.f32.mrf.mxu1 }
 0xe78   :  { %v2565_v2 = vpop.f32.mrf.mxu1 }
 0xe79   :  { %v4376_v19 = vpack.i.bf16 %v2565_v2, %v2562_v46 }
 0xe7a   :  { %v4197_v61 = vpop.f32.mrf.mxu1 }
 0xe7b   :  { %4377 = vrot.lane.b32.xlu1 %v4376_v19, %s4659_s30 }
 0xe7c   :  { %v2570_v56 = vpop.f32.mrf.mxu1 }
 0xe7e   :  { %v4200_v33 = vpop.f32.mrf.mxu1 }
 0xe80   :  { %v2573_v17 = vpop.f32.mrf.mxu1 }
 0xe81   :  { %v4386_v48 = vpack.i.bf16 %v2573_v17, %v2570_v56 }
 0xe82   :  { %v4201_v38 = vpop.f32.mrf.mxu1 }
 0xe84   :  { %v2578_v55 = vpop.f32.mrf.mxu1 }
 0xe86   :  { %v4204_v54 = vpop.f32.mrf.mxu1 }
 0xe88   :  { %v2581_v26 = vpop.f32.mrf.mxu1 }
 0xe8a   :  { %v4205_v63 = vpop.f32.mrf.mxu1 }
 0xe8c   :  { %v2792_v12 = vpop.f32.mrf.mxu1 }
 0xe8e   :  { %v4232_v6 = vpop.f32.mrf.mxu1 }
 0xe90   :  { %v2795_v30 = vpop.f32.mrf.mxu1 }
 0xe91   :  { %v4381_v57 = vpack.i.bf16 %v2795_v30, %v2792_v12 }
 0xe92   :  { %v4233_v43 = vpop.f32.mrf.mxu1 }
 0xe93   :  { %4382 = vrot.lane.b32.xlu1 %v4381_v57, %s4660_s10 }
 0xe94   :  { %v2800_v52 = vpop.f32.mrf.mxu1 }
 0xe96   :  { %v4236_v23 = vpop.f32.mrf.mxu1 }
 0xe97   :  { %4387 = vrot.lane.b32.xlu1 %v4386_v48, %s4659_s30 }
 0xe98   :  { %v2803_v20 = vpop.f32.mrf.mxu1 }
 0xe99   :  { %v4391_v31 = vpack.i.bf16 %v2803_v20, %v2800_v52 }
 0xe9a   :  { %v4237_v44 = vpop.f32.mrf.mxu1 }
 0xe9b   :  { %4392 = vrot.lane.b32.xlu1 %v4391_v31, %s4660_s10 }
 0xe9f   :  { %2827 = vrot.lane.b32.xlu1 %v2348_v25, %s4658_s29 }
 0xea3   :  { %2847 = vrot.lane.b32.xlu1 %v2578_v55, %s4659_s30 }
 0xead   :  { %v2808_v28 = vpop.f32.mrf.mxu1 }
 0xeae   :  { %2867 = vrot.lane.b32.xlu1 %v2808_v28, %s4660_s10 }
 0xeaf   :  { %v4240_v47 = vpop.f32.mrf.mxu1 }
 0xeb1   :  { %v2811_v15 = vpop.f32.mrf.mxu1 }
 0xeb2   :  { %2899 = vrot.lane.b32.xlu1 %v5537_v35, %s4657_s26 }
 0xeb3   :  { %v4241_v50 = vpop.f32.mrf.mxu1 }
 0xec0   :  { %v4368_v60 = vpop.permute.xlu1 %4367 }
 0xec1   :  { %v4370_v39 = vunpack.i.h.bf16 %v4368_v60  ;;  %v4369_v62 = vunpack.i.l.bf16 %v4368_v60 }
 0xec3   :  { %v2875_v59 = vsel %vm318_vm3, %v5987_v34, %v4370_v39  ;;  %v2874_v21 = vsel %vm318_vm3, %v5985_v40, %v4369_v62 }
 0xec8   :  { %v4373_v16 = vpop.permute.xlu0 %4372 }
 0xec9   :  { %v4375_v14 = vunpack.i.h.bf16 %v4373_v16  ;;  %v4374_v32 = vunpack.i.l.bf16 %v4373_v16 }
 0xecb   :  { %v2877_v53 = vsel %vm318_vm3, %v5991_v22, %v4375_v14  ;;  %v2876_v2 = vsel %vm318_vm3, %v5989_v8, %v4374_v32 }
 0xeed   :  { %v4378_v41 = vpop.permute.xlu1 %4377 }
 0xeee   :  { %v4380_v29 = vunpack.i.h.bf16 %v4378_v41  ;;  %v4379_v51 = vunpack.i.l.bf16 %v4378_v41 }
 0xef0   :  { %v2880_v10 = vsel %vm1295_vm12, %v2875_v59, %v4380_v29  ;;  %v2879_v35 = vsel %vm1295_vm12, %v2874_v21, %v4379_v51 }
 0xf05   :  { %v4383_v45 = vpop.permute.xlu1 %4382 }
 0xf06   :  { %v4385_v11 = vunpack.i.h.bf16 %v4383_v45  ;;  %v4384_v5 = vunpack.i.l.bf16 %v4383_v45 }
 0xf08   :  { %v2885_v3 = vsel %vm1301_vm13, %v2880_v10, %v4385_v11  ;;  %v2884_v27 = vsel %vm1301_vm13, %v2879_v35, %v4384_v5 }
 0xf09   :  { %v2889_v25 = vpack.c.bf16 %v2885_v3, %v2884_v27  ;;  %v4388_v7 = vpop.permute.xlu1 %4387 }
 0xf0a   :  { %v4390_v46 = vunpack.i.h.bf16 %v4388_v7  ;;  %v4389_v34 = vunpack.i.l.bf16 %v4388_v7 }
 0xf0b   :  { %4247 = vmatmul.mubr.msk.bf16.vlgmr.msra.gmra.mxu0 %vm240_vm2, %v2889_v25 }
 0xf0c   :  { %4250 = vmatprep.mubr.msk.bf16.mxu0 %vm4644_vm0, %v4643_v0  ;;  %v2881_v56 = vsel %vm1295_vm12, %v2876_v2, %v4389_v34  ;;  %v2882_v33 = vsel %vm1295_vm12, %v2877_v53, %v4390_v46  ;;  %v4417_v46 = vld [vmem:[%s6313_s4 + $0x18] sm:$0xff]   ;;  %v6087_v34 = vld [vmem:[%s6312_s6 + $0x4] sm:$0xf]  ;;  %v4420_v2 = vld [vmem:[%s6314_s5 + $0x70] sm:$0xff]  }
 0xf0d   :  { %v4393_v40 = vpop.permute.xlu1 %4392  ;;  %4259 = vmatpush3.bf16.msra.mxu1 %v4417_v46  ;;  %v4419_v53 = vld [vmem:[%s6314_s5 + $0x78] sm:$0xff]  }
 0xf0e   :  { %v4395_v19 = vunpack.i.h.bf16 %v4393_v40  ;;  %v4394_v61 = vunpack.i.l.bf16 %v4393_v40  ;;  %4260 = vmatprep.subr.bf16.mxu1 %v4643_v0  ;;  %v6092_v40 = vrot.slane %v6087_v34, %v1469_v49  ;;  %4275 = vmatpush3.bf16.msra.mxu0 %v4419_v53  ;;  %v4421_v49 = vld [vmem:[%s6314_s5 + $0x68] sm:$0xff]  }
 0xf0f   :  { %4276 = vmatprep.subr.bf16.mxu0 %v4643_v0 }
 0xf10   :  { %v2886_v17 = vsel %vm1301_vm13, %v2881_v56, %v4394_v61  ;;  %v2887_v38 = vsel %vm1301_vm13, %v2882_v33, %v4395_v19  ;;  %v4422_v19 = vld [vmem:[%s6314_s5 + $0x60] sm:$0xff]   ;;  %v4423_v61 = vld [vmem:[%s6314_s5 + $0x58] sm:$0xff]  }
 0xf11   :  { %v2890_v55 = vpack.c.bf16 %v2887_v38, %v2886_v17  ;;  %v2828_v22 = vpop.permute.xlu1 %2827 }
 0xf12   :  { %v2878_v8 = vsel %vm318_vm3, %v5995_v58, %v2828_v22  ;;  %4277 = vmatpush3.bf16.msra.mxu0 %v4420_v2 }
 0xf13   :  { %4251 = vmatmul.mubr.msk.bf16.gmra.mxu0 %vm240_vm2, %v2890_v55  ;;  %4278 = vmatprep.subr.bf16.mxu0 %v4643_v0 }
 0xf14   :  { %4254 = vmatprep.mubr.msk.bf16.mxu0 %vm4644_vm0, %v4643_v0 }
 0xf15   :  { %v2848_v54 = vpop.permute.xlu1 %2847 }
 0xf16   :  { %v2883_v26 = vsel %vm1295_vm12, %v2878_v8, %v2848_v54  ;;  %4279 = vmatpush3.bf16.msra.mxu0 %v4421_v49 }
 0xf17   :  { %4280 = vmatprep.subr.bf16.mxu0 %v4643_v0 }
 0xf1a   :  { %4281 = vmatpush3.bf16.msra.mxu0 %v4422_v19 }
 0xf1b   :  { %4282 = vmatprep.subr.bf16.mxu0 %v4643_v0 }
 0xf1e   :  { %4283 = vmatpush3.bf16.msra.mxu0 %v4423_v61 }
 0xf1f   :  { %4284 = vmatprep.subr.bf16.mxu0 %v4643_v0 }
 0xf20   :  { %v2868_v63 = vpop.permute.xlu1 %2867 }
 0xf21   :  { %v2888_v12 = vsel %vm1301_vm13, %v2883_v26, %v2868_v63 }
 0xf22   :  { %v2891_v6 = vpack.c.bf16 %v2888_v12, %v2888_v12 }
 0xf24   :  { %4255 = vmatmul.mubr.msk.bf16.gmra.mxu0 %vm240_vm2, %v2891_v6  ;;  %v2900_v30 = vpop.permute.xlu1 %2899 }
 0xf25   :  { %4290 = vmatprep.mubr.msk.bf16.mxu0 %vm4644_vm0, %v4643_v0 }
 0xfcb   :  { %v2945_v57 = vpop.f32.mrf.mxu0 }
 0xfcc   :  { %v2946_v43 = vadd.f32 %v2945_v57, %v2900_v30 }
 0xfcd   :  { %v4248_v52 = vpop.f32.mrf.mxu0 }
 0xfce   :  { %v6038_v48 = vadd.f32 %v2946_v43, %v5506_v24 }
 0xfcf   :  { %v2948_v23 = vpop.f32.mrf.mxu0 }
 0xfd0   :  { %v2949_v58 = vadd.f32 %v2948_v23, %v2900_v30  ;;  %v2972_v20 = vsel %vm240_vm2, %v6038_v48, 0.0  ;;  %v2992_v31 = vmul.f32 %v6038_v48, %v6038_v48 }
 0xfd1   :  { %2973 = vadd.xlane.f32.xlu0 %v2972_v20  ;;  %v4249_v44 = vpop.f32.mrf.mxu0 }
 0xfd2   :  { %v6045_v28 = vadd.f32 %v2949_v58, %v5508_v13  ;;  %v2997_v50 = vsel %vm240_vm2, %v2992_v31, 0.0 }
 0xfd3   :  { %v2953_v47 = vpop.f32.mrf.mxu0 }
 0xfd4   :  { %v2954_v15 = vadd.f32 %v2953_v47, %v2900_v30  ;;  %v2975_v24 = vsel %vm240_vm2, %v6045_v28, 0.0  ;;  %v2993_v60 = vmul.f32 %v6045_v28, %v6045_v28 }
 0xfd5   :  { %2998 = vadd.xlane.f32.xlu0 %v2997_v50  ;;  %2976 = vadd.xlane.f32.xlu1 %v2975_v24  ;;  %v4252_v41 = vpop.f32.mrf.mxu0 }
 0xfd6   :  { %v6053_v39 = vadd.f32 %v2954_v15, %v5516_v18  ;;  %v3000_v13 = vsel %vm240_vm2, %v2993_v60, 0.0 }
 0xfd7   :  { %v2956_v62 = vpop.f32.mrf.mxu0 }
 0xfd8   :  { %v2957_v29 = vadd.f32 %v2956_v62, %v2900_v30  ;;  %v2978_v51 = vsel %vm240_vm2, %v6053_v39, 0.0  ;;  %v2994_v45 = vmul.f32 %v6053_v39, %v6053_v39 }
 0xfd9   :  { %3001 = vadd.xlane.f32.xlu0 %v3000_v13  ;;  %2979 = vadd.xlane.f32.xlu1 %v2978_v51  ;;  %v4253_v59 = vpop.f32.mrf.mxu0 }
 0xfda   :  { %v6061_v21 = vadd.f32 %v2957_v29, %v5518_v42  ;;  %v3003_v11 = vsel %vm240_vm2, %v2994_v45, 0.0 }
 0xfdc   :  { %v2981_v18 = vsel %vm240_vm2, %v6061_v21, 0.0  ;;  %v2995_v5 = vmul.f32 %v6061_v21, %v6061_v21 }
 0xfdd   :  { %3004 = vadd.xlane.f32.xlu1 %v3003_v11  ;;  %2982 = vadd.xlane.f32.xlu0 %v2981_v18 }
 0xfde   :  { %v3006_v16 = vsel %vm240_vm2, %v2995_v5, 0.0 }
 0xfe1   :  { %3007 = vadd.xlane.f32.xlu0 %v3006_v16 }
 0xfe4   :  { %v2961_v10 = vpop.f32.mrf.mxu0 }
 0xfe5   :  { %v2962_v35 = vadd.f32 %v2961_v10, %v2900_v30 }
 0xfe6   :  { %v4256_v3 = vpop.f32.mrf.mxu0 }
 0xfe7   :  { %v6070_v27 = vadd.f32 %v2962_v35, %v5526_v9  ;;  %v4418_v9 = vld [vmem:[%s6313_s4 + $0x10] sm:$0xff]  }
 0xfe8   :  { %v2964_v42 = vpop.f32.mrf.mxu0  ;;  %4261 = vmatpush3.bf16.msra.mxu1 %v4418_v9 }
 0xfe9   :  { %v2984_v25 = vsel %vm1402_vm14, %v6070_v27, 0.0  ;;  %v2996_v7 = vmul.f32 %v6070_v27, %v6070_v27  ;;  %4302 = vmatprep.subr.bf16.mxu1 %v4643_v0 }
 0xfea   :  { %2985 = vadd.xlane.f32.xlu1 %v2984_v25  ;;  %v4257_v14 = vpop.f32.mrf.mxu0 }
 0xfeb   :  { %v3009_v32 = vsel %vm1402_vm14, %v2996_v7, 0.0 }
 0xfec   :  { %3010 = vadd.xlane.f32.xlu0 %v3009_v32 }
 0xffb   :  { %3057 = vrot.lane.b32.xlu1 %v6092_v40, %s4645_s15 }
0x105a   :  { %v2974_v56 = vpop.xlane.xlu0 %2973 }
0x105b   :  { %v2987_v33 = vmul.f32 0.03125, %v2974_v56 }
0x105d   :  { %v3022_v55 = vmul.f32 %v2987_v33, %v2987_v33  ;;  %v3017_v29 = vsub.f32 %v6038_v48, %v2987_v33 }
0x105e   :  { %v2999_v17 = vpop.xlane.xlu0 %2998  ;;  %v2977_v38 = vpop.xlane.xlu1 %2976 }
0x105f   :  { %v3012_v22 = vmul.f32 0.03125, %v2999_v17  ;;  %v2988_v54 = vmul.f32 0.03125, %v2977_v38 }
0x1061   :  { %v3027_v8 = vsub.f32 %v3012_v22, %v3022_v55  ;;  %v3023_v6 = vmul.f32 %v2988_v54, %v2988_v54  ;;  %v3018_v11 = vsub.f32 %v6045_v28, %v2988_v54 }
0x1062   :  { %v3002_v26 = vpop.xlane.xlu0 %3001  ;;  %v2980_v63 = vpop.xlane.xlu1 %2979 }
0x1063   :  { %v3032_v12 = vadd.f32 1e-05, %v3027_v8  ;;  %v3013_v30 = vmul.f32 0.03125, %v3002_v26  ;;  %v2989_v57 = vmul.f32 0.03125, %v2980_v63  ;;  %v4425_v26 = vld [vmem:[%s6314_s5 + $0x48] sm:$0xff]   ;;  %v4426_v63 = vld [vmem:[%s6314_s5 + $0x40] sm:$0xff]  }
0x1065   :  { %4609 = vrsqrt.f32 %v3032_v12  ;;  %v3028_v43 = vsub.f32 %v3013_v30, %v3023_v6  ;;  %v3024_v20 = vmul.f32 %v2989_v57, %v2989_v57  ;;  %v3019_v7 = vsub.f32 %v6053_v39, %v2989_v57 }
0x1066   :  { %v3005_v52 = vpop.xlane.xlu1 %3004  ;;  %v2983_v23 = vpop.xlane.xlu0 %2982  ;;  %v3071_v12 = vrot.slane %v6087_v34, %v5431_v1 }
0x1067   :  { %v3033_v58 = vadd.f32 1e-05, %v3028_v43  ;;  %v3014_v31 = vmul.f32 0.03125, %v3005_v52  ;;  %v2990_v44 = vmul.f32 0.03125, %v2983_v23 }
0x1069   :  { %4611 = vrsqrt.f32 %v3033_v58  ;;  %v3029_v47 = vsub.f32 %v3014_v31, %v3024_v20  ;;  %v3025_v24 = vmul.f32 %v2990_v44, %v2990_v44  ;;  %v3020_v28 = vsub.f32 %v6061_v21, %v2990_v44 }
0x106a   :  { %v3008_v15 = vpop.xlane.xlu0 %3007 }
0x106b   :  { %v3034_v50 = vadd.f32 1e-05, %v3029_v47  ;;  %v3015_v60 = vmul.f32 0.03125, %v3008_v15 }
0x106d   :  { %4613 = vrsqrt.f32 %v3034_v50  ;;  %v3030_v41 = vsub.f32 %v3015_v60, %v3025_v24 }
0x106f   :  { %v3035_v62 = vadd.f32 1e-05, %v3030_v41 }
0x1071   :  { %4615 = vrsqrt.f32 %v3035_v62 }
0x1072   :  { %v4610_v13 = vpop.eup %4609 }
0x1073   :  { %v2986_v51 = vpop.xlane.xlu1 %2985  ;;  %v3042_v45 = vmul.f32 %v4610_v13, %v3017_v29 }
0x1074   :  { %v2991_v59 = vmul.f32 0.03125, %v2986_v51 }
0x1075   :  { %v3011_v18 = vpop.xlane.xlu0 %3010  ;;  %v3051_v3 = vmul.f32 %v6092_v40, %v3042_v45 }
0x1076   :  { %v4612_v5 = vpop.eup %4611  ;;  %v3026_v16 = vmul.f32 %v2991_v59, %v2991_v59  ;;  %v3016_v10 = vmul.f32 0.03125, %v3011_v18  ;;  %v3021_v17 = vsub.f32 %v6070_v27, %v2991_v59  ;;  %v4424_v27 = vld [vmem:[%s6314_s5 + $0x50] sm:$0xff]  }
0x1077   :  { %v3043_v35 = vmul.f32 %v4612_v5, %v3018_v11  ;;  %v3058_v25 = vpop.permute.xlu1 %3057  ;;  %4285 = vmatpush3.bf16.msra.mxu0 %v4424_v27 }
0x1078   :  { %v3031_v42 = vsub.f32 %v3016_v10, %v3026_v16  ;;  %v6122_v9 = vadd.f32 %v3058_v25, %v3051_v3  ;;  %4286 = vmatprep.subr.bf16.mxu0 %v4643_v0  ;;  %v3160_v16 = vrot.slane %v6087_v34, %v1579_v4 }
0x1079   :  { %v3052_v48 = vmul.f32 %v6092_v40, %v3043_v35 }
0x107a   :  { %v4614_v14 = vpop.eup %4613  ;;  %v3036_v32 = vadd.f32 1e-05, %v3031_v42 }
0x107b   :  { %v3044_v46 = vmul.f32 %v4614_v14, %v3019_v7  ;;  %v6124_v53 = vadd.f32 %v3058_v25, %v3052_v48  ;;  %4287 = vmatpush3.bf16.msra.mxu0 %v4425_v26 }
0x107c   :  { %4617 = vrsqrt.f32 %v3036_v32  ;;  %4288 = vmatprep.subr.bf16.mxu0 %v4643_v0 }
0x107d   :  { %v3065_v2 = vpack.c.bf16 %v6124_v53, %v6122_v9  ;;  %v3053_v61 = vmul.f32 %v6092_v40, %v3044_v46 }
0x107e   :  { %v4616_v49 = vpop.eup %4615 }
0x107f   :  { %v3045_v19 = vmul.f32 %v4616_v49, %v3020_v28  ;;  %4263 = vmatmul.mubr.msk.bf16.vlgmr.msra.gmra.mxu1 %vm240_vm2, %v3065_v2  ;;  %v6134_v56 = vadd.f32 %v3058_v25, %v3053_v61  ;;  %4289 = vmatpush3.bf16.msra.mxu0 %v4426_v63 }
0x1080   :  { %4266 = vmatprep.mubr.msk.bf16.mxu1 %vm4644_vm0, %v4643_v0 }
0x1081   :  { %v3054_v39 = vmul.f32 %v6092_v40, %v3045_v19 }
0x1083   :  { %v6136_v33 = vadd.f32 %v3058_v25, %v3054_v39 }
0x1085   :  { %v3066_v21 = vpack.c.bf16 %v6136_v33, %v6134_v56 }
0x1087   :  { %4267 = vmatmul.mubr.msk.bf16.gmra.mxu1 %vm240_vm2, %v3066_v21 }
0x1088   :  { %4270 = vmatprep.mubr.msk.bf16.mxu1 %vm4644_vm0, %v4643_v0 }
0x1089   :  { %v4618_v38 = vpop.eup %4617 }
0x108a   :  { %v3046_v55 = vmul.f32 %v4618_v38, %v3021_v17 }
0x108c   :  { %v3055_v22 = vmul.f32 %v6092_v40, %v3046_v55 }
0x108e   :  { %v6145_v54 = vadd.f32 %v3058_v25, %v3055_v22 }
0x1090   :  { %v3067_v8 = vpack.c.bf16 %v6145_v54, %v6145_v54 }
0x1092   :  { %4271 = vmatmul.mubr.msk.bf16.gmra.mxu1 %vm240_vm2, %v3067_v8 }
0x1093   :  { %4306 = vmatprep.mubr.msk.bf16.mxu1 %vm4644_vm0, %v4643_v0 }
0x113f   :  { %v3127_v6 = vpop.f32.mrf.mxu1 }
0x1140   :  { %v3128_v57 = vadd.f32 %v3127_v6, %v3071_v12 }
0x1141   :  { %v4264_v30 = vpop.f32.mrf.mxu1 }
0x1142   :  { %v3149_v58 = vmax.f32 %v3128_v57, 0.0 }
0x1143   :  { %v3130_v43 = vpop.f32.mrf.mxu1 }
0x1144   :  { %v3131_v52 = vadd.f32 %v3130_v43, %v3071_v12 }
0x1145   :  { %v4265_v23 = vpop.f32.mrf.mxu1 }
0x1146   :  { %v3150_v20 = vmax.f32 %v3131_v52, 0.0 }
0x1147   :  { %v3135_v31 = vpop.f32.mrf.mxu1 }
0x1148   :  { %v3154_v44 = vpack.c.bf16 %v3150_v20, %v3149_v58  ;;  %v3136_v15 = vadd.f32 %v3135_v31, %v3071_v12 }
0x1149   :  { %v4268_v47 = vpop.f32.mrf.mxu1 }
0x114a   :  { %4291 = vmatmul.mubr.bf16.vlgmr.msra.gmra.mxu0 %v3154_v44  ;;  %v3151_v41 = vmax.f32 %v3136_v15, 0.0 }
0x114b   :  { %v3138_v50 = vpop.f32.mrf.mxu1  ;;  %4294 = vmatprep.mubr.msk.bf16.mxu0 %vm4644_vm0, %v4643_v0 }
0x114c   :  { %v3139_v24 = vadd.f32 %v3138_v50, %v3071_v12 }
0x114d   :  { %v4269_v60 = vpop.f32.mrf.mxu1 }
0x114e   :  { %v3152_v62 = vmax.f32 %v3139_v24, 0.0 }
0x1150   :  { %v3155_v29 = vpack.c.bf16 %v3152_v62, %v3151_v41 }
0x1152   :  { %v3143_v13 = vpop.f32.mrf.mxu1  ;;  %4295 = vmatmul.mubr.bf16.gmra.mxu0 %v3155_v29 }
0x1153   :  { %v3144_v51 = vadd.f32 %v3143_v13, %v3071_v12  ;;  %4298 = vmatprep.mubr.msk.bf16.mxu0 %vm4644_vm0, %v4643_v0 }
0x1154   :  { %v4272_v45 = vpop.f32.mrf.mxu1 }
0x1155   :  { %v3153_v59 = vmax.f32 %v3144_v51, 0.0 }
0x1156   :  { %v3146_v11 = vpop.f32.mrf.mxu1 }
0x1157   :  { %v3156_v18 = vpack.c.bf16 %v3153_v59, %v3153_v59 }
0x1158   :  { %v4273_v5 = vpop.f32.mrf.mxu1 }
0x115a   :  { %4299 = vmatmul.mubr.bf16.gmra.mxu0 %v3156_v18 }
0x120a   :  { %v3243_v10 = vpop.f32.mrf.mxu0 }
0x120b   :  { %v3244_v35 = vadd.f32 %v3243_v10, %v3160_v16 }
0x120c   :  { %v4292_v3 = vpop.f32.mrf.mxu0 }
0x120d   :  { %v6173_v42 = vadd.f32 %v3244_v35, %v6122_v9 }
0x120e   :  { %v3246_v25 = vpop.f32.mrf.mxu0 }
0x120f   :  { %v3247_v7 = vadd.f32 %v3246_v25, %v3160_v16  ;;  %v3270_v48 = vsel %vm240_vm2, %v6173_v42, 0.0  ;;  %v3290_v14 = vmul.f32 %v6173_v42, %v6173_v42 }
0x1210   :  { %3271 = vadd.xlane.f32.xlu0 %v3270_v48  ;;  %v4293_v32 = vpop.f32.mrf.mxu0 }
0x1211   :  { %v6180_v36 = vadd.f32 %v3247_v7, %v6124_v53  ;;  %v3295_v4 = vsel %vm240_vm2, %v3290_v14, 0.0 }
0x1212   :  { %v3251_v46 = vpop.f32.mrf.mxu0 }
0x1213   :  { %v3252_v28 = vadd.f32 %v3251_v46, %v3160_v16  ;;  %v3273_v49 = vsel %vm240_vm2, %v6180_v36, 0.0  ;;  %v3291_v19 = vmul.f32 %v6180_v36, %v6180_v36 }
0x1214   :  { %3296 = vadd.xlane.f32.xlu0 %v3295_v4  ;;  %v4296_v34 = vpop.f32.mrf.mxu0 }
0x1215   :  { %v6191_v21 = vadd.f32 %v3252_v28, %v6134_v56  ;;  %v3298_v17 = vsel %vm240_vm2, %v3291_v19, 0.0 }
0x1216   :  { %v3254_v9 = vpop.f32.mrf.mxu0 }
0x1217   :  { %v3255_v2 = vadd.f32 %v3254_v9, %v3160_v16  ;;  %v3276_v8 = vsel %vm240_vm2, %v6191_v21, 0.0 }
0x1218   :  { %3274 = vadd.xlane.f32.xlu0 %v3273_v49  ;;  %v4297_v61 = vpop.f32.mrf.mxu0 }
0x1219   :  { %v6188_v39 = vadd.f32 %v3255_v2, %v6136_v33  ;;  %v3292_v33 = vmul.f32 %v6191_v21, %v6191_v21 }
0x121a   :  { %v3259_v53 = vpop.f32.mrf.mxu0 }
0x121b   :  { %v3279_v38 = vsel %vm240_vm2, %v6188_v39, 0.0  ;;  %v3260_v26 = vadd.f32 %v3259_v53, %v3160_v16  ;;  %v3301_v56 = vsel %vm240_vm2, %v3292_v33, 0.0  ;;  %v3293_v63 = vmul.f32 %v6188_v39, %v6188_v39 }
0x121c   :  { %3299 = vadd.xlane.f32.xlu0 %v3298_v17  ;;  %3280 = vadd.xlane.f32.xlu1 %v3279_v38  ;;  %v4300_v55 = vpop.f32.mrf.mxu0 }
0x121d   :  { %v6204_v12 = vadd.f32 %v3260_v26, %v6145_v54  ;;  %v3304_v6 = vsel %vm240_vm2, %v3293_v63, 0.0 }
0x121e   :  { %v3262_v22 = vpop.f32.mrf.mxu0 }
0x121f   :  { %v3282_v30 = vsel %vm1402_vm14, %v6204_v12, 0.0  ;;  %v3294_v57 = vmul.f32 %v6204_v12, %v6204_v12 }
0x1220   :  { %3277 = vadd.xlane.f32.xlu0 %v3276_v8  ;;  %v4301_v27 = vpop.f32.mrf.mxu0 }
0x1221   :  { %v3307_v43 = vsel %vm1402_vm14, %v3294_v57, 0.0 }
0x1224   :  { %3302 = vadd.xlane.f32.xlu0 %v3301_v56 }
0x1228   :  { %3305 = vadd.xlane.f32.xlu0 %v3304_v6 }
0x122c   :  { %3283 = vadd.xlane.f32.xlu0 %v3282_v30 }
0x122d   :  { %3353 = vrot.lane.b32.xlu1 %v6092_v40, %s4657_s26 }
0x1230   :  { %3308 = vadd.xlane.f32.xlu0 %v3307_v43 }
0x1246   :  { %3345 = vrot.lane.b32.xlu0 %v6092_v40, %s4652_s21 }
0x1299   :  { %v3272_v54 = vpop.xlane.xlu0 %3271 }
0x129a   :  { %v3285_v52 = vmul.f32 0.03125, %v3272_v54 }
0x129c   :  { %v3320_v20 = vmul.f32 %v3285_v52, %v3285_v52  ;;  %v3315_v4 = vsub.f32 %v6173_v42, %v3285_v52 }
0x129d   :  { %v3297_v23 = vpop.xlane.xlu0 %3296 }
0x129e   :  { %v3310_v58 = vmul.f32 0.03125, %v3297_v23 }
0x12a0   :  { %v3325_v47 = vsub.f32 %v3310_v58, %v3320_v20 }
0x12a1   :  { %v3275_v31 = vpop.xlane.xlu0 %3274 }
0x12a2   :  { %v3286_v44 = vmul.f32 0.03125, %v3275_v31  ;;  %v3330_v60 = vadd.f32 1e-05, %v3325_v47 }
0x12a4   :  { %v3321_v50 = vmul.f32 %v3286_v44, %v3286_v44  ;;  %4619 = vrsqrt.f32 %v3330_v60  ;;  %v3316_v34 = vsub.f32 %v6180_v36, %v3286_v44 }
0x12a5   :  { %v3300_v15 = vpop.xlane.xlu0 %3299  ;;  %v3281_v51 = vpop.xlane.xlu1 %3280 }
0x12a6   :  { %v3311_v24 = vmul.f32 0.03125, %v3300_v15  ;;  %v3288_v45 = vmul.f32 0.03125, %v3281_v51  ;;  %v4427_v51 = vld [vmem:[%s6315_s7 + $0x8] sm:$0xff]  }
0x12a7   :  { %4303 = vmatpush3.bf16.msra.mxu1 %v4427_v51 }
0x12a8   :  { %v3326_v41 = vsub.f32 %v3311_v24, %v3321_v50  ;;  %v3323_v16 = vmul.f32 %v3288_v45, %v3288_v45  ;;  %v3318_v63 = vsub.f32 %v6188_v39, %v3288_v45  ;;  %4304 = vmatprep.subr.bf16.mxu1 %v4643_v0 }
0x12a9   :  { %v3278_v62 = vpop.xlane.xlu0 %3277  ;;  %v3354_v53 = vpop.permute.xlu1 %3353 }
0x12aa   :  { %v3331_v29 = vadd.f32 1e-05, %v3326_v41  ;;  %v3287_v13 = vmul.f32 0.03125, %v3278_v62 }
0x12ac   :  { %4621 = vrsqrt.f32 %v3331_v29  ;;  %v3322_v59 = vmul.f32 %v3287_v13, %v3287_v13  ;;  %v3317_v42 = vsub.f32 %v6191_v21, %v3287_v13 }
0x12ad   :  { %v3303_v40 = vpop.xlane.xlu0 %3302 }
0x12ae   :  { %v3312_v11 = vmul.f32 0.03125, %v3303_v40  ;;  %v6263_v40 = vld [vmem:[%s6316_s8] sm:$0x3] }
0x12af   :  { %v6267_v45 = vrot.slane %v6263_v40, %v4800_v37 }
0x12b0   :  { %v3327_v18 = vsub.f32 %v3312_v11, %v3322_v59  ;;  %v4428_v59 = vld [vmem:[%s6315_s7] sm:$0xff]  }
0x12b1   :  { %v3306_v5 = vpop.xlane.xlu0 %3305  ;;  %v4620_v14 = vpop.eup %4619  ;;  %4305 = vmatpush3.bf16.msra.mxu1 %v4428_v59 }
0x12b2   :  { %v3332_v10 = vadd.f32 1e-05, %v3327_v18  ;;  %v3313_v35 = vmul.f32 0.03125, %v3306_v5  ;;  %v3340_v19 = vmul.f32 %v4620_v14, %v3315_v4 }
0x12b4   :  { %4623 = vrsqrt.f32 %v3332_v10  ;;  %v3328_v3 = vsub.f32 %v3313_v35, %v3323_v16 }
0x12b5   :  { %v3284_v25 = vpop.xlane.xlu0 %3283 }
0x12b6   :  { %v3333_v7 = vadd.f32 1e-05, %v3328_v3  ;;  %v3289_v48 = vmul.f32 0.03125, %v3284_v25 }
0x12b8   :  { %4625 = vrsqrt.f32 %v3333_v7  ;;  %v3324_v9 = vmul.f32 %v3289_v48, %v3289_v48  ;;  %v3319_v20 = vsub.f32 %v6204_v12, %v3289_v48 }
0x12b9   :  { %v4622_v32 = vpop.eup %4621  ;;  %v3309_v46 = vpop.xlane.xlu0 %3308 }
0x12ba   :  { %v3314_v28 = vmul.f32 0.03125, %v3309_v46  ;;  %v3341_v49 = vmul.f32 %v4622_v32, %v3316_v34 }
0x12bc   :  { %v3329_v2 = vsub.f32 %v3314_v28, %v3324_v9 }
0x12bd   :  { %v3346_v61 = vpop.permute.xlu0 %3345 }
0x12be   :  { %v3334_v17 = vadd.f32 1e-05, %v3329_v2  ;;  %v3349_v38 = vmul.f32 %v3346_v61, %v3341_v49  ;;  %v3348_v55 = vmul.f32 %v3346_v61, %v3340_v19 }
0x12c0   :  { %4627 = vrsqrt.f32 %v3334_v17  ;;  %v6218_v22 = vadd.f32 %v3354_v53, %v3349_v38  ;;  %v6220_v8 = vadd.f32 %v3354_v53, %v3348_v55 }
0x12c1   :  { %v4624_v33 = vpop.eup %4623 }
0x12c2   :  { %v3365_v36 = vsel %vm240_vm2, %v6218_v22, 0.0  ;;  %v3362_v27 = vsel %vm240_vm2, %v6220_v8, 0.0  ;;  %v3382_v26 = vmul.f32 %v6220_v8, %v6220_v8  ;;  %v3342_v56 = vmul.f32 %v4624_v33, %v3317_v42 }
0x12c3   :  { %3366 = vadd.xlane.f32.xlu1 %v3365_v36  ;;  %3363 = vadd.xlane.f32.xlu0 %v3362_v27  ;;  %v3383_v21 = vmul.f32 %v6218_v22, %v6218_v22 }
0x12c4   :  { %v3387_v57 = vsel %vm240_vm2, %v3382_v26, 0.0  ;;  %v3350_v43 = vmul.f32 %v3346_v61, %v3342_v56 }
0x12c5   :  { %v4626_v6 = vpop.eup %4625  ;;  %v3390_v52 = vsel %vm240_vm2, %v3383_v21, 0.0 }
0x12c6   :  { %v3343_v30 = vmul.f32 %v4626_v6, %v3318_v63  ;;  %v6236_v58 = vadd.f32 %v3354_v53, %v3350_v43 }
0x12c7   :  { %3388 = vadd.xlane.f32.xlu0 %v3387_v57 }
0x12c8   :  { %v3351_v54 = vmul.f32 %v3346_v61, %v3343_v30  ;;  %v3368_v15 = vsel %vm240_vm2, %v6236_v58, 0.0  ;;  %v3384_v50 = vmul.f32 %v6236_v58, %v6236_v58 }
0x12ca   :  { %v6234_v23 = vadd.f32 %v3354_v53, %v3351_v54  ;;  %v3393_v60 = vsel %vm240_vm2, %v3384_v50, 0.0 }
0x12cb   :  { %3391 = vadd.xlane.f32.xlu0 %v3390_v52 }
0x12cc   :  { %v3385_v39 = vmul.f32 %v6234_v23, %v6234_v23  ;;  %v3371_v29 = vsel %vm240_vm2, %v6234_v23, 0.0 }
0x12cd   :  { %v4628_v31 = vpop.eup %4627 }
0x12ce   :  { %v3344_v44 = vmul.f32 %v4628_v31, %v3319_v20  ;;  %v3396_v47 = vsel %vm240_vm2, %v3385_v39, 0.0 }
0x12cf   :  { %3397 = vadd.xlane.f32.xlu1 %v3396_v47  ;;  %3369 = vadd.xlane.f32.xlu0 %v3368_v15 }
0x12d0   :  { %v3352_v24 = vmul.f32 %v3346_v61, %v3344_v44 }
0x12d2   :  { %v6247_v41 = vadd.f32 %v3354_v53, %v3352_v24 }
0x12d3   :  { %3394 = vadd.xlane.f32.xlu0 %v3393_v60 }
0x12d4   :  { %v3386_v12 = vmul.f32 %v6247_v41, %v6247_v41  ;;  %v3374_v13 = vsel %vm1402_vm14, %v6247_v41, 0.0 }
0x12d6   :  { %v3399_v62 = vsel %vm1402_vm14, %v3386_v12, 0.0 }
0x12d7   :  { %3400 = vadd.xlane.f32.xlu1 %v3399_v62  ;;  %3372 = vadd.xlane.f32.xlu0 %v3371_v29 }
0x12db   :  { %3375 = vadd.xlane.f32.xlu0 %v3374_v13 }
0x12f1   :  { %3447 = vrot.lane.b32.xlu0 %v6267_v45, %s4645_s15 }
0x134c   :  { %v3364_v11 = vpop.xlane.xlu0 %3363  ;;  %v3367_v5 = vpop.xlane.xlu1 %3366 }
0x134d   :  { %v3377_v18 = vmul.f32 0.03125, %v3364_v11  ;;  %v3378_v10 = vmul.f32 0.03125, %v3367_v5 }
0x134f   :  { %v3412_v35 = vmul.f32 %v3377_v18, %v3377_v18  ;;  %v3413_v48 = vmul.f32 %v3378_v10, %v3378_v10  ;;  %v3407_v38 = vsub.f32 %v6220_v8, %v3377_v18  ;;  %v3408_v6 = vsub.f32 %v6218_v22, %v3378_v10 }
0x1350   :  { %v3389_v16 = vpop.xlane.xlu0 %3388 }
0x1351   :  { %v3402_v3 = vmul.f32 0.03125, %v3389_v16 }
0x1353   :  { %v3417_v25 = vsub.f32 %v3402_v3, %v3412_v35  ;;  %v3465_v35 = vrot.slane %v6263_v40, %v5431_v1 }
0x1354   :  { %v3392_v7 = vpop.xlane.xlu0 %3391 }
0x1355   :  { %v3422_v37 = vadd.f32 1e-05, %v3417_v25  ;;  %v3403_v14 = vmul.f32 0.03125, %v3392_v7 }
0x1357   :  { %4629 = vrsqrt.f32 %v3422_v37  ;;  %v3418_v32 = vsub.f32 %v3403_v14, %v3413_v48 }
0x1358   :  { %v3370_v46 = vpop.xlane.xlu0 %3369  ;;  %v3398_v19 = vpop.xlane.xlu1 %3397 }
0x1359   :  { %v3423_v4 = vadd.f32 1e-05, %v3418_v32  ;;  %v3379_v34 = vmul.f32 0.03125, %v3370_v46  ;;  %v3405_v55 = vmul.f32 0.03125, %v3398_v19 }
0x135b   :  { %4631 = vrsqrt.f32 %v3423_v4  ;;  %v3414_v28 = vmul.f32 %v3379_v34, %v3379_v34  ;;  %v3409_v22 = vsub.f32 %v6236_v58, %v3379_v34 }
0x135c   :  { %v3395_v9 = vpop.xlane.xlu0 %3394 }
0x135d   :  { %v3404_v2 = vmul.f32 0.03125, %v3395_v9 }
0x135f   :  { %v3419_v49 = vsub.f32 %v3404_v2, %v3414_v28 }
0x1360   :  { %v3373_v61 = vpop.xlane.xlu0 %3372  ;;  %v3401_v36 = vpop.xlane.xlu1 %3400 }
0x1361   :  { %v3424_v53 = vadd.f32 1e-05, %v3419_v49  ;;  %v3380_v17 = vmul.f32 0.03125, %v3373_v61  ;;  %v3406_v30 = vmul.f32 0.03125, %v3401_v36 }
0x1363   :  { %4633 = vrsqrt.f32 %v3424_v53  ;;  %v3415_v33 = vmul.f32 %v3380_v17, %v3380_v17  ;;  %v3410_v60 = vsub.f32 %v6234_v23, %v3380_v17 }
0x1364   :  { %v4630_v42 = vpop.eup %4629  ;;  %v3376_v27 = vpop.xlane.xlu0 %3375 }
0x1365   :  { %v3420_v26 = vsub.f32 %v3405_v55, %v3415_v33  ;;  %v3381_v56 = vmul.f32 0.03125, %v3376_v27  ;;  %v3432_v63 = vmul.f32 %v4630_v42, %v3407_v38 }
0x1367   :  { %v3425_v57 = vadd.f32 1e-05, %v3420_v26  ;;  %v3416_v21 = vmul.f32 %v3381_v56, %v3381_v56  ;;  %v3441_v8 = vmul.f32 %v6267_v45, %v3432_v63  ;;  %v3411_v51 = vsub.f32 %v6247_v41, %v3381_v56 }
0x1368   :  { %v4632_v43 = vpop.eup %4631  ;;  %v3448_v20 = vpop.permute.xlu0 %3447 }
0x1369   :  { %4635 = vrsqrt.f32 %v3425_v57  ;;  %v3421_v54 = vsub.f32 %v3406_v30, %v3416_v21  ;;  %v3433_v52 = vmul.f32 %v4632_v43, %v3408_v6  ;;  %v3450_v44 = vadd.f32 %v3448_v20, %v3441_v8 }
0x136b   :  { %v3426_v39 = vadd.f32 1e-05, %v3421_v54  ;;  %v3442_v31 = vmul.f32 %v6267_v45, %v3433_v52 }
0x136d   :  { %4637 = vrsqrt.f32 %v3426_v39  ;;  %v3451_v47 = vadd.f32 %v3448_v20, %v3442_v31 }
0x136f   :  { %v3455_v15 = vpack.c.bf16 %v3451_v47, %v3450_v44 }
0x1370   :  { %v4634_v50 = vpop.eup %4633 }
0x1371   :  { %4307 = vmatmul.mubr.msk.bf16.vlgmr.msra.gmra.mxu1 %vm240_vm2, %v3455_v15  ;;  %v3434_v24 = vmul.f32 %v4634_v50, %v3409_v22 }
0x1372   :  { %4310 = vmatprep.mubr.msk.bf16.mxu1 %vm4644_vm0, %v4643_v0 }
0x1373   :  { %v3443_v29 = vmul.f32 %v6267_v45, %v3434_v24 }
0x1375   :  { %v3452_v18 = vadd.f32 %v3448_v20, %v3443_v29 }
0x1376   :  { %v4636_v12 = vpop.eup %4635 }
0x1377   :  { %v3435_v62 = vmul.f32 %v4636_v12, %v3410_v60 }
0x1379   :  { %v3444_v13 = vmul.f32 %v6267_v45, %v3435_v62 }
0x137a   :  { %v4638_v59 = vpop.eup %4637 }
0x137b   :  { %v3436_v11 = vmul.f32 %v4638_v59, %v3411_v51  ;;  %v3453_v58 = vadd.f32 %v3448_v20, %v3444_v13 }
0x137d   :  { %v3445_v5 = vmul.f32 %v6267_v45, %v3436_v11  ;;  %v3456_v16 = vpack.c.bf16 %v3453_v58, %v3452_v18 }
0x137f   :  { %4311 = vmatmul.mubr.msk.bf16.gmra.mxu1 %vm240_vm2, %v3456_v16  ;;  %v3454_v23 = vadd.f32 %v3448_v20, %v3445_v5 }
0x1380   :  { %4314 = vmatprep.mubr.msk.bf16.mxu1 %vm4644_vm0, %v4643_v0 }
0x1381   :  { %v3457_v10 = vpack.c.bf16 %v3454_v23, %v3454_v23 }
0x1387   :  { %4315 = vmatmul.mubr.msk.bf16.gmra.mxu1 %vm240_vm2, %v3457_v10 }
0x1431   :  { %v3521_v41 = vpop.f32.mrf.mxu1 }
0x1432   :  { %v3522_v3 = vadd.f32 %v3521_v41, %v3465_v35 }
0x1433   :  { %v4308_v25 = vpop.f32.mrf.mxu1 }
0x1434   :  { %3543 = vst [vmem:[%s6317_s9] sm:$0xff] %v3522_v3 }
0x1435   :  { %v3524_v45 = vpop.f32.mrf.mxu1 }
0x1436   :  { %v3525_v7 = vadd.f32 %v3524_v45, %v3465_v35 }
0x1437   :  { %v4309_v48 = vpop.f32.mrf.mxu1 }
0x1438   :  { %3544 = vst [vmem:[%s6317_s9 + $0x8] sm:$0xff] %v3525_v7 }
0x143f   :  { %v3529_v0 = vpop.f32.mrf.mxu1 }
0x1440   :  { %v3530_v37 = vadd.f32 %v3529_v0, %v3465_v35 }
0x1441   :  { %v4312_v14 = vpop.f32.mrf.mxu1 }
0x1442   :  { %3545 = vst [vmem:[%s6317_s9 + $0x10] sm:$0xff] %v3530_v37 }
0x1443   :  { %v3532_v1 = vpop.f32.mrf.mxu1 }
0x1444   :  { %v3533_v40 = vadd.f32 %v3532_v1, %v3465_v35 }
0x1445   :  { %v4313_v32 = vpop.f32.mrf.mxu1 }
0x1446   :  { %3546 = vst [vmem:[%s6317_s9 + $0x18] sm:$0xff] %v3533_v40 }
0x1447   :  { %v3537_v46 = vpop.f32.mrf.mxu1 }
0x1448   :  { %v3538_v4 = vadd.f32 %v3537_v46, %v3465_v35 }
0x1449   :  { %v4316_v34 = vpop.f32.mrf.mxu1 }
0x144a   :  { %3547 = vst [vmem:[%s6317_s9 + $0x20] sm:$0x3] %v3538_v4 }
0x144b   :  { %v3540_v9 = vpop.f32.mrf.mxu1 }
0x144d   :  { %v4317_v28 = vpop.f32.mrf.mxu1 }

</bundles_post_ra>
